<compile_context>
chip_gen: v5e
topology: v5e:2x2
jax: 0.10.0
libtpu: 0.0.40
codegen_flags: <defaults>
</compile_context>

<pallas_src>
import jax
import jax.numpy as jnp
from jax.experimental import pallas as pl
from jax.experimental.pallas import tpu as pltpu

LANE = 128          # channel padding -> lane-dense vregs / full MXU columns
MAX_ROW_TILE = 256  # target rows per grid step


def _round_up(x, m):
    return ((x + m - 1) // m) * m


def _row_tiling(n):
    """Pad a row count to a layout-friendly size and pick the per-step tile."""
    n_p = _round_up(n, 8)
    if n_p <= MAX_ROW_TILE:
        return n_p, n_p                      # single grid step
    n_p = _round_up(n_p, MAX_ROW_TILE)
    return n_p, MAX_ROW_TILE


def _pad2(a, rows, cols):
    return jnp.pad(a, ((0, rows - a.shape[0]), (0, cols - a.shape[1])))


# ----------------------------------------------------------------- kernel ---
def _allset_block_kernel(x_ref, inc_ref, w1_ref, w2_ref, wc_ref,
                         wd1_ref, wd2_ref, out_ref, msg_ref):
    """Fused AllSetBlock forward for one tile of target rows.

    msg = relu(relu(x @ We1) @ We2) @ Wconv        (computed once, cached bf16)
    agg = (inc_tile @ msg) / row_degree            (aggr_norm)
    out = relu(relu(relu(agg) @ Wd1) @ Wd2)        (conv relu + decoder MLP)
    """
    # Source-side messages: computed on the first grid step only and cached in
    # VMEM scratch.  Requires "arbitrary" semantics on the row-tile grid axis
    # so the scratch carry is sequential.
    @pl.when(pl.program_id(0) == 0)
    def _():
        h = jnp.dot(x_ref[...], w1_ref[...], preferred_element_type=jnp.float32)
        h = jnp.maximum(h, 0.0)                         # encoder hidden ReLU
        h = jnp.dot(h, w2_ref[...], preferred_element_type=jnp.float32)
        h = jnp.maximum(h, 0.0)                         # F.relu(encoder(x))
        msg = jnp.dot(h, wc_ref[...], preferred_element_type=jnp.float32)
        msg_ref[...] = msg.astype(msg_ref.dtype)        # cache as bf16

    inc = inc_ref[...]                                  # [tile_t, n_src] bf16
    agg = jnp.dot(inc, msg_ref[...], preferred_element_type=jnp.float32)

    # aggr_norm: divide by row degree.  Degrees are exact small integers even
    # in bf16; clamp so padded (all-zero) rows give 0 instead of NaN.
    deg = jnp.sum(inc.astype(jnp.float32), axis=1, keepdims=True)
    inv_deg = pl.reciprocal(jnp.maximum(deg, 1.0), approx=True)
    h = jnp.maximum(agg * inv_deg, 0.0)                 # conv update_func='relu'

    d = jnp.dot(h, wd1_ref[...], preferred_element_type=jnp.float32)
    d = jnp.maximum(d, 0.0)                             # decoder hidden ReLU
    d = jnp.dot(d, wd2_ref[...], preferred_element_type=jnp.float32)
    out_ref[...] = jnp.maximum(d, 0.0)                  # F.relu(decoder(x))


# --------------------------------------------------------------- wrappers ---
def _allset_block(x_p, inc_p, w_p, tile_t):
    """One AllSetBlock forward on padded operands.

    x_p:   [n_src_p, c_in_p]   float32   padded source features
    inc_p: [n_tgt_p, n_src_p]  bfloat16  padded dense incidence (targets first)
    w_p:   dict of padded float32 weights
    """
    n_src_p, c_in_p = x_p.shape
    n_tgt_p = inc_p.shape[0]
    hidden_p = w_p["w_conv"].shape[1]

    def full(shape):
        return pl.BlockSpec(shape, lambda i: (0,) * len(shape))

    return pl.pallas_call(
        _allset_block_kernel,
        out_shape=jax.ShapeDtypeStruct((n_tgt_p, hidden_p), jnp.float32),
        grid_spec=pltpu.PrefetchScalarGridSpec(
            num_scalar_prefetch=0,
            grid=(n_tgt_p // tile_t,),
            in_specs=[
                full((n_src_p, c_in_p)),                            # x (resident)
                pl.BlockSpec((tile_t, n_src_p), lambda i: (i, 0)),  # incidence tile
                full(w_p["w_enc1"].shape),
                full(w_p["w_enc2"].shape),
                full(w_p["w_conv"].shape),
                full(w_p["w_dec1"].shape),
                full(w_p["w_dec2"].shape),
            ],
            out_specs=pl.BlockSpec((tile_t, hidden_p), lambda i: (i, 0)),
            scratch_shapes=[pltpu.VMEM((n_src_p, hidden_p), jnp.bfloat16)],
        ),
        compiler_params=pltpu.CompilerParams(
            # "arbitrary": message scratch is written at step 0 and read by
            # later steps, so the row-tile axis must execute sequentially.
            dimension_semantics=("arbitrary",),
            vmem_limit_bytes=48 << 20,  # headroom on all of v5e/v6e/v7x
        ),
    )(x_p, inc_p, w_p["w_enc1"], w_p["w_enc2"], w_p["w_conv"],
      w_p["w_dec1"], w_p["w_dec2"])


def _pad_block_params(p, c_in_p, hidden_p):
    return {
        "w_enc1": _pad2(p["w_enc1"], c_in_p, hidden_p),
        "w_enc2": _pad2(p["w_enc2"], hidden_p, hidden_p),
        "w_conv": _pad2(p["w_conv"], hidden_p, hidden_p),
        "w_dec1": _pad2(p["w_dec1"], hidden_p, hidden_p),
        "w_dec2": _pad2(p["w_dec2"], hidden_p, hidden_p),
    }


@jax.jit
def allset_layer(x, incidence_1, params):
    """AllSetLayer forward (eval mode): vertex2edge with B1^T, edge2vertex with B1."""
    if x.shape[-2] != incidence_1.shape[-2]:
        raise ValueError(
            f"Shape of incidence matrix ({incidence_1.shape}) does not have "
            f"the correct number of nodes ({x.shape[0]}).")

    n_nodes, c_in = x.shape
    n_edges = incidence_1.shape[1]
    hidden = params["vertex2edge"]["w_conv"].shape[1]

    c_in_p = _round_up(c_in, LANE)
    hidden_p = _round_up(hidden, LANE)
    n_nodes_p, tile_nodes = _row_tiling(n_nodes)
    n_edges_p, tile_edges = _row_tiling(n_edges)

    # Pad features / weights; build both incidence orientations once, fused
    # with the f32 -> bf16 cast (incidence entries are 0/1 -> lossless).
    x_p = _pad2(x, n_nodes_p, c_in_p)
    inc_bf16 = incidence_1.astype(jnp.bfloat16)
    inc_v2e = _pad2(inc_bf16.T, n_edges_p, n_nodes_p)   # targets = hyperedges
    inc_e2v = _pad2(inc_bf16, n_nodes_p, n_edges_p)     # targets = nodes
    p_v2e = _pad_block_params(params["vertex2edge"], c_in_p, hidden_p)
    p_e2v = _pad_block_params(params["edge2vertex"], hidden_p, hidden_p)

    # Layer-level dropouts are identity in eval mode.
    e = _allset_block(x_p, inc_v2e, p_v2e, tile_edges)   # [n_edges_p, hidden_p]
    v = _allset_block(e, inc_e2v, p_e2v, tile_nodes)     # [n_nodes_p, hidden_p]
    return v[:n_nodes, :hidden]


# -------------------------------------------------------------- reference ---
def _block_ref(x, incidence, p):
    hp = "highest"
    h = jnp.maximum(jnp.dot(x, p["w_enc1"], precision=hp), 0.0)
    h = jnp.maximum(jnp.dot(h, p["w_enc2"], precision=hp), 0.0)
    msg = jnp.dot(h, p["w_conv"], precision=hp)
    agg = jnp.dot(incidence, msg, precision=hp)
    agg = agg / jnp.sum(incidence, axis=1, keepdims=True)
    h = jnp.maximum(agg, 0.0)
    d = jnp.maximum(jnp.dot(h, p["w_dec1"], precision=hp), 0.0)
    d = jnp.maximum(jnp.dot(d, p["w_dec2"], precision=hp), 0.0)
    return d


def _layer_ref(x, incidence_1, params):
    e = _block_ref(x, incidence_1.T, params["vertex2edge"])
    return _block_ref(e, incidence_1, params["edge2vertex"])


# ------------------------------------------------------------------- main ---
def _make_block_params(key, c_in, hidden):
    ks = jax.random.split(key, 5)

    def w(k, fan_in, fan_out):
        return (jax.random.normal(k, (fan_in, fan_out), jnp.float32)
                / jnp.sqrt(jnp.float32(fan_in)))

    return {
        "w_enc1": w(ks[0], c_in, hidden),
        "w_enc2": w(ks[1], hidden, hidden),
        "w_conv": w(ks[2], hidden, hidden),
        "w_dec1": w(ks[3], hidden, hidden),
        "w_dec2": w(ks[4], hidden, hidden),
    }


if __name__ == "__main__":
    # Small, deliberately non-aligned shapes to exercise padding and a >1 grid.
    n_nodes, n_edges = 300, 120
    in_channels, hidden_channels = 12, 64

    key = jax.random.PRNGKey(0)
    k_x, k_inc, k_v2e, k_e2v = jax.random.split(key, 4)

    x = jax.random.normal(k_x, (n_nodes, in_channels), jnp.float32)

    # Dense incidence B1 [n_nodes, n_edges]; guarantee every node is in at
    # least one hyperedge and every hyperedge has at least one node so the
    # aggr_norm degree is never zero on real rows.
    inc = (jax.random.uniform(k_inc, (n_nodes, n_edges)) < 0.4).astype(jnp.float32)
    rows = jnp.arange(n_nodes)
    inc = inc.at[rows, rows % n_edges].set(1.0)

    params = {
        "vertex2edge": _make_block_params(k_v2e, in_channels, hidden_channels),
        "edge2vertex": _make_block_params(k_e2v, hidden_channels, hidden_channels),
    }

    out = allset_layer(x, inc, params)
    out = jax.block_until_ready(out)

    ref = _layer_ref(x, inc, params)
    assert out.shape == (n_nodes, hidden_channels)
    # Slightly looser tolerance than pure-f32: the aggregation path uses bf16
    # incidence/messages and an approximate reciprocal for aggr_norm.
    err = float(jnp.max(jnp.abs(out - ref)))
    assert jnp.allclose(out, ref, rtol=3e-2, atol=3e-2), f"mismatch vs reference: {err}"

    print("KERNEL_OK")
</pallas_src>

<mosaic_0001>
module attributes {stable_mosaic.version = 11 : i64} {
  func.func @_allset_block_kernel(%arg0: i32, %arg1: memref<512x128xf32, #tpu.memory_space<vmem>>, %arg2: memref<120x512xbf16, #tpu.memory_space<vmem>>, %arg3: memref<128x128xf32, #tpu.memory_space<vmem>>, %arg4: memref<128x128xf32, #tpu.memory_space<vmem>>, %arg5: memref<128x128xf32, #tpu.memory_space<vmem>>, %arg6: memref<128x128xf32, #tpu.memory_space<vmem>>, %arg7: memref<128x128xf32, #tpu.memory_space<vmem>>, %arg8: memref<120x128xf32, #tpu.memory_space<vmem>>, %arg9: memref<512x128xbf16, #tpu.memory_space<vmem>>) attributes {dimension_semantics = [#tpu.dimension_semantics<arbitrary>], iteration_bounds = array<i64: 1>, scalar_prefetch = 0 : i64, scratch_operands = 1 : i64, tpu.core_type = #tpu.core_type<tc>, window_params = [{pipeline_mode = #tpu.pipeline_mode<synchronous>, transform_indices = @transform_0, window_bounds = array<i64: 512, 128>}, {transform_indices = @transform_1, window_bounds = array<i64: 120, 512>}, {pipeline_mode = #tpu.pipeline_mode<synchronous>, transform_indices = @transform_2, window_bounds = array<i64: 128, 128>}, {pipeline_mode = #tpu.pipeline_mode<synchronous>, transform_indices = @transform_3, window_bounds = array<i64: 128, 128>}, {pipeline_mode = #tpu.pipeline_mode<synchronous>, transform_indices = @transform_4, window_bounds = array<i64: 128, 128>}, {pipeline_mode = #tpu.pipeline_mode<synchronous>, transform_indices = @transform_5, window_bounds = array<i64: 128, 128>}, {pipeline_mode = #tpu.pipeline_mode<synchronous>, transform_indices = @transform_6, window_bounds = array<i64: 128, 128>}, {transform_indices = @transform_7, window_bounds = array<i64: 120, 128>}]} {
    %c0_i32 = arith.constant 0 : i32
    %0 = arith.cmpi eq, %arg0, %c0_i32 : i32
    %1 = arith.extui %0 : i1 to i32
    %c0_i32_0 = arith.constant 0 : i32
    %2 = arith.cmpi ne, %1, %c0_i32_0 : i32
    scf.if %2 {
      %c0_17 = arith.constant 0 : index
      %c0_18 = arith.constant 0 : index
      %25 = vector.load %arg1[%c0_17, %c0_18] : memref<512x128xf32, #tpu.memory_space<vmem>>, vector<512x128xf32>
      %c0_19 = arith.constant 0 : index
      %c0_20 = arith.constant 0 : index
      %26 = vector.load %arg3[%c0_19, %c0_20] : memref<128x128xf32, #tpu.memory_space<vmem>>, vector<128x128xf32>
      %cst_21 = arith.constant dense<0.000000e+00> : vector<512x128xf32>
      %27 = tpu.matmul %25, %26, %cst_21 {dimension_numbers = #tpu.dot_dimension_numbers<[1], [0], [0], [1], [0, 0, 1, 1], [], []>} : vector<512x128xf32>, vector<128x128xf32>, vector<512x128xf32> -> vector<512x128xf32>
      %cst_22 = arith.constant 0.000000e+00 : f32
      %28 = vector.broadcast %cst_22 : f32 to vector<512x128xf32>
      %29 = arith.maximumf %27, %28 : vector<512x128xf32>
      %c0_23 = arith.constant 0 : index
      %c0_24 = arith.constant 0 : index
      %30 = vector.load %arg4[%c0_23, %c0_24] : memref<128x128xf32, #tpu.memory_space<vmem>>, vector<128x128xf32>
      %cst_25 = arith.constant dense<0.000000e+00> : vector<512x128xf32>
      %31 = tpu.matmul %29, %30, %cst_25 {dimension_numbers = #tpu.dot_dimension_numbers<[1], [0], [0], [1], [0, 0, 1, 1], [], []>} : vector<512x128xf32>, vector<128x128xf32>, vector<512x128xf32> -> vector<512x128xf32>
      %cst_26 = arith.constant 0.000000e+00 : f32
      %32 = vector.broadcast %cst_26 : f32 to vector<512x128xf32>
      %33 = arith.maximumf %31, %32 : vector<512x128xf32>
      %c0_27 = arith.constant 0 : index
      %c0_28 = arith.constant 0 : index
      %34 = vector.load %arg5[%c0_27, %c0_28] : memref<128x128xf32, #tpu.memory_space<vmem>>, vector<128x128xf32>
      %cst_29 = arith.constant dense<0.000000e+00> : vector<512x128xf32>
      %35 = tpu.matmul %33, %34, %cst_29 {dimension_numbers = #tpu.dot_dimension_numbers<[1], [0], [0], [1], [0, 0, 1, 1], [], []>} : vector<512x128xf32>, vector<128x128xf32>, vector<512x128xf32> -> vector<512x128xf32>
      %36 = arith.truncf %35 : vector<512x128xf32> to vector<512x128xbf16>
      %c0_30 = arith.constant 0 : index
      %c0_31 = arith.constant 0 : index
      %37 = vector.load %arg9[%c0_30, %c0_31] : memref<512x128xbf16, #tpu.memory_space<vmem>>, vector<512x128xbf16>
      tpu.vector_store %arg9[%c0_30, %c0_31], %36 {strides = array<i32>} : memref<512x128xbf16, #tpu.memory_space<vmem>>, vector<512x128xbf16>,
    } else {
    }
    %c0 = arith.constant 0 : index
    %c0_1 = arith.constant 0 : index
    %3 = vector.load %arg2[%c0, %c0_1] : memref<120x512xbf16, #tpu.memory_space<vmem>>, vector<120x512xbf16>
    %c0_2 = arith.constant 0 : index
    %c0_3 = arith.constant 0 : index
    %4 = vector.load %arg9[%c0_2, %c0_3] : memref<512x128xbf16, #tpu.memory_space<vmem>>, vector<512x128xbf16>
    %cst = arith.constant dense<0.000000e+00> : vector<120x128xf32>
    %5 = tpu.matmul %3, %4, %cst {dimension_numbers = #tpu.dot_dimension_numbers<[1], [0], [0], [1], [0, 0, 1, 1], [], []>} : vector<120x512xbf16>, vector<512x128xbf16>, vector<120x128xf32> -> vector<120x128xf32>
    %6 = arith.extf %3 : vector<120x512xbf16> to vector<120x512xf32>
    %cst_4 = arith.constant dense<0.000000e+00> : vector<120xf32>
    %7 = vector.multi_reduction <add>, %6, %cst_4 [1] : vector<120x512xf32> to vector<120xf32>
    %8 = vector.shape_cast %7 : vector<120xf32> to vector<120x1xf32>
    %cst_5 = arith.constant 1.000000e+00 : f32
    %9 = vector.broadcast %cst_5 : f32 to vector<120x1xf32>
    %10 = arith.maximumf %8, %9 : vector<120x1xf32>
    %11 = tpu.reciprocal %10 {approx = true} : vector<120x1xf32> -> vector<120x1xf32>
    %12 = vector.broadcast %11 : vector<120x1xf32> to vector<120x128xf32>
    %13 = arith.mulf %5, %12 : vector<120x128xf32>
    %cst_6 = arith.constant 0.000000e+00 : f32
    %14 = vector.broadcast %cst_6 : f32 to vector<120x128xf32>
    %15 = arith.maximumf %13, %14 : vector<120x128xf32>
    %c0_7 = arith.constant 0 : index
    %c0_8 = arith.constant 0 : index
    %16 = vector.load %arg6[%c0_7, %c0_8] : memref<128x128xf32, #tpu.memory_space<vmem>>, vector<128x128xf32>
    %cst_9 = arith.constant dense<0.000000e+00> : vector<120x128xf32>
    %17 = tpu.matmul %15, %16, %cst_9 {dimension_numbers = #tpu.dot_dimension_numbers<[1], [0], [0], [1], [0, 0, 1, 1], [], []>} : vector<120x128xf32>, vector<128x128xf32>, vector<120x128xf32> -> vector<120x128xf32>
    %cst_10 = arith.constant 0.000000e+00 : f32
    %18 = vector.broadcast %cst_10 : f32 to vector<120x128xf32>
    %19 = arith.maximumf %17, %18 : vector<120x128xf32>
    %c0_11 = arith.constant 0 : index
    %c0_12 = arith.constant 0 : index
    %20 = vector.load %arg7[%c0_11, %c0_12] : memref<128x128xf32, #tpu.memory_space<vmem>>, vector<128x128xf32>
    %cst_13 = arith.constant dense<0.000000e+00> : vector<120x128xf32>
    %21 = tpu.matmul %19, %20, %cst_13 {dimension_numbers = #tpu.dot_dimension_numbers<[1], [0], [0], [1], [0, 0, 1, 1], [], []>} : vector<120x128xf32>, vector<128x128xf32>, vector<120x128xf32> -> vector<120x128xf32>
    %cst_14 = arith.constant 0.000000e+00 : f32
    %22 = vector.broadcast %cst_14 : f32 to vector<120x128xf32>
    %23 = arith.maximumf %21, %22 : vector<120x128xf32>
    %c0_15 = arith.constant 0 : index
    %c0_16 = arith.constant 0 : index
    %24 = vector.load %arg8[%c0_15, %c0_16] : memref<120x128xf32, #tpu.memory_space<vmem>>, vector<120x128xf32>
    tpu.vector_store %arg8[%c0_15, %c0_16], %23 {strides = array<i32>} : memref<120x128xf32, #tpu.memory_space<vmem>>, vector<120x128xf32>,
    return
  }
  func.func @transform_0(%arg0: i32) -> (i32, i32) {
    %c0_i32 = arith.constant 0 : i32
    %c0_i32_0 = arith.constant 0 : i32
    %c0_i32_1 = arith.constant 0 : i32
    return %c0_i32, %c0_i32_0 : i32, i32
  }
  func.func @transform_1(%arg0: i32) -> (i32, i32) {
    %c0_i32 = arith.constant 0 : i32
    %c0_i32_0 = arith.constant 0 : i32
    return %arg0, %c0_i32 : i32, i32
  }
  func.func @transform_2(%arg0: i32) -> (i32, i32) {
    %c0_i32 = arith.constant 0 : i32
    %c0_i32_0 = arith.constant 0 : i32
    %c0_i32_1 = arith.constant 0 : i32
    return %c0_i32, %c0_i32_0 : i32, i32
  }
  func.func @transform_3(%arg0: i32) -> (i32, i32) {
    %c0_i32 = arith.constant 0 : i32
    %c0_i32_0 = arith.constant 0 : i32
    %c0_i32_1 = arith.constant 0 : i32
    return %c0_i32, %c0_i32_0 : i32, i32
  }
  func.func @transform_4(%arg0: i32) -> (i32, i32) {
    %c0_i32 = arith.constant 0 : i32
    %c0_i32_0 = arith.constant 0 : i32
    %c0_i32_1 = arith.constant 0 : i32
    return %c0_i32, %c0_i32_0 : i32, i32
  }
  func.func @transform_5(%arg0: i32) -> (i32, i32) {
    %c0_i32 = arith.constant 0 : i32
    %c0_i32_0 = arith.constant 0 : i32
    %c0_i32_1 = arith.constant 0 : i32
    return %c0_i32, %c0_i32_0 : i32, i32
  }
  func.func @transform_6(%arg0: i32) -> (i32, i32) {
    %c0_i32 = arith.constant 0 : i32
    %c0_i32_0 = arith.constant 0 : i32
    %c0_i32_1 = arith.constant 0 : i32
    return %c0_i32, %c0_i32_0 : i32, i32
  }
  func.func @transform_7(%arg0: i32) -> (i32, i32) {
    %c0_i32 = arith.constant 0 : i32
    %c0_i32_0 = arith.constant 0 : i32
    return %arg0, %c0_i32 : i32, i32
  }
}

module attributes {stable_mosaic.version = 11 : i64} {
  func.func @_allset_block_kernel(%arg0: i32, %arg1: memref<120x128xf32, #tpu.memory_space<vmem>>, %arg2: memref<256x120xbf16, #tpu.memory_space<vmem>>, %arg3: memref<128x128xf32, #tpu.memory_space<vmem>>, %arg4: memref<128x128xf32, #tpu.memory_space<vmem>>, %arg5: memref<128x128xf32, #tpu.memory_space<vmem>>, %arg6: memref<128x128xf32, #tpu.memory_space<vmem>>, %arg7: memref<128x128xf32, #tpu.memory_space<vmem>>, %arg8: memref<256x128xf32, #tpu.memory_space<vmem>>, %arg9: memref<120x128xbf16, #tpu.memory_space<vmem>>) attributes {dimension_semantics = [#tpu.dimension_semantics<arbitrary>], iteration_bounds = array<i64: 2>, scalar_prefetch = 0 : i64, scratch_operands = 1 : i64, tpu.core_type = #tpu.core_type<tc>, window_params = [{pipeline_mode = #tpu.pipeline_mode<synchronous>, transform_indices = @transform_0, window_bounds = array<i64: 120, 128>}, {transform_indices = @transform_1, window_bounds = array<i64: 256, 120>}, {pipeline_mode = #tpu.pipeline_mode<synchronous>, transform_indices = @transform_2, window_bounds = array<i64: 128, 128>}, {pipeline_mode = #tpu.pipeline_mode<synchronous>, transform_indices = @transform_3, window_bounds = array<i64: 128, 128>}, {pipeline_mode = #tpu.pipeline_mode<synchronous>, transform_indices = @transform_4, window_bounds = array<i64: 128, 128>}, {pipeline_mode = #tpu.pipeline_mode<synchronous>, transform_indices = @transform_5, window_bounds = array<i64: 128, 128>}, {pipeline_mode = #tpu.pipeline_mode<synchronous>, transform_indices = @transform_6, window_bounds = array<i64: 128, 128>}, {transform_indices = @transform_7, window_bounds = array<i64: 256, 128>}]} {
    %c0_i32 = arith.constant 0 : i32
    %0 = arith.cmpi eq, %arg0, %c0_i32 : i32
    %1 = arith.extui %0 : i1 to i32
    %c0_i32_0 = arith.constant 0 : i32
    %2 = arith.cmpi ne, %1, %c0_i32_0 : i32
    scf.if %2 {
      %c0_17 = arith.constant 0 : index
      %c0_18 = arith.constant 0 : index
      %25 = vector.load %arg1[%c0_17, %c0_18] : memref<120x128xf32, #tpu.memory_space<vmem>>, vector<120x128xf32>
      %c0_19 = arith.constant 0 : index
      %c0_20 = arith.constant 0 : index
      %26 = vector.load %arg3[%c0_19, %c0_20] : memref<128x128xf32, #tpu.memory_space<vmem>>, vector<128x128xf32>
      %cst_21 = arith.constant dense<0.000000e+00> : vector<120x128xf32>
      %27 = tpu.matmul %25, %26, %cst_21 {dimension_numbers = #tpu.dot_dimension_numbers<[1], [0], [0], [1], [0, 0, 1, 1], [], []>} : vector<120x128xf32>, vector<128x128xf32>, vector<120x128xf32> -> vector<120x128xf32>
      %cst_22 = arith.constant 0.000000e+00 : f32
      %28 = vector.broadcast %cst_22 : f32 to vector<120x128xf32>
      %29 = arith.maximumf %27, %28 : vector<120x128xf32>
      %c0_23 = arith.constant 0 : index
      %c0_24 = arith.constant 0 : index
      %30 = vector.load %arg4[%c0_23, %c0_24] : memref<128x128xf32, #tpu.memory_space<vmem>>, vector<128x128xf32>
      %cst_25 = arith.constant dense<0.000000e+00> : vector<120x128xf32>
      %31 = tpu.matmul %29, %30, %cst_25 {dimension_numbers = #tpu.dot_dimension_numbers<[1], [0], [0], [1], [0, 0, 1, 1], [], []>} : vector<120x128xf32>, vector<128x128xf32>, vector<120x128xf32> -> vector<120x128xf32>
      %cst_26 = arith.constant 0.000000e+00 : f32
      %32 = vector.broadcast %cst_26 : f32 to vector<120x128xf32>
      %33 = arith.maximumf %31, %32 : vector<120x128xf32>
      %c0_27 = arith.constant 0 : index
      %c0_28 = arith.constant 0 : index
      %34 = vector.load %arg5[%c0_27, %c0_28] : memref<128x128xf32, #tpu.memory_space<vmem>>, vector<128x128xf32>
      %cst_29 = arith.constant dense<0.000000e+00> : vector<120x128xf32>
      %35 = tpu.matmul %33, %34, %cst_29 {dimension_numbers = #tpu.dot_dimension_numbers<[1], [0], [0], [1], [0, 0, 1, 1], [], []>} : vector<120x128xf32>, vector<128x128xf32>, vector<120x128xf32> -> vector<120x128xf32>
      %36 = arith.truncf %35 : vector<120x128xf32> to vector<120x128xbf16>
      %c0_30 = arith.constant 0 : index
      %c0_31 = arith.constant 0 : index
      %37 = vector.load %arg9[%c0_30, %c0_31] : memref<120x128xbf16, #tpu.memory_space<vmem>>, vector<120x128xbf16>
      tpu.vector_store %arg9[%c0_30, %c0_31], %36 {strides = array<i32>} : memref<120x128xbf16, #tpu.memory_space<vmem>>, vector<120x128xbf16>,
    } else {
    }
    %c0 = arith.constant 0 : index
    %c0_1 = arith.constant 0 : index
    %3 = vector.load %arg2[%c0, %c0_1] : memref<256x120xbf16, #tpu.memory_space<vmem>>, vector<256x120xbf16>
    %c0_2 = arith.constant 0 : index
    %c0_3 = arith.constant 0 : index
    %4 = vector.load %arg9[%c0_2, %c0_3] : memref<120x128xbf16, #tpu.memory_space<vmem>>, vector<120x128xbf16>
    %cst = arith.constant dense<0.000000e+00> : vector<256x128xf32>
    %5 = tpu.matmul %3, %4, %cst {dimension_numbers = #tpu.dot_dimension_numbers<[1], [0], [0], [1], [0, 0, 1, 1], [], []>} : vector<256x120xbf16>, vector<120x128xbf16>, vector<256x128xf32> -> vector<256x128xf32>
    %6 = arith.extf %3 : vector<256x120xbf16> to vector<256x120xf32>
    %cst_4 = arith.constant dense<0.000000e+00> : vector<256xf32>
    %7 = vector.multi_reduction <add>, %6, %cst_4 [1] : vector<256x120xf32> to vector<256xf32>
    %8 = vector.shape_cast %7 : vector<256xf32> to vector<256x1xf32>
    %cst_5 = arith.constant 1.000000e+00 : f32
    %9 = vector.broadcast %cst_5 : f32 to vector<256x1xf32>
    %10 = arith.maximumf %8, %9 : vector<256x1xf32>
    %11 = tpu.reciprocal %10 {approx = true} : vector<256x1xf32> -> vector<256x1xf32>
    %12 = vector.broadcast %11 : vector<256x1xf32> to vector<256x128xf32>
    %13 = arith.mulf %5, %12 : vector<256x128xf32>
    %cst_6 = arith.constant 0.000000e+00 : f32
    %14 = vector.broadcast %cst_6 : f32 to vector<256x128xf32>
    %15 = arith.maximumf %13, %14 : vector<256x128xf32>
    %c0_7 = arith.constant 0 : index
    %c0_8 = arith.constant 0 : index
    %16 = vector.load %arg6[%c0_7, %c0_8] : memref<128x128xf32, #tpu.memory_space<vmem>>, vector<128x128xf32>
    %cst_9 = arith.constant dense<0.000000e+00> : vector<256x128xf32>
    %17 = tpu.matmul %15, %16, %cst_9 {dimension_numbers = #tpu.dot_dimension_numbers<[1], [0], [0], [1], [0, 0, 1, 1], [], []>} : vector<256x128xf32>, vector<128x128xf32>, vector<256x128xf32> -> vector<256x128xf32>
    %cst_10 = arith.constant 0.000000e+00 : f32
    %18 = vector.broadcast %cst_10 : f32 to vector<256x128xf32>
    %19 = arith.maximumf %17, %18 : vector<256x128xf32>
    %c0_11 = arith.constant 0 : index
    %c0_12 = arith.constant 0 : index
    %20 = vector.load %arg7[%c0_11, %c0_12] : memref<128x128xf32, #tpu.memory_space<vmem>>, vector<128x128xf32>
    %cst_13 = arith.constant dense<0.000000e+00> : vector<256x128xf32>
    %21 = tpu.matmul %19, %20, %cst_13 {dimension_numbers = #tpu.dot_dimension_numbers<[1], [0], [0], [1], [0, 0, 1, 1], [], []>} : vector<256x128xf32>, vector<128x128xf32>, vector<256x128xf32> -> vector<256x128xf32>
    %cst_14 = arith.constant 0.000000e+00 : f32
    %22 = vector.broadcast %cst_14 : f32 to vector<256x128xf32>
    %23 = arith.maximumf %21, %22 : vector<256x128xf32>
    %c0_15 = arith.constant 0 : index
    %c0_16 = arith.constant 0 : index
    %24 = vector.load %arg8[%c0_15, %c0_16] : memref<256x128xf32, #tpu.memory_space<vmem>>, vector<256x128xf32>
    tpu.vector_store %arg8[%c0_15, %c0_16], %23 {strides = array<i32>} : memref<256x128xf32, #tpu.memory_space<vmem>>, vector<256x128xf32>,
    return
  }
  func.func @transform_0(%arg0: i32) -> (i32, i32) {
    %c0_i32 = arith.constant 0 : i32
    %c0_i32_0 = arith.constant 0 : i32
    %c0_i32_1 = arith.constant 0 : i32
    return %c0_i32, %c0_i32_0 : i32, i32
  }
  func.func @transform_1(%arg0: i32) -> (i32, i32) {
    %c0_i32 = arith.constant 0 : i32
    %c0_i32_0 = arith.constant 0 : i32
    return %arg0, %c0_i32 : i32, i32
  }
  func.func @transform_2(%arg0: i32) -> (i32, i32) {
    %c0_i32 = arith.constant 0 : i32
    %c0_i32_0 = arith.constant 0 : i32
    %c0_i32_1 = arith.constant 0 : i32
    return %c0_i32, %c0_i32_0 : i32, i32
  }
  func.func @transform_3(%arg0: i32) -> (i32, i32) {
    %c0_i32 = arith.constant 0 : i32
    %c0_i32_0 = arith.constant 0 : i32
    %c0_i32_1 = arith.constant 0 : i32
    return %c0_i32, %c0_i32_0 : i32, i32
  }
  func.func @transform_4(%arg0: i32) -> (i32, i32) {
    %c0_i32 = arith.constant 0 : i32
    %c0_i32_0 = arith.constant 0 : i32
    %c0_i32_1 = arith.constant 0 : i32
    return %c0_i32, %c0_i32_0 : i32, i32
  }
  func.func @transform_5(%arg0: i32) -> (i32, i32) {
    %c0_i32 = arith.constant 0 : i32
    %c0_i32_0 = arith.constant 0 : i32
    %c0_i32_1 = arith.constant 0 : i32
    return %c0_i32, %c0_i32_0 : i32, i32
  }
  func.func @transform_6(%arg0: i32) -> (i32, i32) {
    %c0_i32 = arith.constant 0 : i32
    %c0_i32_0 = arith.constant 0 : i32
    %c0_i32_1 = arith.constant 0 : i32
    return %c0_i32, %c0_i32_0 : i32, i32
  }
  func.func @transform_7(%arg0: i32) -> (i32, i32) {
    %c0_i32 = arith.constant 0 : i32
    %c0_i32_0 = arith.constant 0 : i32
    return %arg0, %c0_i32 : i32, i32
  }
}

</mosaic_0001>

<bundles_post_ra>
// kernel: allset_layer.3
= control target key start
LH: loop header
LB: loop body
LE: loop exit
PB: predicated region body
PF: predicated region fallthrough
CT: control target
= control target key end

     0   :  { %s1967_s24 = smov 0   ;;  %s2412_s0 = inlined_call_operand.vmem [shape: f32[120,128], index: 0, kind: input, shape index: {}]   ;;  %s2413_s1 = inlined_call_operand.vmem [shape: bf16[512,120], index: 1, kind: input, shape index: {}]   ;;  %s2414_s2 = inlined_call_operand.vmem [shape: f32[128,128], index: 2, kind: input, shape index: {}]   ;;  %s2415_s3 = inlined_call_operand.vmem [shape: f32[128,128], index: 3, kind: input, shape index: {}]   ;;  %s2416_s4 = inlined_call_operand.vmem [shape: f32[128,128], index: 4, kind: input, shape index: {}]   ;;  %s2417_s5 = inlined_call_operand.vmem [shape: f32[128,128], index: 5, kind: input, shape index: {}]   ;;  %s2418_s6 = inlined_call_operand.vmem [shape: f32[128,128], index: 6, kind: input, shape index: {}]   ;;  %s2419_s7 = inlined_call_operand.vmem [shape: f32[512,128], index: 7, kind: output, shape index: {}]  }
   0x1 LB: > { %s1575_s25 = sadd.s32 4294967295, %s1925_s24   ;;  %p1579_p0 = scmp.ge.s32.totalorder %s1925_s24, 1  ;;  %s1925_s24 = sphi %s1967_s24, %s17_s24  }
   0x2   : > { %p238_p1 = scmp.lt.s32.totalorder %s1925_s24, 3 }
   0x4   : > { %p239_p2 = pnand %p1579_p0, %p238_p1 }
   0x5   : > { %s1580_s26 = sshll.u32 (!%p239_p2), %s1575_s25, 5  ;;  %p1584_p4 = scmp.ne.s32.totalorder (!%p239_p2), %s1575_s25, 0 }
   0x6   : > { %242 = sbr.rel (%p239_p2) target bundleno = 1141 (0x475), region = 48  ;;  %p271_p3 = scmp.lt.s32.totalorder (!%p239_p2), %s1580_s26, 63 }
   0xb   : > { %s2421_s26 = smov (!%p271_p3, %s1580_s26), 63  ;;  %285 = sbr.rel (%p1584_p4) target bundleno = 527 (0x20f), region = 52 }
   0xc   : > { %s1581_s27 = sshll.u32 %s2421_s26, 2  ;;  %s1583_s28 = sshll.u32 %s2421_s26, 3 }
   0xd   : > { %s1978_s8 = scalar_lea.vmem %s2413_s1, %s1581_s27  ;;  %s1983_s11 = scalar_lea.vmem %s2419_s7, %s1583_s28 }
  0x10   : > { %v316_v0 = vld [vmem:[%s2414_s2 + $0x78] sm:$0xff]  ;;  %v315_v1 = vld [vmem:[%s2414_s2 + $0x70] sm:$0xff]  ;;  %v314_v2 = vld [vmem:[%s2414_s2 + $0x68] sm:$0xff] }
  0x11   : > { %317 = vmatpush.msra.mxu0 %v316_v0  ;;  %1759 = vmatpush.msra.mxu3 %v316_v0  ;;  %v313_v3 = vld [vmem:[%s2414_s2 + $0x60] sm:$0xff]  ;;  %v312_v4 = vld [vmem:[%s2414_s2 + $0x58] sm:$0xff]  ;;  %v311_v5 = vld [vmem:[%s2414_s2 + $0x50] sm:$0xff] }
  0x12   : > { %v310_v6 = vld [vmem:[%s2414_s2 + $0x48] sm:$0xff]  ;;  %v309_v7 = vld [vmem:[%s2414_s2 + $0x40] sm:$0xff]  ;;  %v308_v8 = vld [vmem:[%s2414_s2 + $0x38] sm:$0xff] }
  0x13   : > { %318 = vmatpush.msra.mxu0 %v315_v1  ;;  %1760 = vmatpush.msra.mxu3 %v315_v1  ;;  %v307_v9 = vld [vmem:[%s2414_s2 + $0x30] sm:$0xff]  ;;  %v306_v10 = vld [vmem:[%s2414_s2 + $0x28] sm:$0xff]  ;;  %v305_v11 = vld [vmem:[%s2414_s2 + $0x20] sm:$0xff] }
  0x14   : > { %v304_v12 = vld [vmem:[%s2414_s2 + $0x18] sm:$0xff]  ;;  %v303_v13 = vld [vmem:[%s2414_s2 + $0x10] sm:$0xff]  ;;  %v302_v14 = vld [vmem:[%s2414_s2 + $0x8] sm:$0xff] }
  0x15   : > { %319 = vmatpush.msra.mxu0 %v314_v2  ;;  %1761 = vmatpush.msra.mxu3 %v314_v2  ;;  %v301_v15 = vld [vmem:[%s2414_s2] sm:$0xff]  ;;  %v287_v17 = vld [vmem:[%s2412_s0 + $0x8] sm:$0xff]  ;;  %v288_v18 = vld [vmem:[%s2412_s0 + $0x10] sm:$0xff] }
  0x16   : > { %v286_v16 = vld [vmem:[%s2412_s0] sm:$0xff]  ;;  %v289_v20 = vld [vmem:[%s2412_s0 + $0x18] sm:$0xff]  ;;  %v299_v21 = vld [vmem:[%s2412_s0 + $0x68] sm:$0xff] }
  0x17   : > { %320 = vmatpush.msra.mxu0 %v313_v3  ;;  %1762 = vmatpush.msra.mxu3 %v313_v3  ;;  %v298_v19 = vld [vmem:[%s2412_s0 + $0x60] sm:$0xff]  ;;  %v291_v23 = vld [vmem:[%s2412_s0 + $0x28] sm:$0xff]  ;;  %v300_v24 = vld [vmem:[%s2412_s0 + $0x70] sm:$0xff] }
  0x18   : > { %v290_v22 = vld [vmem:[%s2412_s0 + $0x20] sm:$0xff]  ;;  %v292_v25 = vld [vmem:[%s2412_s0 + $0x30] sm:$0xff]  ;;  %v293_v26 = vld [vmem:[%s2412_s0 + $0x38] sm:$0xff] }
  0x19   : > { %321 = vmatpush.msra.mxu0 %v312_v4  ;;  %1763 = vmatpush.msra.mxu3 %v312_v4  ;;  %v409_v27 = vld [vmem:[%s2415_s3 + $0x78] sm:$0xff]  ;;  %v408_v28 = vld [vmem:[%s2415_s3 + $0x70] sm:$0xff]  ;;  %v407_v29 = vld [vmem:[%s2415_s3 + $0x68] sm:$0xff] }
  0x1a   : > { %410 = vmatpush.msra.mxu1 %v409_v27  ;;  %v406_v30 = vld [vmem:[%s2415_s3 + $0x60] sm:$0xff]  ;;  %v405_v32 = vld [vmem:[%s2415_s3 + $0x58] sm:$0xff]  ;;  %v404_v33 = vld [vmem:[%s2415_s3 + $0x50] sm:$0xff] }
  0x1b   : > { %322 = vmatpush.msra.mxu0 %v311_v5  ;;  %1764 = vmatpush.msra.mxu3 %v311_v5  ;;  %v294_v31 = vld [vmem:[%s2412_s0 + $0x40] sm:$0xff]  ;;  %v403_v34 = vld [vmem:[%s2415_s3 + $0x48] sm:$0xff]  ;;  %v401_v37 = vld [vmem:[%s2415_s3 + $0x38] sm:$0xff] }
  0x1c   : > { %411 = vmatpush.msra.mxu1 %v408_v28  ;;  %v402_v35 = vld [vmem:[%s2415_s3 + $0x40] sm:$0xff]  ;;  %v295_v36 = vld [vmem:[%s2412_s0 + $0x48] sm:$0xff]  ;;  %v400_v38 = vld [vmem:[%s2415_s3 + $0x30] sm:$0xff] }
  0x1d   : > { %323 = vmatpush.msra.mxu0 %v310_v6  ;;  %1765 = vmatpush.msra.mxu3 %v310_v6  ;;  %v399_v39 = vld [vmem:[%s2415_s3 + $0x28] sm:$0xff]  ;;  %v398_v40 = vld [vmem:[%s2415_s3 + $0x20] sm:$0xff]  ;;  %v296_v41 = vld [vmem:[%s2412_s0 + $0x50] sm:$0xff] }
  0x1e   : > { %412 = vmatpush.msra.mxu1 %v407_v29  ;;  %v397_v42 = vld [vmem:[%s2415_s3 + $0x18] sm:$0xff]  ;;  %v396_v43 = vld [vmem:[%s2415_s3 + $0x10] sm:$0xff]  ;;  %v395_v45 = vld [vmem:[%s2415_s3 + $0x8] sm:$0xff] }
  0x1f   : > { %324 = vmatpush.msra.mxu0 %v309_v7  ;;  %1766 = vmatpush.msra.mxu3 %v309_v7  ;;  %v297_v44 = vld [vmem:[%s2412_s0 + $0x58] sm:$0xff]  ;;  %v394_v46 = vld [vmem:[%s2415_s3] sm:$0xff]  ;;  %v501_v6 = vld [vmem:[%s2416_s4 + $0x70] sm:$0xff] }
  0x20   : > { %413 = vmatpush.msra.mxu1 %v406_v30  ;;  %v502_v5 = vld [vmem:[%s2416_s4 + $0x78] sm:$0xff]  ;;  %v500_v7 = vld [vmem:[%s2416_s4 + $0x68] sm:$0xff] }
  0x21   : > { %325 = vmatpush.msra.mxu0 %v308_v8  ;;  %1767 = vmatpush.msra.mxu3 %v308_v8  ;;  %v499_v8 = vld [vmem:[%s2416_s4 + $0x60] sm:$0xff] }
  0x22   : > { %414 = vmatpush.msra.mxu1 %v405_v32  ;;  %503 = vmatpush.msra.mxu2 %v502_v5 }
  0x23   : > { %326 = vmatpush.msra.mxu0 %v307_v9  ;;  %1768 = vmatpush.msra.mxu3 %v307_v9 }
  0x24   : > { %415 = vmatpush.msra.mxu1 %v404_v33  ;;  %504 = vmatpush.msra.mxu2 %v501_v6 }
  0x25   : > { %327 = vmatpush.msra.mxu0 %v306_v10  ;;  %1769 = vmatpush.msra.mxu3 %v306_v10 }
  0x26   : > { %416 = vmatpush.msra.mxu1 %v403_v34  ;;  %505 = vmatpush.msra.mxu2 %v500_v7 }
  0x27   : > { %328 = vmatpush.msra.mxu0 %v305_v11  ;;  %1770 = vmatpush.msra.mxu3 %v305_v11  ;;  %v498_v11 = vld [vmem:[%s2416_s4 + $0x58] sm:$0xff] }
  0x28   : > { %417 = vmatpush.msra.mxu1 %v402_v35  ;;  %506 = vmatpush.msra.mxu2 %v499_v8 }
  0x29   : > { %329 = vmatpush.msra.mxu0 %v304_v12  ;;  %1771 = vmatpush.msra.mxu3 %v304_v12  ;;  %v497_v12 = vld [vmem:[%s2416_s4 + $0x50] sm:$0xff] }
  0x2a   : > { %418 = vmatpush.msra.mxu1 %v401_v37  ;;  %507 = vmatpush.msra.mxu2 %v498_v11 }
  0x2b   : > { %330 = vmatpush.msra.mxu0 %v303_v13  ;;  %1772 = vmatpush.msra.mxu3 %v303_v13  ;;  %v496_v13 = vld [vmem:[%s2416_s4 + $0x48] sm:$0xff] }
  0x2c   : > { %419 = vmatpush.msra.mxu1 %v400_v38  ;;  %508 = vmatpush.msra.mxu2 %v497_v12 }
  0x2d   : > { %331 = vmatpush.msra.mxu0 %v302_v14  ;;  %1773 = vmatpush.msra.mxu3 %v302_v14  ;;  %v495_v14 = vld [vmem:[%s2416_s4 + $0x40] sm:$0xff] }
  0x2e   : > { %420 = vmatpush.msra.mxu1 %v399_v39  ;;  %509 = vmatpush.msra.mxu2 %v496_v13 }
  0x2f   : > { %332 = vmatpush.msra.mxu0 %v301_v15  ;;  %1774 = vmatpush.msra.mxu3 %v301_v15 }
  0x30   : > { %333 = vmatmul.f32.vlgmr.msra.gmra.mxu0 %v286_v16  ;;  %369 = vmatmul.f32.vlgmr.msra.gmra.mxu3 %v298_v19  ;;  %v492_v19 = vld [vmem:[%s2416_s4 + $0x28] sm:$0xff] }
  0x31   : > { %1775 = vmatpush.msrb.mxu3 %v409_v27  ;;  %421 = vmatpush.msra.mxu1 %v398_v40  ;;  %v488_v27 = vld [vmem:[%s2416_s4 + $0x8] sm:$0xff] }
  0x32   : > { %510 = vmatpush.msra.mxu2 %v495_v14 }
  0x33   : > { %1776 = vmatpush.msrb.mxu3 %v408_v28  ;;  %422 = vmatpush.msra.mxu1 %v397_v42  ;;  %v487_v28 = vld [vmem:[%s2416_s4] sm:$0xff] }
  0x35   : > { %1777 = vmatpush.msrb.mxu3 %v407_v29  ;;  %423 = vmatpush.msra.mxu1 %v396_v43 }
  0x37   : > { %1778 = vmatpush.msrb.mxu3 %v406_v30  ;;  %424 = vmatpush.msra.mxu1 %v395_v45 }
  0x38   : > { %336 = vmatmul.f32.gmra.mxu0 %v287_v17  ;;  %372 = vmatmul.f32.gmra.mxu3 %v299_v21  ;;  %v494_v17 = vld [vmem:[%s2416_s4 + $0x38] sm:$0xff] }
  0x39   : > { %1779 = vmatpush.msrb.mxu3 %v405_v32  ;;  %425 = vmatpush.msra.mxu1 %v394_v46 }
  0x3a   : > { %511 = vmatpush.msra.mxu2 %v494_v17 }
  0x3b   : > { %1780 = vmatpush.msrb.mxu3 %v404_v33 }
  0x3d   : > { %1781 = vmatpush.msrb.mxu3 %v403_v34 }
  0x3f   : > { %1782 = vmatpush.msrb.mxu3 %v402_v35 }
  0x40   : > { %339 = vmatmul.f32.gmra.mxu0 %v288_v18  ;;  %375 = vmatmul.f32.gmra.mxu3 %v300_v24  ;;  %v493_v18 = vld [vmem:[%s2416_s4 + $0x30] sm:$0xff] }
  0x41   : > { %1783 = vmatpush.msrb.mxu3 %v401_v37  ;;  %512 = vmatpush.msra.mxu2 %v493_v18  ;;  %v489_v24 = vld [vmem:[%s2416_s4 + $0x10] sm:$0xff] }
  0x43   : > { %1784 = vmatpush.msrb.mxu3 %v400_v38  ;;  %513 = vmatpush.msra.mxu2 %v492_v19 }
  0x45   : > { %1785 = vmatpush.msrb.mxu3 %v399_v39 }
  0x47   : > { %1786 = vmatpush.msrb.mxu3 %v398_v40 }
  0x48   : > { %342 = vmatmul.f32.gmra.mxu0 %v289_v20  ;;  %v491_v20 = vld [vmem:[%s2416_s4 + $0x20] sm:$0xff] }
  0x49   : > { %1787 = vmatpush.msrb.mxu3 %v397_v42  ;;  %514 = vmatpush.msra.mxu2 %v491_v20 }
  0x4b   : > { %1788 = vmatpush.msrb.mxu3 %v396_v43 }
  0x4d   : > { %1789 = vmatpush.msrb.mxu3 %v395_v45 }
  0x4f   : > { %1790 = vmatpush.msrb.mxu3 %v394_v46 }
  0x50   : > { %345 = vmatmul.f32.gmra.mxu0 %v290_v22 }
  0x51   : > { %1791 = vmatpush.msra.mxu3 %v502_v5 }
  0x53   : > { %1792 = vmatpush.msra.mxu3 %v501_v6 }
  0x55   : > { %1793 = vmatpush.msra.mxu3 %v500_v7 }
  0x57   : > { %1794 = vmatpush.msra.mxu3 %v499_v8 }
  0x58   : > { %348 = vmatmul.f32.gmra.mxu0 %v291_v23  ;;  %v490_v23 = vld [vmem:[%s2416_s4 + $0x18] sm:$0xff] }
  0x59   : > { %1795 = vmatpush.msra.mxu3 %v498_v11  ;;  %515 = vmatpush.msra.mxu2 %v490_v23 }
  0x5b   : > { %1796 = vmatpush.msra.mxu3 %v497_v12  ;;  %516 = vmatpush.msra.mxu2 %v489_v24 }
  0x5d   : > { %1797 = vmatpush.msra.mxu3 %v496_v13  ;;  %517 = vmatpush.msra.mxu2 %v488_v27 }
  0x5f   : > { %1798 = vmatpush.msra.mxu3 %v495_v14  ;;  %518 = vmatpush.msra.mxu2 %v487_v28 }
  0x60   : > { %351 = vmatmul.f32.gmra.mxu0 %v292_v25 }
  0x61   : > { %1799 = vmatpush.msra.mxu3 %v494_v17 }
  0x63   : > { %1800 = vmatpush.msra.mxu3 %v493_v18 }
  0x65   : > { %1801 = vmatpush.msra.mxu3 %v492_v19 }
  0x67   : > { %1802 = vmatpush.msra.mxu3 %v491_v20 }
  0x68   : > { %354 = vmatmul.f32.gmra.mxu0 %v293_v26 }
  0x69   : > { %1803 = vmatpush.msra.mxu3 %v490_v23 }
  0x6b   : > { %1804 = vmatpush.msra.mxu3 %v489_v24 }
  0x6d   : > { %1805 = vmatpush.msra.mxu3 %v488_v27 }
  0x6f   : > { %1806 = vmatpush.msra.mxu3 %v487_v28 }
  0x70   : > { %357 = vmatmul.f32.gmra.mxu0 %v294_v31 }
  0x78   : > { %360 = vmatmul.f32.gmra.mxu0 %v295_v36 }
  0x80   : > { %363 = vmatmul.f32.gmra.mxu0 %v296_v41 }
  0x88   : > { %366 = vmatmul.f32.gmra.mxu0 %v297_v44 }
  0xad   : > { %v334_v47 = vpop.f32.mrf.mxu0 }
  0xae   : > { %v379_v48 = vmax.f32 %v334_v47, 0.0 }
  0xb0   : > { %426 = vmatmul.f32.vlgmr.msra.gmra.mxu1 %v379_v48 }
  0xb3   : > { %v370_v55 = vpop.f32.mrf.mxu3 }
  0xb4   : > { %v391_v56 = vmax.f32 %v370_v55, 0.0 }
  0xb5   : > { %v337_v49 = vpop.f32.mrf.mxu0 }
  0xb6   : > { %v380_v50 = vmax.f32 %v337_v49, 0.0  ;;  %462 = vmatmul.f32.vlgmr.msrb.gmra.mxu3 %v391_v56 }
  0xb8   : > { %429 = vmatmul.f32.gmra.mxu1 %v380_v50 }
  0xbb   : > { %v373_v59 = vpop.f32.mrf.mxu3 }
  0xbc   : > { %v392_v60 = vmax.f32 %v373_v59, 0.0 }
  0xbd   : > { %v340_v51 = vpop.f32.mrf.mxu0 }
  0xbe   : > { %v381_v52 = vmax.f32 %v340_v51, 0.0  ;;  %465 = vmatmul.f32.gmra.mxu3 %v392_v60 }
  0xc0   : > { %432 = vmatmul.f32.gmra.mxu1 %v381_v52 }
  0xc3   : > { %v376_v1 = vpop.f32.mrf.mxu3 }
  0xc4   : > { %v393_v2 = vmax.f32 %v376_v1, 0.0 }
  0xc5   : > { %v343_v53 = vpop.f32.mrf.mxu0 }
  0xc6   : > { %v382_v54 = vmax.f32 %v343_v53, 0.0  ;;  %468 = vmatmul.f32.gmra.mxu3 %v393_v2 }
  0xc8   : > { %435 = vmatmul.f32.gmra.mxu1 %v382_v54 }
  0xcd   : > { %v346_v57 = vpop.f32.mrf.mxu0 }
  0xce   : > { %v383_v58 = vmax.f32 %v346_v57, 0.0 }
  0xd0   : > { %438 = vmatmul.f32.gmra.mxu1 %v383_v58 }
  0xd5   : > { %v349_v61 = vpop.f32.mrf.mxu0 }
  0xd6   : > { %v384_v62 = vmax.f32 %v349_v61, 0.0 }
  0xd8   : > { %441 = vmatmul.f32.gmra.mxu1 %v384_v62 }
  0xdd   : > { %v352_v63 = vpop.f32.mrf.mxu0 }
  0xde   : > { %v385_v0 = vmax.f32 %v352_v63, 0.0 }
  0xe0   : > { %444 = vmatmul.f32.gmra.mxu1 %v385_v0 }
  0xe5   : > { %v355_v3 = vpop.f32.mrf.mxu0 }
  0xe6   : > { %v386_v4 = vmax.f32 %v355_v3, 0.0 }
  0xe8   : > { %447 = vmatmul.f32.gmra.mxu1 %v386_v4 }
  0xed   : > { %v358_v9 = vpop.f32.mrf.mxu0 }
  0xee   : > { %v387_v10 = vmax.f32 %v358_v9, 0.0 }
  0xf0   : > { %450 = vmatmul.f32.gmra.mxu1 %v387_v10 }
  0xf5   : > { %v361_v15 = vpop.f32.mrf.mxu0 }
  0xf6   : > { %v388_v16 = vmax.f32 %v361_v15, 0.0 }
  0xf8   : > { %453 = vmatmul.f32.gmra.mxu1 %v388_v16 }
  0xfd   : > { %v364_v21 = vpop.f32.mrf.mxu0 }
  0xfe   : > { %v389_v22 = vmax.f32 %v364_v21, 0.0 }
 0x100   : > { %456 = vmatmul.f32.gmra.mxu1 %v389_v22 }
 0x105   : > { %v367_v25 = vpop.f32.mrf.mxu0 }
 0x106   : > { %v390_v26 = vmax.f32 %v367_v25, 0.0 }
 0x108   : > { %459 = vmatmul.f32.gmra.mxu1 %v390_v26 }
 0x12d   : > { %v427_v29 = vpop.f32.mrf.mxu1 }
 0x12e   : > { %v472_v30 = vmax.f32 %v427_v29, 0.0 }
 0x130   : > { %519 = vmatmul.f32.vlgmr.msra.gmra.mxu2 %v472_v30 }
 0x135   : > { %v430_v31 = vpop.f32.mrf.mxu1 }
 0x136   : > { %v473_v32 = vmax.f32 %v430_v31, 0.0 }
 0x138   : > { %522 = vmatmul.f32.gmra.mxu2 %v473_v32 }
 0x139   : > { %v463_v38 = vpop.f32.mrf.mxu3 }
 0x13a   : > { %v484_v40 = vmax.f32 %v463_v38, 0.0 }
 0x13c   : > { %555 = vmatmul.f32.vlgmr.msra.gmra.mxu3 %v484_v40 }
 0x13d   : > { %v433_v33 = vpop.f32.mrf.mxu1 }
 0x13e   : > { %v474_v34 = vmax.f32 %v433_v33, 0.0 }
 0x140   : > { %525 = vmatmul.f32.gmra.mxu2 %v474_v34 }
 0x141   : > { %v466_v42 = vpop.f32.mrf.mxu3 }
 0x142   : > { %v485_v44 = vmax.f32 %v466_v42, 0.0 }
 0x144   : > { %558 = vmatmul.f32.gmra.mxu3 %v485_v44 }
 0x145   : > { %v436_v35 = vpop.f32.mrf.mxu1 }
 0x146   : > { %v475_v36 = vmax.f32 %v436_v35, 0.0 }
 0x148   : > { %528 = vmatmul.f32.gmra.mxu2 %v475_v36 }
 0x149   : > { %v469_v48 = vpop.f32.mrf.mxu3 }
 0x14a   : > { %v486_v50 = vmax.f32 %v469_v48, 0.0 }
 0x14c   : > { %561 = vmatmul.f32.gmra.mxu3 %v486_v50 }
 0x14d   : > { %v439_v37 = vpop.f32.mrf.mxu1 }
 0x14e   : > { %v476_v39 = vmax.f32 %v439_v37, 0.0 }
 0x150   : > { %531 = vmatmul.f32.gmra.mxu2 %v476_v39 }
 0x155   : > { %v442_v41 = vpop.f32.mrf.mxu1 }
 0x156   : > { %v477_v43 = vmax.f32 %v442_v41, 0.0 }
 0x158   : > { %534 = vmatmul.f32.gmra.mxu2 %v477_v43 }
 0x15d   : > { %v445_v45 = vpop.f32.mrf.mxu1 }
 0x15e   : > { %v478_v46 = vmax.f32 %v445_v45, 0.0 }
 0x160   : > { %537 = vmatmul.f32.gmra.mxu2 %v478_v46 }
 0x165   : > { %v448_v47 = vpop.f32.mrf.mxu1 }
 0x166   : > { %v479_v49 = vmax.f32 %v448_v47, 0.0 }
 0x168   : > { %540 = vmatmul.f32.gmra.mxu2 %v479_v49 }
 0x16d   : > { %v451_v51 = vpop.f32.mrf.mxu1 }
 0x16e   : > { %v480_v52 = vmax.f32 %v451_v51, 0.0 }
 0x170   : > { %543 = vmatmul.f32.gmra.mxu2 %v480_v52 }
 0x175   : > { %v454_v53 = vpop.f32.mrf.mxu1 }
 0x176   : > { %v481_v54 = vmax.f32 %v454_v53, 0.0 }
 0x178   : > { %546 = vmatmul.f32.gmra.mxu2 %v481_v54 }
 0x17d   : > { %v457_v55 = vpop.f32.mrf.mxu1 }
 0x17e   : > { %v482_v56 = vmax.f32 %v457_v55, 0.0 }
 0x180   : > { %549 = vmatmul.f32.gmra.mxu2 %v482_v56 }
 0x185   : > { %v460_v57 = vpop.f32.mrf.mxu1 }
 0x186   : > { %v483_v58 = vmax.f32 %v460_v57, 0.0 }
 0x188   : > { %552 = vmatmul.f32.gmra.mxu2 %v483_v58 }
 0x1b3   : > { %v520_v59 = vpop.f32.mrf.mxu2 }
 0x1bb   : > { %v523_v60 = vpop.f32.mrf.mxu2 }
 0x1bc   : > { %v1721_v61 = vpack.c.bf16 %v523_v60, %v520_v59 }
 0x1be   : > { %1722 = vst [vmem:[#allocation2] sm:$0xff] %v1721_v61  }
 0x1bf   : > { %v556_v2 = vpop.f32.mrf.mxu3 }
 0x1c3   : > { %v526_v62 = vpop.f32.mrf.mxu2 }
 0x1c7   : > { %v559_v4 = vpop.f32.mrf.mxu3 }
 0x1c8   : > { %v1751_v6 = vpack.c.bf16 %v559_v4, %v556_v2 }
 0x1ca   : > { %1758 = vst [vmem:[#allocation2 + $0x30] sm:$0xff] %v1751_v6  }
 0x1cb   : > { %v529_v63 = vpop.f32.mrf.mxu2 }
 0x1cc   : > { %v1726_v0 = vpack.c.bf16 %v529_v63, %v526_v62 }
 0x1ce   : > { %1753 = vst [vmem:[#allocation2 + $0x8] sm:$0xff] %v1726_v0  }
 0x1cf   : > { %v562_v9 = vpop.f32.mrf.mxu3 }
 0x1d0   : > { %v579_v11 = vpack.c.bf16 %v562_v9, %v562_v9 }
 0x1d2   : > { %594 = vst [vmem:[#allocation2 + $0x38] sm:$0xf] %v579_v11 }
 0x1d3   : > { %v532_v1 = vpop.f32.mrf.mxu2 }
 0x1db   : > { %v535_v3 = vpop.f32.mrf.mxu2 }
 0x1dc   : > { %v1731_v5 = vpack.c.bf16 %v535_v3, %v532_v1 }
 0x1de   : > { %1754 = vst [vmem:[#allocation2 + $0x10] sm:$0xff] %v1731_v5  }
 0x1e3   : > { %v538_v7 = vpop.f32.mrf.mxu2 }
 0x1eb   : > { %v541_v8 = vpop.f32.mrf.mxu2 }
 0x1ec   : > { %v1736_v10 = vpack.c.bf16 %v541_v8, %v538_v7 }
 0x1ee   : > { %1755 = vst [vmem:[#allocation2 + $0x18] sm:$0xff] %v1736_v10  }
 0x1f3   : > { %v544_v12 = vpop.f32.mrf.mxu2 }
 0x1fb   : > { %v547_v13 = vpop.f32.mrf.mxu2 }
 0x1fc   : > { %v1741_v14 = vpack.c.bf16 %v547_v13, %v544_v12 }
 0x1fe   : > { %1756 = vst [vmem:[#allocation2 + $0x20] sm:$0xff] %v1741_v14  }
 0x203   : > { %v550_v15 = vpop.f32.mrf.mxu2 }
 0x20b   : > { %v553_v16 = vpop.f32.mrf.mxu2 }
 0x20c   : > { %v1746_v17 = vpack.c.bf16 %v553_v16, %v550_v15 }
 0x20e   : > { %1757 = vst [vmem:[#allocation2 + $0x28] sm:$0xff] %v1746_v17  }
 0x20f PF: > { %v641_v18 = vld [vmem:[#allocation2 + $0x38] sm:$0xf]  ;;  %vm816_vm0 = vcmask 1043456   ;;  %vm767_vm1 = vcmask 982016   ;;  %v595_v21 = vld [vmem:[%s1978_s8] sm:$0xff]   ;;  %v1717_v24 = vld [vmem:[#allocation2 + $0x30] sm:$0xff] }
 0x210   : > { %v751_v19 = vunpack.c.l.b16 %v641_v18  ;;  %v909_v22 = vunpack.c.l.bf16 %v595_v21  ;;  %v910_v26 = vunpack.c.h.bf16 %v595_v21  ;;  %v1715_v29 = vld [vmem:[#allocation2 + $0x20] sm:$0xff]  ;;  %v1714_v30 = vld [vmem:[#allocation2 + $0x18] sm:$0xff]  ;;  %v597_v31 = vld [vmem:[%s1978_s8 + $0x8] sm:$0xff]  }
 0x211   : > { %v911_v32 = vunpack.c.l.bf16 %v597_v31  ;;  %v1713_v34 = vld [vmem:[#allocation2 + $0x10] sm:$0xff]  ;;  %v912_v35 = vunpack.c.h.bf16 %v597_v31  ;;  %v1712_v36 = vld [vmem:[#allocation2 + $0x8] sm:$0xff]  ;;  %v1711_v38 = vld [vmem:[#allocation2] sm:$0xff] }
 0x212   : > { %v759_v20 = vpack.c.b16 %v751_v19, %v751_v19  ;;  %v941_v25 = vsel %vm767_vm1, %v909_v22, 0.0  ;;  %v944_v28 = vsel %vm767_vm1, %v910_v26, 0.0  ;;  %v1695_v39 = vld [vmem:[%s1978_s8] sm:$0xff]  ;;  %v599_v40 = vld [vmem:[%s1978_s8 + $0x10] sm:$0xff]   ;;  %v1696_v45 = vld [vmem:[%s1978_s8 + $0x8] sm:$0xff] }
 0x213   : > { %942 = vadd.xlane.f32.xlu0 %v941_v25  ;;  %v947_v33 = vsel %vm767_vm1, %v911_v32, 0.0  ;;  %v950_v37 = vsel %vm767_vm1, %v912_v35, 0.0  ;;  %v913_v41 = vunpack.c.l.bf16 %v599_v40  ;;  %v914_v43 = vunpack.c.h.bf16 %v599_v40  ;;  %v601_v46 = vld [vmem:[%s1978_s8 + $0x18] sm:$0xff]   ;;  %v1697_v51 = vld [vmem:[%s1978_s8 + $0x10] sm:$0xff]  ;;  %v603_v52 = vld [vmem:[%s1978_s8 + $0x20] sm:$0xff]  }
 0x214   : > { %v818_v23 = vsel %vm816_vm0, %v759_v20, 0  ;;  %948 = vadd.xlane.f32.xlu1 %v947_v33  ;;  %v915_v47 = vunpack.c.l.bf16 %v601_v46  ;;  %v916_v49 = vunpack.c.h.bf16 %v601_v46  ;;  %v917_v53 = vunpack.c.l.bf16 %v603_v52  ;;  %v1698_v57 = vld [vmem:[%s1978_s8 + $0x18] sm:$0xff]  ;;  %v605_v58 = vld [vmem:[%s1978_s8 + $0x28] sm:$0xff]   ;;  %v1699_v63 = vld [vmem:[%s1978_s8 + $0x20] sm:$0xff] }
 0x215   : > { %820 = vmatpush.bf16.msra.mxu0 %v818_v23  ;;  %1807 = vmatpush.bf16.msra.mxu3 %v818_v23  ;;  %v1716_v27 = vld [vmem:[#allocation2 + $0x28] sm:$0xff]  ;;  %v953_v42 = vsel %vm767_vm1, %v913_v41, 0.0  ;;  %v956_v44 = vsel %vm767_vm1, %v914_v43, 0.0  ;;  %v918_v55 = vunpack.c.h.bf16 %v603_v52  ;;  %v919_v59 = vunpack.c.l.bf16 %v605_v58  ;;  %v607_v0 = vld [vmem:[%s1978_s8 + $0x30] sm:$0xff]   ;;  %v1180_v3 = vld [vmem:[%s2417_s5 + $0x78] sm:$0xff] }
 0x216   : > { %954 = vadd.xlane.f32.xlu2 %v953_v42  ;;  %v959_v48 = vsel %vm767_vm1, %v915_v47, 0.0  ;;  %v962_v50 = vsel %vm767_vm1, %v916_v49, 0.0  ;;  %v965_v54 = vsel %vm767_vm1, %v917_v53, 0.0  ;;  %v920_v61 = vunpack.c.h.bf16 %v605_v58  ;;  %v1179_v4 = vld [vmem:[%s2417_s5 + $0x70] sm:$0xff]  ;;  %1181 = vmatpush.msra.mxu1 %v1180_v3  ;;  %v1707_v6 = vld [vmem:[%s1978_s8 + $0x60] sm:$0xff]  ;;  %v1178_v7 = vld [vmem:[%s2417_s5 + $0x68] sm:$0xff] }
 0x217   : > { %v968_v56 = vsel %vm767_vm1, %v918_v55, 0.0  ;;  %v971_v60 = vsel %vm767_vm1, %v919_v59, 0.0  ;;  %v921_v1 = vunpack.c.l.bf16 %v607_v0  ;;  %v922_v5 = vunpack.c.h.bf16 %v607_v0  ;;  %v1177_v9 = vld [vmem:[%s2417_s5 + $0x60] sm:$0xff]  ;;  %v1176_v10 = vld [vmem:[%s2417_s5 + $0x58] sm:$0xff]  ;;  %v1175_v11 = vld [vmem:[%s2417_s5 + $0x50] sm:$0xff] }
 0x218   : > { %v974_v62 = vsel %vm767_vm1, %v920_v61, 0.0  ;;  %1182 = vmatpush.msra.mxu1 %v1179_v4  ;;  %v1174_v12 = vld [vmem:[%s2417_s5 + $0x48] sm:$0xff]  ;;  %v609_v14 = vld [vmem:[%s1978_s8 + $0x38] sm:$0xff]   ;;  %v619_v16 = vld [vmem:[%s1978_s8 + $0x60] sm:$0xff]  }
 0x219   : > { %821 = vmatpush.bf16.msra.mxu0 %v1717_v24  ;;  %1808 = vmatpush.bf16.msra.mxu3 %v1717_v24  ;;  %v977_v2 = vsel %vm767_vm1, %v921_v1, 0.0  ;;  %v980_v8 = vsel %vm767_vm1, %v922_v5, 0.0  ;;  %v1700_v13 = vld [vmem:[%s1978_s8 + $0x28] sm:$0xff]  ;;  %v923_v15 = vunpack.c.l.bf16 %v609_v14  ;;  %v1173_v17 = vld [vmem:[%s2417_s5 + $0x40] sm:$0xff]  ;;  %v1172_v19 = vld [vmem:[%s2417_s5 + $0x38] sm:$0xff]  ;;  %v933_v20 = vunpack.c.l.bf16 %v619_v16 }
 0x21a   : > { %1183 = vmatpush.msra.mxu1 %v1178_v7  ;;  %v924_v21 = vunpack.c.h.bf16 %v609_v14  ;;  %v1171_v24 = vld [vmem:[%s2417_s5 + $0x30] sm:$0xff]  ;;  %v611_v25 = vld [vmem:[%s1978_s8 + $0x40] sm:$0xff]   ;;  %v1708_v26 = vld [vmem:[%s1978_s8 + $0x68] sm:$0xff] }
 0x21b   : > { %945 = vadd.xlane.f32.xlu0 %v944_v28  ;;  %v983_v18 = vsel %vm767_vm1, %v923_v15, 0.0  ;;  %v1013_v22 = vsel %vm767_vm1, %v933_v20, 0.0  ;;  %v1170_v28 = vld [vmem:[%s2417_s5 + $0x28] sm:$0xff]  ;;  %v1168_v32 = vld [vmem:[%s2417_s5 + $0x18] sm:$0xff]  ;;  %v1167_v35 = vld [vmem:[%s2417_s5 + $0x10] sm:$0xff]  ;;  %v926_v40 = vunpack.c.h.bf16 %v611_v25 }
 0x21c   : > { %951 = vadd.xlane.f32.xlu1 %v950_v37  ;;  %1184 = vmatpush.msra.mxu1 %v1177_v9  ;;  %v986_v23 = vsel %vm767_vm1, %v924_v21, 0.0  ;;  %v621_v37 = vld [vmem:[%s1978_s8 + $0x68] sm:$0xff]   ;;  %v1702_v49 = vld [vmem:[%s1978_s8 + $0x38] sm:$0xff]  ;;  %v615_v58 = vld [vmem:[%s1978_s8 + $0x50] sm:$0xff]  }
 0x21d   : > { %822 = vmatpush.bf16.msra.mxu0 %v1716_v27  ;;  %1809 = vmatpush.bf16.msra.mxu3 %v1716_v27  ;;  %v925_v27 = vunpack.c.l.bf16 %v611_v25  ;;  %v992_v42 = vsel %vm767_vm1, %v926_v40, 0.0  ;;  %v613_v43 = vld [vmem:[%s1978_s8 + $0x48] sm:$0xff]   ;;  %v1710_v0 = vld [vmem:[%s1978_s8 + $0x78] sm:$0xff]  ;;  %v1705_v40 = vld [vmem:[%s1978_s8 + $0x50] sm:$0xff] }
 0x21e   : > { %957 = vadd.xlane.f32.xlu2 %v956_v44  ;;  %1185 = vmatpush.msra.mxu1 %v1176_v10  ;;  %v936_v44 = vunpack.c.h.bf16 %v621_v37  ;;  %v928_v52 = vunpack.c.h.bf16 %v613_v43  ;;  %v617_v25 = vld [vmem:[%s1978_s8 + $0x58] sm:$0xff]  }
 0x21f   : > { %v989_v31 = vsel %vm767_vm1, %v925_v27, 0.0  ;;  %v931_v27 = vunpack.c.l.bf16 %v617_v25 }
 0x220   : > { %1186 = vmatpush.msra.mxu1 %v1175_v11  ;;  %v1022_v46 = vsel %vm767_vm1, %v936_v44, 0.0  ;;  %v998_v55 = vsel %vm767_vm1, %v928_v52, 0.0 }
 0x221   : > { %823 = vmatpush.bf16.msra.mxu0 %v1715_v29  ;;  %1810 = vmatpush.bf16.msra.mxu3 %v1715_v29  ;;  %v934_v29 = vunpack.c.h.bf16 %v619_v16 }
 0x222   : > { %1187 = vmatpush.msra.mxu1 %v1174_v12 }
 0x223   : > { %960 = vadd.xlane.f32.xlu0 %v959_v48  ;;  %v1016_v33 = vsel %vm767_vm1, %v934_v29, 0.0  ;;  %v1709_v48 = vld [vmem:[%s1978_s8 + $0x70] sm:$0xff]  ;;  %v1007_v29 = vsel %vm767_vm1, %v931_v27, 0.0 }
 0x224   : > { %963 = vadd.xlane.f32.xlu1 %v962_v50  ;;  %1188 = vmatpush.msra.mxu1 %v1173_v17 }
 0x225   : > { %824 = vmatpush.bf16.msra.mxu0 %v1714_v30  ;;  %1811 = vmatpush.bf16.msra.mxu3 %v1714_v30  ;;  %v1169_v30 = vld [vmem:[%s2417_s5 + $0x20] sm:$0xff] }
 0x226   : > { %966 = vadd.xlane.f32.xlu2 %v965_v54  ;;  %1189 = vmatpush.msra.mxu1 %v1172_v19 }
 0x228   : > { %1190 = vmatpush.msra.mxu1 %v1171_v24 }
 0x229   : > { %825 = vmatpush.bf16.msra.mxu0 %v1713_v34  ;;  %1812 = vmatpush.bf16.msra.mxu3 %v1713_v34  ;;  %v1701_v34 = vld [vmem:[%s1978_s8 + $0x30] sm:$0xff] }
 0x22a   : > { %1191 = vmatpush.msra.mxu1 %v1170_v28 }
 0x22b   : > { %969 = vadd.xlane.f32.xlu0 %v968_v56 }
 0x22c   : > { %972 = vadd.xlane.f32.xlu1 %v971_v60  ;;  %1192 = vmatpush.msra.mxu1 %v1169_v30  ;;  %v929_v60 = vunpack.c.l.bf16 %v615_v58 }
 0x22d   : > { %826 = vmatpush.bf16.msra.mxu0 %v1712_v36  ;;  %1813 = vmatpush.bf16.msra.mxu3 %v1712_v36  ;;  %v1166_v36 = vld [vmem:[%s2417_s5 + $0x8] sm:$0xff] }
 0x22e   : > { %975 = vadd.xlane.f32.xlu2 %v974_v62  ;;  %1193 = vmatpush.msra.mxu1 %v1168_v32 }
 0x230   : > { %1194 = vmatpush.msra.mxu1 %v1167_v35 }
 0x231   : > { %827 = vmatpush.bf16.msra.mxu0 %v1711_v38  ;;  %1814 = vmatpush.bf16.msra.mxu3 %v1711_v38  ;;  %v1165_v38 = vld [vmem:[%s2417_s5] sm:$0xff] }
 0x232   : > { %1195 = vmatpush.msra.mxu1 %v1166_v36 }
 0x233   : > { %978 = vadd.xlane.f32.xlu0 %v977_v2  ;;  %v1703_v2 = vld [vmem:[%s1978_s8 + $0x40] sm:$0xff] }
 0x234   : > { %1677 = vmatmul.msk.bf16.vlgmr.msra.gmra.mxu0 %vm767_vm1, %v1695_v39  ;;  %981 = vadd.xlane.f32.xlu1 %v980_v8  ;;  %v935_v39 = vunpack.c.l.bf16 %v621_v37 }
 0x235   : > { %1815 = vmatpush.msrb.mxu3 %v1180_v3  ;;  %1196 = vmatpush.msra.mxu1 %v1165_v38 }
 0x236   : > { %1689 = vmatmul.msk.bf16.vlgmr.msra.gmra.mxu3 %vm767_vm1, %v1707_v6  ;;  %984 = vadd.xlane.f32.xlu2 %v983_v18  ;;  %v1019_v41 = vsel %vm767_vm1, %v935_v39, 0.0  ;;  %v625_v6 = vld [vmem:[%s1978_s8 + $0x78] sm:$0xff]  }
 0x237   : > { %1816 = vmatpush.msrb.mxu3 %v1179_v4  ;;  %v939_v8 = vunpack.c.l.bf16 %v625_v6  ;;  %v940_v18 = vunpack.c.h.bf16 %v625_v6 }
 0x239   : > { %1817 = vmatpush.msrb.mxu3 %v1178_v7  ;;  %v1034_v20 = vsel %vm767_vm1, %v940_v18, 0.0 }
 0x23b   : > { %1818 = vmatpush.msrb.mxu3 %v1177_v9  ;;  %987 = vadd.xlane.f32.xlu0 %v986_v23  ;;  %v930_v9 = vunpack.c.h.bf16 %v615_v58 }
 0x23c   : > { %1014 = vadd.xlane.f32.xlu1 %v1013_v22  ;;  %v1704_v22 = vld [vmem:[%s1978_s8 + $0x48] sm:$0xff] }
 0x23d   : > { %1819 = vmatpush.msrb.mxu3 %v1176_v10 }
 0x23e   : > { %990 = vadd.xlane.f32.xlu2 %v989_v31 }
 0x23f   : > { %1820 = vmatpush.msrb.mxu3 %v1175_v11  ;;  %v1031_v11 = vsel %vm767_vm1, %v939_v8, 0.0 }
 0x241   : > { %1821 = vmatpush.msrb.mxu3 %v1174_v12  ;;  %v1004_v12 = vsel %vm767_vm1, %v930_v9, 0.0 }
 0x243   : > { %1822 = vmatpush.msrb.mxu3 %v1173_v17  ;;  %1017 = vadd.xlane.f32.xlu0 %v1016_v33 }
 0x244   : > { %1678 = vmatmul.msk.bf16.gmra.mxu0 %vm767_vm1, %v1696_v45  ;;  %993 = vadd.xlane.f32.xlu1 %v992_v42  ;;  %v927_v45 = vunpack.c.l.bf16 %v613_v43 }
 0x245   : > { %1823 = vmatpush.msrb.mxu3 %v1172_v19 }
 0x246   : > { %1690 = vmatmul.msk.bf16.gmra.mxu3 %vm767_vm1, %v1708_v26  ;;  %1020 = vadd.xlane.f32.xlu2 %v1019_v41  ;;  %v995_v47 = vsel %vm767_vm1, %v927_v45, 0.0 }
 0x247   : > { %1824 = vmatpush.msrb.mxu3 %v1171_v24 }
 0x249   : > { %1825 = vmatpush.msrb.mxu3 %v1170_v28 }
 0x24b   : > { %1826 = vmatpush.msrb.mxu3 %v1169_v30  ;;  %996 = vadd.xlane.f32.xlu0 %v995_v47 }
 0x24c   : > { %1023 = vadd.xlane.f32.xlu1 %v1022_v46 }
 0x24d   : > { %1827 = vmatpush.msrb.mxu3 %v1168_v32 }
 0x24e   : > { %999 = vadd.xlane.f32.xlu2 %v998_v55 }
 0x24f   : > { %1828 = vmatpush.msrb.mxu3 %v1167_v35  ;;  %v932_v35 = vunpack.c.h.bf16 %v617_v25  ;;  %v1336_v25 = vld [vmem:[%s2418_s6 + $0x50] sm:$0xff] }
 0x251   : > { %1829 = vmatpush.msrb.mxu3 %v1166_v36  ;;  %v1010_v37 = vsel %vm767_vm1, %v932_v35, 0.0 }
 0x253   : > { %1830 = vmatpush.msrb.mxu3 %v1165_v38 }
 0x254   : > { %1679 = vmatmul.msk.bf16.gmra.mxu0 %vm767_vm1, %v1697_v51  ;;  %v623_v51 = vld [vmem:[%s1978_s8 + $0x70] sm:$0xff]  }
 0x255   : > { %v937_v53 = vunpack.c.l.bf16 %v623_v51  ;;  %v938_v59 = vunpack.c.h.bf16 %v623_v51 }
 0x256   : > { %1691 = vmatmul.msk.bf16.gmra.mxu3 %vm767_vm1, %v1709_v48 }
 0x257   : > { %v1025_v56 = vsel %vm767_vm1, %v937_v53, 0.0  ;;  %v1028_v62 = vsel %vm767_vm1, %v938_v59, 0.0  ;;  %v1706_v53 = vld [vmem:[%s1978_s8 + $0x58] sm:$0xff] }
 0x258   : > { %1026 = vadd.xlane.f32.xlu0 %v1025_v56  ;;  %1029 = vadd.xlane.f32.xlu2 %v1028_v62 }
 0x260   : > { %1005 = vadd.xlane.f32.xlu0 %v1004_v12  ;;  %1008 = vadd.xlane.f32.xlu2 %v1007_v29  ;;  %v1340_v12 = vld [vmem:[%s2418_s6 + $0x70] sm:$0xff]  ;;  %v1335_v29 = vld [vmem:[%s2418_s6 + $0x48] sm:$0xff] }
 0x264   : > { %1680 = vmatmul.msk.bf16.gmra.mxu0 %vm767_vm1, %v1698_v57 }
 0x266   : > { %1692 = vmatmul.msk.bf16.gmra.mxu3 %vm767_vm1, %v1710_v0 }
 0x268   : > { %1035 = vadd.xlane.f32.xlu0 %v1034_v20 }
 0x274   : > { %1681 = vmatmul.msk.bf16.gmra.mxu0 %vm767_vm1, %v1699_v63  ;;  %v1001_v63 = vsel %vm767_vm1, %v929_v60, 0.0 }
 0x275   : > { %1002 = vadd.xlane.f32.xlu1 %v1001_v63 }
 0x27d   : > { %1032 = vadd.xlane.f32.xlu1 %v1031_v11 }
 0x284   : > { %1682 = vmatmul.msk.bf16.gmra.mxu0 %vm767_vm1, %v1700_v13 }
 0x285   : > { %1011 = vadd.xlane.f32.xlu1 %v1010_v37 }
 0x286   : > { %v943_v50 = vpop.xlane.xlu0 %942 }
 0x287   : > { %v1037_v54 = vmax.f32 %v943_v50, 1.0  ;;  %v949_v3 = vpop.xlane.xlu1 %948 }
 0x288   : > { %v1039_v10 = vmax.f32 %v949_v3, 1.0 }
 0x289   : > { %1855 = vrcp.f32 %v1037_v54  ;;  %v955_v23 = vpop.xlane.xlu2 %954 }
 0x28a   : > { %v1041_v30 = vmax.f32 %v955_v23, 1.0  ;;  %v1337_v23 = vld [vmem:[%s2418_s6 + $0x58] sm:$0xff] }
 0x28e   : > { %v946_v57 = vpop.xlane.xlu0 %945 }
 0x28f   : > { %v1038_v61 = vmax.f32 %v946_v57, 1.0  ;;  %v1856_v1 = vpop.eup %1855  ;;  %v952_v16 = vpop.xlane.xlu1 %951 }
 0x290   : > { %v1040_v19 = vmax.f32 %v952_v16, 1.0 }
 0x291   : > { %1857 = vrcp.f32 %v1038_v61 }
 0x292   : > { %1859 = vrcp.f32 %v1039_v10  ;;  %v1341_v10 = vld [vmem:[%s2418_s6 + $0x78] sm:$0xff] }
 0x293   : > { %1861 = vrcp.f32 %v1040_v19  ;;  %1342 = vmatpush.msra.mxu2 %v1341_v10  ;;  %1831 = vmatpush.msra.mxu3 %v1341_v10 }
 0x294   : > { %1683 = vmatmul.msk.bf16.gmra.mxu0 %vm767_vm1, %v1701_v34  ;;  %1863 = vrcp.f32 %v1041_v30  ;;  %v958_v34 = vpop.xlane.xlu2 %957 }
 0x295   : > { %v1042_v38 = vmax.f32 %v958_v34, 1.0  ;;  %1343 = vmatpush.msra.mxu2 %v1340_v12  ;;  %1832 = vmatpush.msra.mxu3 %v1340_v12 }
 0x296   : > { %v961_v43 = vpop.xlane.xlu0 %960 }
 0x297   : > { %v1858_v13 = vpop.eup %1857  ;;  %1865 = vrcp.f32 %v1042_v38  ;;  %v1043_v45 = vmax.f32 %v961_v43, 1.0 }
 0x298   : > { %v1860_v21 = vpop.eup %1859 }
 0x299   : > { %v1862_v31 = vpop.eup %1861  ;;  %1867 = vrcp.f32 %v1043_v45 }
 0x29a   : > { %v1864_v39 = vpop.eup %1863 }
 0x29c   : > { %v967_v56 = vpop.xlane.xlu2 %966 }
 0x29d   : > { %v1866_v46 = vpop.eup %1865  ;;  %v1045_v58 = vmax.f32 %v967_v56, 1.0 }
 0x29e   : > { %v970_v62 = vpop.xlane.xlu0 %969 }
 0x29f   : > { %v1868_v52 = vpop.eup %1867 }
 0x2a4   : > { %1684 = vmatmul.msk.bf16.gmra.mxu0 %vm767_vm1, %v1702_v49  ;;  %v964_v49 = vpop.xlane.xlu1 %963 }
 0x2a5   : > { %v1044_v51 = vmax.f32 %v964_v49, 1.0 }
 0x2a7   : > { %1869 = vrcp.f32 %v1044_v51 }
 0x2a8   : > { %1871 = vrcp.f32 %v1045_v58 }
 0x2ac   : > { %v973_v63 = vpop.xlane.xlu1 %972 }
 0x2ad   : > { %v1870_v59 = vpop.eup %1869  ;;  %v1047_v9 = vmax.f32 %v973_v63, 1.0 }
 0x2b1   : > { %v829_v4 = vpop.f32.mrf.mxu0 }
 0x2b2   : > { %v1101_v5 = vmul.f32 %v1856_v1, %v829_v4  ;;  %v1046_v1 = vmax.f32 %v970_v62, 1.0  ;;  %v1327_v62 = vld [vmem:[%s2418_s6 + $0x8] sm:$0xff] }
 0x2b4   : > { %v1133_v7 = vmax.f32 %v1101_v5, 0.0  ;;  %1685 = vmatmul.msk.bf16.gmra.mxu0 %vm767_vm1, %v1703_v2  ;;  %v1872_v2 = vpop.eup %1871  ;;  %1873 = vrcp.f32 %v1046_v1  ;;  %v976_v5 = vpop.xlane.xlu2 %975 }
 0x2b5   : > { %v2302_v6 = vpop.xlane.xlu1 %981  ;;  %1875 = vrcp.f32 %v1047_v9 }
 0x2b6   : > { %1197 = vmatmul.f32.vlgmr.msra.gmra.mxu1 %v1133_v7  ;;  %v979_v7 = vpop.xlane.xlu0 %978 }
 0x2b7   : > { %v1049_v37 = vmax.f32 %v979_v7, 1.0 }
 0x2b9   : > { %v831_v14 = vpop.f32.mrf.mxu0 }
 0x2ba   : > { %v1102_v15 = vmul.f32 %v1858_v13, %v831_v14  ;;  %v1874_v11 = vpop.eup %1873 }
 0x2bc   : > { %v1134_v17 = vmax.f32 %v1102_v15, 0.0  ;;  %v2310_v15 = vpop.xlane.xlu2 %984 }
 0x2bd   : > { %v1015_v16 = vpop.xlane.xlu1 %1014 }
 0x2be   : > { %1200 = vmatmul.f32.gmra.mxu1 %v1134_v17  ;;  %v1339_v17 = vld [vmem:[%s2418_s6 + $0x68] sm:$0xff]  ;;  %v1061_v18 = vmax.f32 %v1015_v16, 1.0  ;;  %v2315_v19 = vpop.xlane.xlu0 %987 }
 0x2bf   : > { %1344 = vmatpush.msra.mxu2 %v1339_v17  ;;  %1833 = vmatpush.msra.mxu3 %v1339_v17 }
 0x2c0   : > { %1877 = vrcp.f32 %v1061_v18 }
 0x2c1   : > { %v834_v24 = vpop.f32.mrf.mxu0 }
 0x2c2   : > { %v1103_v26 = vmul.f32 %v1860_v21, %v834_v24  ;;  %v1338_v21 = vld [vmem:[%s2418_s6 + $0x60] sm:$0xff]  ;;  %v1876_v24 = vpop.eup %1875 }
 0x2c3   : > { %1345 = vmatpush.msra.mxu2 %v1338_v21  ;;  %1834 = vmatpush.msra.mxu3 %v1338_v21 }
 0x2c4   : > { %v1135_v28 = vmax.f32 %v1103_v26, 0.0  ;;  %1686 = vmatmul.msk.bf16.gmra.mxu0 %vm767_vm1, %v1704_v22  ;;  %v1048_v22 = vmax.f32 %v976_v5, 1.0  ;;  %v1051_v5 = vmax.f32 %v2310_v15, 1.0  ;;  %v1052_v15 = vmax.f32 %v2315_v19, 1.0 }
 0x2c5   : > { %1346 = vmatpush.msra.mxu2 %v1337_v23  ;;  %1835 = vmatpush.msra.mxu3 %v1337_v23  ;;  %v2340_v45 = vpop.xlane.xlu1 %993 }
 0x2c6   : > { %1203 = vmatmul.f32.gmra.mxu1 %v1135_v28  ;;  %1879 = vrcp.f32 %v1048_v22  ;;  %v2326_v28 = vpop.xlane.xlu2 %990  ;;  %v1878_v30 = vpop.eup %1877 }
 0x2c7   : > { %1347 = vmatpush.msra.mxu2 %v1336_v25  ;;  %1836 = vmatpush.msra.mxu3 %v1336_v25 }
 0x2c9   : > { %v836_v32 = vpop.f32.mrf.mxu0  ;;  %1348 = vmatpush.msra.mxu2 %v1335_v29  ;;  %1837 = vmatpush.msra.mxu3 %v1335_v29 }
 0x2ca   : > { %v1104_v33 = vmul.f32 %v1862_v31, %v836_v32  ;;  %v1018_v31 = vpop.xlane.xlu0 %1017  ;;  %v889_v32 = vpop.f32.mrf.mxu3 }
 0x2cb   : > { %v1062_v34 = vmax.f32 %v1018_v31, 1.0  ;;  %v1125_v35 = vmul.f32 %v1878_v30, %v889_v32  ;;  %v1053_v31 = vmax.f32 %v2326_v28, 1.0 }
 0x2cc   : > { %v1136_v36 = vmax.f32 %v1104_v33, 0.0 }
 0x2cd   : > { %v1157_v38 = vmax.f32 %v1125_v35, 0.0  ;;  %1881 = vrcp.f32 %v1062_v34 }
 0x2ce   : > { %1206 = vmatmul.f32.gmra.mxu1 %v1136_v36  ;;  %v1334_v36 = vld [vmem:[%s2418_s6 + $0x40] sm:$0xff]  ;;  %1883 = vrcp.f32 %v1049_v37 }
 0x2cf   : > { %1349 = vmatpush.msra.mxu2 %v1334_v36  ;;  %1838 = vmatpush.msra.mxu3 %v1334_v36 }
 0x2d0   : > { %1269 = vmatmul.f32.vlgmr.msrb.gmra.mxu3 %v1157_v38 }
 0x2d1   : > { %v839_v41 = vpop.f32.mrf.mxu0 }
 0x2d2   : > { %v1105_v42 = vmul.f32 %v1864_v39, %v839_v41  ;;  %v1333_v39 = vld [vmem:[%s2418_s6 + $0x38] sm:$0xff]  ;;  %v1332_v41 = vld [vmem:[%s2418_s6 + $0x30] sm:$0xff] }
 0x2d3   : > { %1350 = vmatpush.msra.mxu2 %v1333_v39  ;;  %1839 = vmatpush.msra.mxu3 %v1333_v39 }
 0x2d4   : > { %v1137_v44 = vmax.f32 %v1105_v42, 0.0  ;;  %1687 = vmatmul.msk.bf16.gmra.mxu0 %vm767_vm1, %v1705_v40  ;;  %v1880_v40 = vpop.eup %1879 }
 0x2d5   : > { %1351 = vmatpush.msra.mxu2 %v1332_v41  ;;  %1840 = vmatpush.msra.mxu3 %v1332_v41  ;;  %v1882_v51 = vpop.eup %1881 }
 0x2d6   : > { %1209 = vmatmul.f32.gmra.mxu1 %v1137_v44  ;;  %v1021_v44 = vpop.xlane.xlu2 %1020 }
 0x2d9   : > { %v841_v47 = vpop.f32.mrf.mxu0 }
 0x2da   : > { %v1106_v48 = vmul.f32 %v1866_v46, %v841_v47  ;;  %v1331_v46 = vld [vmem:[%s2418_s6 + $0x28] sm:$0xff]  ;;  %v1063_v47 = vmax.f32 %v1021_v44, 1.0 }
 0x2db   : > { %1352 = vmatpush.msra.mxu2 %v1331_v46  ;;  %1841 = vmatpush.msra.mxu3 %v1331_v46 }
 0x2dc   : > { %v1138_v50 = vmax.f32 %v1106_v48, 0.0  ;;  %v891_v48 = vpop.f32.mrf.mxu3  ;;  %1885 = vrcp.f32 %v1063_v47 }
 0x2de   : > { %1212 = vmatmul.f32.gmra.mxu1 %v1138_v50  ;;  %v1330_v50 = vld [vmem:[%s2418_s6 + $0x20] sm:$0xff]  ;;  %v2364_v10 = vpop.xlane.xlu2 %999 }
 0x2df   : > { %1353 = vmatpush.msra.mxu2 %v1330_v50  ;;  %1842 = vmatpush.msra.mxu3 %v1330_v50 }
 0x2e1   : > { %v844_v54 = vpop.f32.mrf.mxu0 }
 0x2e2   : > { %v1107_v55 = vmul.f32 %v1868_v52, %v844_v54  ;;  %v1050_v52 = vmax.f32 %v2302_v6, 1.0  ;;  %v1329_v54 = vld [vmem:[%s2418_s6 + $0x18] sm:$0xff] }
 0x2e3   : > { %1354 = vmatpush.msra.mxu2 %v1329_v54  ;;  %1843 = vmatpush.msra.mxu3 %v1329_v54 }
 0x2e4   : > { %v1139_v57 = vmax.f32 %v1107_v55, 0.0  ;;  %1688 = vmatmul.msk.bf16.gmra.mxu0 %vm767_vm1, %v1706_v53  ;;  %v1126_v53 = vmul.f32 %v1882_v51, %v891_v48  ;;  %v1884_v55 = vpop.eup %1883  ;;  %1887 = vrcp.f32 %v1050_v52  ;;  %v894_v1 = vpop.f32.mrf.mxu3 }
 0x2e5   : > { %v1886_v63 = vpop.eup %1885 }
 0x2e6   : > { %1215 = vmatmul.f32.gmra.mxu1 %v1139_v57  ;;  %v1158_v56 = vmax.f32 %v1126_v53, 0.0  ;;  %v1328_v57 = vld [vmem:[%s2418_s6 + $0x10] sm:$0xff]  ;;  %v1030_v23 = vpop.xlane.xlu2 %1029 }
 0x2e7   : > { %1355 = vmatpush.msra.mxu2 %v1328_v57  ;;  %1844 = vmatpush.msra.mxu3 %v1328_v57 }
 0x2e8   : > { %1272 = vmatmul.f32.gmra.mxu3 %v1158_v56 }
 0x2e9   : > { %v846_v60 = vpop.f32.mrf.mxu0  ;;  %1356 = vmatpush.msra.mxu2 %v1327_v62  ;;  %1845 = vmatpush.msra.mxu3 %v1327_v62 }
 0x2ea   : > { %v1108_v61 = vmul.f32 %v1870_v59, %v846_v60  ;;  %v1024_v60 = vpop.xlane.xlu1 %1023  ;;  %v1888_v7 = vpop.eup %1887 }
 0x2ec   : > { %v1140_v0 = vmax.f32 %v1108_v61, 0.0  ;;  %v2355_v61 = vpop.xlane.xlu0 %996 }
 0x2ee   : > { %1218 = vmatmul.f32.gmra.mxu1 %v1140_v0  ;;  %v1064_v0 = vmax.f32 %v1024_v60, 1.0 }
 0x2f0   : > { %1889 = vrcp.f32 %v1064_v0 }
 0x2f1   : > { %v849_v3 = vpop.f32.mrf.mxu0  ;;  %1891 = vrcp.f32 %v1051_v5 }
 0x2f2   : > { %v1109_v4 = vmul.f32 %v1872_v2, %v849_v3  ;;  %v1127_v3 = vmul.f32 %v1886_v63, %v894_v1 }
 0x2f4   : > { %v1141_v8 = vmax.f32 %v1109_v4, 0.0  ;;  %v1326_v4 = vld [vmem:[%s2418_s6] sm:$0xff]  ;;  %v1159_v6 = vmax.f32 %v1127_v3, 0.0 }
 0x2f5   : > { %1357 = vmatpush.msra.mxu2 %v1326_v4  ;;  %1846 = vmatpush.msra.mxu3 %v1326_v4 }
 0x2f6   : > { %1221 = vmatmul.f32.gmra.mxu1 %v1141_v8  ;;  %1275 = vmatmul.f32.gmra.mxu3 %v1159_v6  ;;  %v1890_v12 = vpop.eup %1889 }
 0x2f9   : > { %v851_v13 = vpop.f32.mrf.mxu0 }
 0x2fa   : > { %v1110_v14 = vmul.f32 %v1874_v11, %v851_v13  ;;  %v1027_v11 = vpop.xlane.xlu0 %1026 }
 0x2fb   : > { %v1065_v13 = vmax.f32 %v1027_v11, 1.0 }
 0x2fc   : > { %v1142_v20 = vmax.f32 %v1110_v14, 0.0  ;;  %v896_v14 = vpop.f32.mrf.mxu3 }
 0x2fd   : > { %v1128_v17 = vmul.f32 %v1890_v12, %v896_v14  ;;  %1893 = vrcp.f32 %v1065_v13 }
 0x2fe   : > { %1224 = vmatmul.f32.gmra.mxu1 %v1142_v20  ;;  %v1892_v20 = vpop.eup %1891  ;;  %1895 = vrcp.f32 %v1052_v15 }
 0x2ff   : > { %v1160_v18 = vmax.f32 %v1128_v17, 0.0 }
 0x301   : > { %v854_v26 = vpop.f32.mrf.mxu0  ;;  %1278 = vmatmul.f32.gmra.mxu3 %v1160_v18 }
 0x302   : > { %v1111_v27 = vmul.f32 %v1876_v24, %v854_v26  ;;  %v2367_v24 = vpop.xlane.xlu1 %1002  ;;  %v1066_v26 = vmax.f32 %v1030_v23, 1.0  ;;  %v2370_v36 = vpop.xlane.xlu0 %1005 }
 0x303   : > { %v1894_v25 = vpop.eup %1893  ;;  %v1058_v17 = vmax.f32 %v2370_v36, 1.0 }
 0x304   : > { %v1143_v33 = vmax.f32 %v1111_v27, 0.0  ;;  %v899_v27 = vpop.f32.mrf.mxu3  ;;  %1897 = vrcp.f32 %v1066_v26  ;;  %v1896_v32 = vpop.eup %1895 }
 0x305   : > { %v1129_v30 = vmul.f32 %v1894_v25, %v899_v27  ;;  %1899 = vrcp.f32 %v1053_v31 }
 0x306   : > { %1227 = vmatmul.f32.gmra.mxu1 %v1143_v33 }
 0x307   : > { %v1161_v19 = vmax.f32 %v1129_v30, 0.0 }
 0x309   : > { %v856_v42 = vpop.f32.mrf.mxu0  ;;  %1281 = vmatmul.f32.gmra.mxu3 %v1161_v19 }
 0x30a   : > { %v1112_v43 = vmul.f32 %v1880_v40, %v856_v42  ;;  %v1033_v35 = vpop.xlane.xlu1 %1032  ;;  %v1898_v37 = vpop.eup %1897  ;;  %v1054_v42 = vmax.f32 %v2340_v45, 1.0 }
 0x30b   : > { %v1067_v38 = vmax.f32 %v1033_v35, 1.0  ;;  %v1036_v47 = vpop.xlane.xlu0 %1035 }
 0x30c   : > { %v1144_v49 = vmax.f32 %v1112_v43, 0.0  ;;  %v901_v39 = vpop.f32.mrf.mxu3  ;;  %v1900_v43 = vpop.eup %1899  ;;  %v1068_v50 = vmax.f32 %v1036_v47, 1.0 }
 0x30d   : > { %v1130_v41 = vmul.f32 %v1898_v37, %v901_v39  ;;  %1901 = vrcp.f32 %v1067_v38 }
 0x30e   : > { %1230 = vmatmul.f32.gmra.mxu1 %v1144_v49  ;;  %1903 = vrcp.f32 %v1054_v42 }
 0x30f   : > { %v1162_v28 = vmax.f32 %v1130_v41, 0.0  ;;  %1905 = vrcp.f32 %v1068_v50 }
 0x311   : > { %v859_v58 = vpop.f32.mrf.mxu0  ;;  %1284 = vmatmul.f32.gmra.mxu3 %v1162_v28 }
 0x312   : > { %v1113_v59 = vmul.f32 %v1884_v55, %v859_v58  ;;  %v1055_v55 = vmax.f32 %v2355_v61, 1.0  ;;  %v1012_v30 = vpop.xlane.xlu1 %1011 }
 0x313   : > { %v1902_v48 = vpop.eup %1901 }
 0x314   : > { %v1145_v2 = vmax.f32 %v1113_v59, 0.0  ;;  %v904_v51 = vpop.f32.mrf.mxu3  ;;  %v1904_v56 = vpop.eup %1903  ;;  %1907 = vrcp.f32 %v1055_v55 }
 0x315   : > { %v1131_v54 = vmul.f32 %v1902_v48, %v904_v51  ;;  %v1906_v59 = vpop.eup %1905 }
 0x316   : > { %1233 = vmatmul.f32.gmra.mxu1 %v1145_v2  ;;  %v1056_v2 = vmax.f32 %v2364_v10, 1.0 }
 0x317   : > { %v1163_v45 = vmax.f32 %v1131_v54, 0.0 }
 0x318   : > { %1909 = vrcp.f32 %v1056_v2 }
 0x319   : > { %v861_v8 = vpop.f32.mrf.mxu0  ;;  %1287 = vmatmul.f32.gmra.mxu3 %v1163_v45 }
 0x31a   : > { %v1114_v9 = vmul.f32 %v1888_v7, %v861_v8  ;;  %v1908_v3 = vpop.eup %1907 }
 0x31c   : > { %v1146_v16 = vmax.f32 %v1114_v9, 0.0  ;;  %v906_v62 = vpop.f32.mrf.mxu3  ;;  %v1057_v9 = vmax.f32 %v2367_v24, 1.0 }
 0x31d   : > { %v1132_v1 = vmul.f32 %v1906_v59, %v906_v62 }
 0x31e   : > { %1236 = vmatmul.f32.gmra.mxu1 %v1146_v16  ;;  %v1910_v11 = vpop.eup %1909  ;;  %1911 = vrcp.f32 %v1057_v9 }
 0x31f   : > { %v1164_v61 = vmax.f32 %v1132_v1, 0.0  ;;  %1913 = vrcp.f32 %v1058_v17 }
 0x321   : > { %v864_v21 = vpop.f32.mrf.mxu0  ;;  %1290 = vmatmul.f32.gmra.mxu3 %v1164_v61 }
 0x322   : > { %v1115_v22 = vmul.f32 %v1892_v20, %v864_v21  ;;  %v1009_v21 = vpop.xlane.xlu2 %1008 }
 0x323   : > { %v1059_v25 = vmax.f32 %v1009_v21, 1.0 }
 0x324   : > { %v1147_v29 = vmax.f32 %v1115_v22, 0.0  ;;  %v1912_v15 = vpop.eup %1911 }
 0x325   : > { %v1914_v26 = vpop.eup %1913  ;;  %1915 = vrcp.f32 %v1059_v25 }
 0x326   : > { %1239 = vmatmul.f32.gmra.mxu1 %v1147_v29 }
 0x329   : > { %v866_v33 = vpop.f32.mrf.mxu0 }
 0x32a   : > { %v1116_v34 = vmul.f32 %v1896_v32, %v866_v33  ;;  %v1060_v33 = vmax.f32 %v1012_v30, 1.0 }
 0x32c   : > { %v1148_v40 = vmax.f32 %v1116_v34, 0.0  ;;  %v1916_v34 = vpop.eup %1915  ;;  %1917 = vrcp.f32 %v1060_v33 }
 0x32e   : > { %1242 = vmatmul.f32.gmra.mxu1 %v1148_v40 }
 0x331   : > { %v869_v44 = vpop.f32.mrf.mxu0 }
 0x332   : > { %v1117_v46 = vmul.f32 %v1900_v43, %v869_v44  ;;  %v1918_v40 = vpop.eup %1917 }
 0x333   : > { %v1198_v49 = vpop.f32.mrf.mxu1 }
 0x334   : > { %v1149_v52 = vmax.f32 %v1117_v46, 0.0  ;;  %v1294_v53 = vmax.f32 %v1198_v49, 0.0 }
 0x336   : > { %1245 = vmatmul.f32.gmra.mxu1 %v1149_v52  ;;  %1358 = vmatmul.f32.vlgmr.msra.gmra.mxu2 %v1294_v53 }
 0x339   : > { %v871_v57 = vpop.f32.mrf.mxu0 }
 0x33a   : > { %v1118_v58 = vmul.f32 %v1904_v56, %v871_v57 }
 0x33b   : > { %v1201_v60 = vpop.f32.mrf.mxu1 }
 0x33c   : > { %v1150_v63 = vmax.f32 %v1118_v58, 0.0  ;;  %v1295_v0 = vmax.f32 %v1201_v60, 0.0 }
 0x33e   : > { %1248 = vmatmul.f32.gmra.mxu1 %v1150_v63  ;;  %1361 = vmatmul.f32.gmra.mxu2 %v1295_v0 }
 0x341   : > { %v874_v4 = vpop.f32.mrf.mxu0 }
 0x342   : > { %v1119_v5 = vmul.f32 %v1908_v3, %v874_v4 }
 0x343   : > { %v1204_v6 = vpop.f32.mrf.mxu1 }
 0x344   : > { %v1151_v7 = vmax.f32 %v1119_v5, 0.0  ;;  %v1296_v8 = vmax.f32 %v1204_v6, 0.0 }
 0x346   : > { %1251 = vmatmul.f32.gmra.mxu1 %v1151_v7  ;;  %1364 = vmatmul.f32.gmra.mxu2 %v1296_v8 }
 0x349   : > { %v876_v12 = vpop.f32.mrf.mxu0 }
 0x34a   : > { %v1120_v13 = vmul.f32 %v1910_v11, %v876_v12 }
 0x34b   : > { %v1207_v10 = vpop.f32.mrf.mxu1 }
 0x34c   : > { %v1152_v14 = vmax.f32 %v1120_v13, 0.0  ;;  %v1297_v16 = vmax.f32 %v1207_v10, 0.0 }
 0x34e   : > { %1254 = vmatmul.f32.gmra.mxu1 %v1152_v14  ;;  %1367 = vmatmul.f32.gmra.mxu2 %v1297_v16 }
 0x351   : > { %v879_v18 = vpop.f32.mrf.mxu0 }
 0x352   : > { %v1121_v20 = vmul.f32 %v1912_v15, %v879_v18 }
 0x353   : > { %v1210_v22 = vpop.f32.mrf.mxu1  ;;  %v1270_v53 = vpop.f32.mrf.mxu3 }
 0x354   : > { %v1153_v23 = vmax.f32 %v1121_v20, 0.0  ;;  %v1298_v24 = vmax.f32 %v1210_v22, 0.0  ;;  %v1318_v55 = vmax.f32 %v1270_v53, 0.0 }
 0x356   : > { %1257 = vmatmul.f32.gmra.mxu1 %v1153_v23  ;;  %1370 = vmatmul.f32.gmra.mxu2 %v1298_v24 }
 0x357   : > { %1430 = vmatmul.f32.vlgmr.msra.gmra.mxu3 %v1318_v55 }
 0x359   : > { %v881_v27 = vpop.f32.mrf.mxu0 }
 0x35a   : > { %v1122_v29 = vmul.f32 %v1914_v26, %v881_v27 }
 0x35b   : > { %v1213_v31 = vpop.f32.mrf.mxu1 }
 0x35c   : > { %v1154_v19 = vmax.f32 %v1122_v29, 0.0  ;;  %v1299_v32 = vmax.f32 %v1213_v31, 0.0 }
 0x35e   : > { %1260 = vmatmul.f32.gmra.mxu1 %v1154_v19  ;;  %1373 = vmatmul.f32.gmra.mxu2 %v1299_v32 }
 0x361   : > { %v884_v35 = vpop.f32.mrf.mxu0 }
 0x362   : > { %v1123_v36 = vmul.f32 %v1916_v34, %v884_v35 }
 0x363   : > { %v1216_v37 = vpop.f32.mrf.mxu1 }
 0x364   : > { %v1155_v38 = vmax.f32 %v1123_v36, 0.0  ;;  %v1300_v39 = vmax.f32 %v1216_v37, 0.0 }
 0x366   : > { %1263 = vmatmul.f32.gmra.mxu1 %v1155_v38  ;;  %1376 = vmatmul.f32.gmra.mxu2 %v1300_v39 }
 0x369   : > { %v886_v41 = vpop.f32.mrf.mxu0 }
 0x36a   : > { %v1124_v42 = vmul.f32 %v1918_v40, %v886_v41 }
 0x36b   : > { %v1219_v28 = vpop.f32.mrf.mxu1  ;;  %v1273_v57 = vpop.f32.mrf.mxu3 }
 0x36c   : > { %v1156_v43 = vmax.f32 %v1124_v42, 0.0  ;;  %v1301_v44 = vmax.f32 %v1219_v28, 0.0  ;;  %v1319_v58 = vmax.f32 %v1273_v57, 0.0 }
 0x36e   : > { %1266 = vmatmul.f32.gmra.mxu1 %v1156_v43  ;;  %1379 = vmatmul.f32.gmra.mxu2 %v1301_v44 }
 0x36f   : > { %1433 = vmatmul.f32.gmra.mxu3 %v1319_v58 }
 0x373   : > { %v1222_v46 = vpop.f32.mrf.mxu1 }
 0x374   : > { %v1302_v47 = vmax.f32 %v1222_v46, 0.0 }
 0x376   : > { %1382 = vmatmul.f32.gmra.mxu2 %v1302_v47 }
 0x379   : > { %v1276_v62 = vpop.f32.mrf.mxu3 }
 0x37a   : > { %v1320_v63 = vmax.f32 %v1276_v62, 0.0 }
 0x37b   : > { %v1225_v48 = vpop.f32.mrf.mxu1 }
 0x37c   : > { %v1303_v49 = vmax.f32 %v1225_v48, 0.0  ;;  %1436 = vmatmul.f32.gmra.mxu3 %v1320_v63 }
 0x37e   : > { %1385 = vmatmul.f32.gmra.mxu2 %v1303_v49 }
 0x383   : > { %v1228_v50 = vpop.f32.mrf.mxu1 }
 0x384   : > { %v1304_v51 = vmax.f32 %v1228_v50, 0.0  ;;  %v1279_v2 = vpop.f32.mrf.mxu3 }
 0x385   : > { %v1321_v61 = vmax.f32 %v1279_v2, 0.0 }
 0x386   : > { %1388 = vmatmul.f32.gmra.mxu2 %v1304_v51 }
 0x387   : > { %1439 = vmatmul.f32.gmra.mxu3 %v1321_v61 }
 0x38b   : > { %v1231_v52 = vpop.f32.mrf.mxu1 }
 0x38c   : > { %v1305_v54 = vmax.f32 %v1231_v52, 0.0  ;;  %v1282_v5 = vpop.f32.mrf.mxu3 }
 0x38d   : > { %v1322_v6 = vmax.f32 %v1282_v5, 0.0 }
 0x38e   : > { %1391 = vmatmul.f32.gmra.mxu2 %v1305_v54 }
 0x38f   : > { %1442 = vmatmul.f32.gmra.mxu3 %v1322_v6 }
 0x393   : > { %v1234_v45 = vpop.f32.mrf.mxu1 }
 0x394   : > { %v1306_v56 = vmax.f32 %v1234_v45, 0.0  ;;  %v1285_v9 = vpop.f32.mrf.mxu3 }
 0x395   : > { %v1323_v11 = vmax.f32 %v1285_v9, 0.0 }
 0x396   : > { %1394 = vmatmul.f32.gmra.mxu2 %v1306_v56 }
 0x397   : > { %1445 = vmatmul.f32.gmra.mxu3 %v1323_v11 }
 0x39b   : > { %v1237_v59 = vpop.f32.mrf.mxu1 }
 0x39c   : > { %v1307_v60 = vmax.f32 %v1237_v59, 0.0  ;;  %v1288_v16 = vpop.f32.mrf.mxu3 }
 0x39d   : > { %v1324_v17 = vmax.f32 %v1288_v16, 0.0 }
 0x39e   : > { %1397 = vmatmul.f32.gmra.mxu2 %v1307_v60 }
 0x39f   : > { %1448 = vmatmul.f32.gmra.mxu3 %v1324_v17 }
 0x3a3   : > { %v1240_v0 = vpop.f32.mrf.mxu1 }
 0x3a4   : > { %v1308_v1 = vmax.f32 %v1240_v0, 0.0  ;;  %v1291_v22 = vpop.f32.mrf.mxu3 }
 0x3a5   : > { %v1325_v23 = vmax.f32 %v1291_v22, 0.0 }
 0x3a6   : > { %1400 = vmatmul.f32.gmra.mxu2 %v1308_v1 }
 0x3a7   : > { %1451 = vmatmul.f32.gmra.mxu3 %v1325_v23 }
 0x3ab   : > { %v1243_v3 = vpop.f32.mrf.mxu1 }
 0x3ac   : > { %v1309_v4 = vmax.f32 %v1243_v3, 0.0 }
 0x3ae   : > { %1403 = vmatmul.f32.gmra.mxu2 %v1309_v4 }
 0x3b3   : > { %v1246_v7 = vpop.f32.mrf.mxu1 }
 0x3b4   : > { %v1310_v8 = vmax.f32 %v1246_v7, 0.0 }
 0x3b6   : > { %1406 = vmatmul.f32.gmra.mxu2 %v1310_v8 }
 0x3b9   : > { %v1359_v12 = vpop.f32.mrf.mxu2 }
 0x3ba   : > { %v1455_v13 = vmax.f32 %v1359_v12, 0.0 }
 0x3bb   : > { %v1249_v10 = vpop.f32.mrf.mxu1 }
 0x3bc   : > { %1487 = vst [vmem:[%s1983_s11] sm:$0xff] %v1455_v13  ;;  %v1311_v14 = vmax.f32 %v1249_v10, 0.0 }
 0x3be   : > { %1409 = vmatmul.f32.gmra.mxu2 %v1311_v14 }
 0x3c1   : > { %v1362_v15 = vpop.f32.mrf.mxu2 }
 0x3c2   : > { %v1456_v18 = vmax.f32 %v1362_v15, 0.0 }
 0x3c3   : > { %v1252_v20 = vpop.f32.mrf.mxu1 }
 0x3c4   : > { %1488 = vst [vmem:[%s1983_s11 + $0x8] sm:$0xff] %v1456_v18  ;;  %v1312_v21 = vmax.f32 %v1252_v20, 0.0 }
 0x3c6   : > { %1412 = vmatmul.f32.gmra.mxu2 %v1312_v21 }
 0x3c9   : > { %v1365_v24 = vpop.f32.mrf.mxu2 }
 0x3ca   : > { %v1457_v25 = vmax.f32 %v1365_v24, 0.0 }
 0x3cb   : > { %v1255_v26 = vpop.f32.mrf.mxu1 }
 0x3cc   : > { %1489 = vst [vmem:[%s1983_s11 + $0x10] sm:$0xff] %v1457_v25  ;;  %v1313_v27 = vmax.f32 %v1255_v26, 0.0 }
 0x3ce   : > { %1415 = vmatmul.f32.gmra.mxu2 %v1313_v27 }
 0x3d1   : > { %v1368_v29 = vpop.f32.mrf.mxu2 }
 0x3d2   : > { %v1458_v30 = vmax.f32 %v1368_v29, 0.0 }
 0x3d3   : > { %v1258_v31 = vpop.f32.mrf.mxu1 }
 0x3d4   : > { %1490 = vst [vmem:[%s1983_s11 + $0x18] sm:$0xff] %v1458_v30  ;;  %v1314_v19 = vmax.f32 %v1258_v31, 0.0 }
 0x3d6   : > { %1418 = vmatmul.f32.gmra.mxu2 %v1314_v19 }
 0x3d9   : > { %v1371_v32 = vpop.f32.mrf.mxu2 }
 0x3da   : > { %v1459_v33 = vmax.f32 %v1371_v32, 0.0  ;;  %v1431_v53 = vpop.f32.mrf.mxu3 }
 0x3db   : > { %v1261_v34 = vpop.f32.mrf.mxu1  ;;  %v1479_v55 = vmax.f32 %v1431_v53, 0.0 }
 0x3dc   : > { %1491 = vst [vmem:[%s1983_s11 + $0x20] sm:$0xff] %v1459_v33  ;;  %v1315_v35 = vmax.f32 %v1261_v34, 0.0 }
 0x3dd   : > { %1511 = vst [vmem:[%s1983_s11 + $0xc0] sm:$0xff] %v1479_v55 }
 0x3de   : > { %1421 = vmatmul.f32.gmra.mxu2 %v1315_v35 }
 0x3e1   : > { %v1374_v36 = vpop.f32.mrf.mxu2 }
 0x3e2   : > { %v1460_v37 = vmax.f32 %v1374_v36, 0.0 }
 0x3e3   : > { %v1264_v38 = vpop.f32.mrf.mxu1 }
 0x3e4   : > { %1492 = vst [vmem:[%s1983_s11 + $0x28] sm:$0xff] %v1460_v37  ;;  %v1316_v39 = vmax.f32 %v1264_v38, 0.0 }
 0x3e6   : > { %1424 = vmatmul.f32.gmra.mxu2 %v1316_v39 }
 0x3e9   : > { %v1377_v40 = vpop.f32.mrf.mxu2 }
 0x3ea   : > { %v1461_v41 = vmax.f32 %v1377_v40, 0.0 }
 0x3eb   : > { %v1267_v42 = vpop.f32.mrf.mxu1 }
 0x3ec   : > { %1493 = vst [vmem:[%s1983_s11 + $0x30] sm:$0xff] %v1461_v41  ;;  %v1317_v28 = vmax.f32 %v1267_v42, 0.0 }
 0x3ee   : > { %1427 = vmatmul.f32.gmra.mxu2 %v1317_v28 }
 0x3f1   : > { %v1380_v43 = vpop.f32.mrf.mxu2 }
 0x3f2   : > { %v1462_v44 = vmax.f32 %v1380_v43, 0.0  ;;  %v1434_v57 = vpop.f32.mrf.mxu3 }
 0x3f3   : > { %v1480_v58 = vmax.f32 %v1434_v57, 0.0 }
 0x3f4   : > { %1494 = vst [vmem:[%s1983_s11 + $0x38] sm:$0xff] %v1462_v44 }
 0x3f5   : > { %1512 = vst [vmem:[%s1983_s11 + $0xc8] sm:$0xff] %v1480_v58 }
 0x3f9   : > { %v1383_v46 = vpop.f32.mrf.mxu2 }
 0x3fa   : > { %v1463_v47 = vmax.f32 %v1383_v46, 0.0 }
 0x3fc   : > { %1495 = vst [vmem:[%s1983_s11 + $0x40] sm:$0xff] %v1463_v47 }
 0x3ff   : > { %v1437_v62 = vpop.f32.mrf.mxu3 }
 0x400   : > { %v1481_v63 = vmax.f32 %v1437_v62, 0.0 }
 0x401   : > { %v1386_v48 = vpop.f32.mrf.mxu2 }
 0x402   : > { %v1464_v49 = vmax.f32 %v1386_v48, 0.0  ;;  %1513 = vst [vmem:[%s1983_s11 + $0xd0] sm:$0xff] %v1481_v63 }
 0x404   : > { %1496 = vst [vmem:[%s1983_s11 + $0x48] sm:$0xff] %v1464_v49 }
 0x409   : > { %v1389_v50 = vpop.f32.mrf.mxu2 }
 0x40a   : > { %v1465_v51 = vmax.f32 %v1389_v50, 0.0  ;;  %v1440_v2 = vpop.f32.mrf.mxu3 }
 0x40b   : > { %v1482_v61 = vmax.f32 %v1440_v2, 0.0 }
 0x40c   : > { %1497 = vst [vmem:[%s1983_s11 + $0x50] sm:$0xff] %v1465_v51 }
 0x40d   : > { %1514 = vst [vmem:[%s1983_s11 + $0xd8] sm:$0xff] %v1482_v61 }
 0x411   : > { %v1392_v52 = vpop.f32.mrf.mxu2 }
 0x412   : > { %v1466_v54 = vmax.f32 %v1392_v52, 0.0  ;;  %v1443_v5 = vpop.f32.mrf.mxu3 }
 0x413   : > { %v1483_v6 = vmax.f32 %v1443_v5, 0.0 }
 0x414   : > { %1498 = vst [vmem:[%s1983_s11 + $0x58] sm:$0xff] %v1466_v54 }
 0x415   : > { %1515 = vst [vmem:[%s1983_s11 + $0xe0] sm:$0xff] %v1483_v6 }
 0x419   : > { %v1395_v45 = vpop.f32.mrf.mxu2 }
 0x41a   : > { %v1467_v56 = vmax.f32 %v1395_v45, 0.0  ;;  %v1446_v9 = vpop.f32.mrf.mxu3 }
 0x41b   : > { %v1484_v11 = vmax.f32 %v1446_v9, 0.0 }
 0x41c   : > { %1499 = vst [vmem:[%s1983_s11 + $0x60] sm:$0xff] %v1467_v56 }
 0x41d   : > { %1516 = vst [vmem:[%s1983_s11 + $0xe8] sm:$0xff] %v1484_v11 }
 0x421   : > { %v1398_v59 = vpop.f32.mrf.mxu2 }
 0x422   : > { %v1468_v60 = vmax.f32 %v1398_v59, 0.0  ;;  %v1449_v10 = vpop.f32.mrf.mxu3 }
 0x423   : > { %v1485_v14 = vmax.f32 %v1449_v10, 0.0 }
 0x424   : > { %1500 = vst [vmem:[%s1983_s11 + $0x68] sm:$0xff] %v1468_v60 }
 0x425   : > { %1517 = vst [vmem:[%s1983_s11 + $0xf0] sm:$0xff] %v1485_v14 }
 0x429   : > { %v1401_v0 = vpop.f32.mrf.mxu2 }
 0x42a   : > { %v1469_v1 = vmax.f32 %v1401_v0, 0.0  ;;  %v1452_v15 = vpop.f32.mrf.mxu3 }
 0x42b   : > { %v1486_v18 = vmax.f32 %v1452_v15, 0.0 }
 0x42c   : > { %1501 = vst [vmem:[%s1983_s11 + $0x70] sm:$0xff] %v1469_v1 }
 0x42d   : > { %1518 = vst [vmem:[%s1983_s11 + $0xf8] sm:$0xff] %v1486_v18 }
 0x431   : > { %v1404_v3 = vpop.f32.mrf.mxu2 }
 0x432   : > { %v1470_v4 = vmax.f32 %v1404_v3, 0.0 }
 0x434   : > { %1502 = vst [vmem:[%s1983_s11 + $0x78] sm:$0xff] %v1470_v4 }
 0x439   : > { %v1407_v7 = vpop.f32.mrf.mxu2 }
 0x43a   : > { %v1471_v8 = vmax.f32 %v1407_v7, 0.0 }
 0x43c   : > { %1503 = vst [vmem:[%s1983_s11 + $0x80] sm:$0xff] %v1471_v8 }
 0x441   : > { %v1410_v12 = vpop.f32.mrf.mxu2 }
 0x442   : > { %v1472_v13 = vmax.f32 %v1410_v12, 0.0 }
 0x444   : > { %1504 = vst [vmem:[%s1983_s11 + $0x88] sm:$0xff] %v1472_v13 }
 0x449   : > { %v1413_v16 = vpop.f32.mrf.mxu2 }
 0x44a   : > { %v1473_v17 = vmax.f32 %v1413_v16, 0.0 }
 0x44c   : > { %1505 = vst [vmem:[%s1983_s11 + $0x90] sm:$0xff] %v1473_v17 }
 0x451   : > { %v1416_v20 = vpop.f32.mrf.mxu2 }
 0x452   : > { %v1474_v21 = vmax.f32 %v1416_v20, 0.0 }
 0x454   : > { %1506 = vst [vmem:[%s1983_s11 + $0x98] sm:$0xff] %v1474_v21 }
 0x459   : > { %v1419_v22 = vpop.f32.mrf.mxu2 }
 0x45a   : > { %v1475_v23 = vmax.f32 %v1419_v22, 0.0 }
 0x45c   : > { %1507 = vst [vmem:[%s1983_s11 + $0xa0] sm:$0xff] %v1475_v23 }
 0x461   : > { %v1422_v24 = vpop.f32.mrf.mxu2 }
 0x462   : > { %v1476_v25 = vmax.f32 %v1422_v24, 0.0 }
 0x464   : > { %1508 = vst [vmem:[%s1983_s11 + $0xa8] sm:$0xff] %v1476_v25 }
 0x469   : > { %v1425_v26 = vpop.f32.mrf.mxu2 }
 0x46a   : > { %v1477_v27 = vmax.f32 %v1425_v26, 0.0 }
 0x46c   : > { %1509 = vst [vmem:[%s1983_s11 + $0xb0] sm:$0xff] %v1477_v27 }
 0x471   : > { %v1428_v29 = vpop.f32.mrf.mxu2 }
 0x472   : > { %v1478_v30 = vmax.f32 %v1428_v29, 0.0 }
 0x474   : > { %1510 = vst [vmem:[%s1983_s11 + $0xb8] sm:$0xff] %v1478_v30 }
 0x475 PF: > { %s17_s24 = sadd.s32 1, %s1925_s24  }
 0x476   : > { %p14_p5 = scmp.ge.s32.totalorder %s17_s24, 4  }
 0x478   :  { %16 = sbr.rel (!%p14_p5) target bundleno = 1 (0x1), region = 82 }

// kernel: allset_layer.2
= control target key start
LH: loop header
LB: loop body
LE: loop exit
PB: predicated region body
PF: predicated region fallthrough
CT: control target
= control target key end

     0   :  { %s3553_s2 = inlined_call_operand.vmem [shape: f32[128,128], index: 2, kind: input, shape index: {}]   ;;  %s3554_s0 = inlined_call_operand.vmem [shape: f32[512,128], index: 0, kind: input, shape index: {}]   ;;  %s3555_s3 = inlined_call_operand.vmem [shape: f32[128,128], index: 3, kind: input, shape index: {}]   ;;  %s3556_s4 = inlined_call_operand.vmem [shape: f32[128,128], index: 4, kind: input, shape index: {}]   ;;  %s3557_s1 = inlined_call_operand.vmem [shape: bf16[120,512], index: 1, kind: input, shape index: {}]   ;;  %s3558_s5 = inlined_call_operand.vmem [shape: f32[128,128], index: 5, kind: input, shape index: {}]   ;;  %s3559_s6 = inlined_call_operand.vmem [shape: f32[128,128], index: 6, kind: input, shape index: {}]   ;;  %s3560_s7 = inlined_call_operand.vmem [shape: f32[120,128], index: 7, kind: output, shape index: {}]  }
   0x1   :  { %v109_v0 = vld [vmem:[%s3553_s2 + $0x78] sm:$0xff]  ;;  %v108_v1 = vld [vmem:[%s3553_s2 + $0x70] sm:$0xff]  ;;  %v107_v2 = vld [vmem:[%s3553_s2 + $0x68] sm:$0xff] }
   0x2   :  { %110 = vmatpush.msra.mxu0 %v109_v0  ;;  %2548 = vmatpush.msra.mxu2 %v109_v0  ;;  %v106_v3 = vld [vmem:[%s3553_s2 + $0x60] sm:$0xff]  ;;  %v105_v4 = vld [vmem:[%s3553_s2 + $0x58] sm:$0xff]  ;;  %v104_v5 = vld [vmem:[%s3553_s2 + $0x50] sm:$0xff] }
   0x3   :  { %v103_v6 = vld [vmem:[%s3553_s2 + $0x48] sm:$0xff]  ;;  %v102_v7 = vld [vmem:[%s3553_s2 + $0x40] sm:$0xff]  ;;  %v101_v8 = vld [vmem:[%s3553_s2 + $0x38] sm:$0xff] }
   0x4   :  { %111 = vmatpush.msra.mxu0 %v108_v1  ;;  %2549 = vmatpush.msra.mxu2 %v108_v1  ;;  %v100_v9 = vld [vmem:[%s3553_s2 + $0x30] sm:$0xff]  ;;  %v99_v10 = vld [vmem:[%s3553_s2 + $0x28] sm:$0xff]  ;;  %v98_v11 = vld [vmem:[%s3553_s2 + $0x20] sm:$0xff] }
   0x5   :  { %v97_v12 = vld [vmem:[%s3553_s2 + $0x18] sm:$0xff]  ;;  %v96_v13 = vld [vmem:[%s3553_s2 + $0x10] sm:$0xff]  ;;  %v95_v14 = vld [vmem:[%s3553_s2 + $0x8] sm:$0xff] }
   0x6   :  { %112 = vmatpush.msra.mxu0 %v107_v2  ;;  %2550 = vmatpush.msra.mxu2 %v107_v2  ;;  %v94_v15 = vld [vmem:[%s3553_s2] sm:$0xff]  ;;  %v31_v17 = vld [vmem:[%s3554_s0 + $0x8] sm:$0xff]  ;;  %v32_v18 = vld [vmem:[%s3554_s0 + $0x10] sm:$0xff] }
   0x7   :  { %v30_v16 = vld [vmem:[%s3554_s0] sm:$0xff]  ;;  %v33_v19 = vld [vmem:[%s3554_s0 + $0x18] sm:$0xff]  ;;  %v35_v21 = vld [vmem:[%s3554_s0 + $0x28] sm:$0xff] }
   0x8   :  { %113 = vmatpush.msra.mxu0 %v106_v3  ;;  %2551 = vmatpush.msra.mxu2 %v106_v3  ;;  %v34_v20 = vld [vmem:[%s3554_s0 + $0x20] sm:$0xff]  ;;  %v36_v22 = vld [vmem:[%s3554_s0 + $0x30] sm:$0xff]  ;;  %v37_v23 = vld [vmem:[%s3554_s0 + $0x38] sm:$0xff] }
   0x9   :  { %v38_v24 = vld [vmem:[%s3554_s0 + $0x40] sm:$0xff]  ;;  %v398_v25 = vld [vmem:[%s3555_s3 + $0x78] sm:$0xff]  ;;  %v397_v26 = vld [vmem:[%s3555_s3 + $0x70] sm:$0xff] }
   0xa   :  { %114 = vmatpush.msra.mxu0 %v105_v4  ;;  %2552 = vmatpush.msra.mxu2 %v105_v4  ;;  %v396_v27 = vld [vmem:[%s3555_s3 + $0x68] sm:$0xff]  ;;  %v395_v28 = vld [vmem:[%s3555_s3 + $0x60] sm:$0xff]  ;;  %v394_v30 = vld [vmem:[%s3555_s3 + $0x58] sm:$0xff] }
   0xb   :  { %399 = vmatpush.msra.mxu1 %v398_v25  ;;  %2564 = vmatpush.msra.mxu3 %v398_v25  ;;  %v39_v29 = vld [vmem:[%s3554_s0 + $0x48] sm:$0xff]  ;;  %v393_v31 = vld [vmem:[%s3555_s3 + $0x50] sm:$0xff]  ;;  %v391_v33 = vld [vmem:[%s3555_s3 + $0x40] sm:$0xff] }
   0xc   :  { %115 = vmatpush.msra.mxu0 %v104_v5  ;;  %2553 = vmatpush.msra.mxu2 %v104_v5  ;;  %v392_v32 = vld [vmem:[%s3555_s3 + $0x48] sm:$0xff]  ;;  %v40_v34 = vld [vmem:[%s3554_s0 + $0x50] sm:$0xff]  ;;  %v390_v35 = vld [vmem:[%s3555_s3 + $0x38] sm:$0xff] }
   0xd   :  { %400 = vmatpush.msra.mxu1 %v397_v26  ;;  %2565 = vmatpush.msra.mxu3 %v397_v26  ;;  %v389_v36 = vld [vmem:[%s3555_s3 + $0x30] sm:$0xff]  ;;  %v388_v37 = vld [vmem:[%s3555_s3 + $0x28] sm:$0xff]  ;;  %v387_v38 = vld [vmem:[%s3555_s3 + $0x20] sm:$0xff] }
   0xe   :  { %116 = vmatpush.msra.mxu0 %v103_v6  ;;  %2554 = vmatpush.msra.mxu2 %v103_v6  ;;  %v41_v39 = vld [vmem:[%s3554_s0 + $0x58] sm:$0xff]  ;;  %v385_v41 = vld [vmem:[%s3555_s3 + $0x10] sm:$0xff]  ;;  %v384_v42 = vld [vmem:[%s3555_s3 + $0x8] sm:$0xff] }
   0xf   :  { %401 = vmatpush.msra.mxu1 %v396_v27  ;;  %2566 = vmatpush.msra.mxu3 %v396_v27  ;;  %v386_v40 = vld [vmem:[%s3555_s3 + $0x18] sm:$0xff]  ;;  %v42_v43 = vld [vmem:[%s3554_s0 + $0x60] sm:$0xff]  ;;  %v43_v45 = vld [vmem:[%s3554_s0 + $0x68] sm:$0xff] }
  0x10   :  { %117 = vmatpush.msra.mxu0 %v102_v7  ;;  %2555 = vmatpush.msra.mxu2 %v102_v7  ;;  %v383_v44 = vld [vmem:[%s3555_s3] sm:$0xff]  ;;  %v44_v46 = vld [vmem:[%s3554_s0 + $0x70] sm:$0xff]  ;;  %v45_v47 = vld [vmem:[%s3554_s0 + $0x78] sm:$0xff] }
  0x11   :  { %402 = vmatpush.msra.mxu1 %v395_v28  ;;  %2567 = vmatpush.msra.mxu3 %v395_v28  ;;  %v46_v49 = vld [vmem:[%s3554_s0 + $0x80] sm:$0xff]  ;;  %v47_v52 = vld [vmem:[%s3554_s0 + $0x88] sm:$0xff]  ;;  %v48_v55 = vld [vmem:[%s3554_s0 + $0x90] sm:$0xff] }
  0x12   :  { %118 = vmatpush.msra.mxu0 %v101_v8  ;;  %2556 = vmatpush.msra.mxu2 %v101_v8  ;;  %v49_v58 = vld [vmem:[%s3554_s0 + $0x98] sm:$0xff]  ;;  %v50_v61 = vld [vmem:[%s3554_s0 + $0xa0] sm:$0xff]  ;;  %v51_v0 = vld [vmem:[%s3554_s0 + $0xa8] sm:$0xff] }
  0x13   :  { %403 = vmatpush.msra.mxu1 %v394_v30  ;;  %2568 = vmatpush.msra.mxu3 %v394_v30  ;;  %v87_v2 = vld [vmem:[%s3554_s0 + $0x1c8] sm:$0xff]  ;;  %v52_v4 = vld [vmem:[%s3554_s0 + $0xb0] sm:$0xff]  ;;  %v53_v8 = vld [vmem:[%s3554_s0 + $0xb8] sm:$0xff] }
  0x14   :  { %119 = vmatpush.msra.mxu0 %v100_v9  ;;  %2557 = vmatpush.msra.mxu2 %v100_v9  ;;  %v88_v6 = vld [vmem:[%s3554_s0 + $0x1d0] sm:$0xff]  ;;  %v681_v25 = vld [vmem:[%s3556_s4 + $0x48] sm:$0xff] }
  0x15   :  { %404 = vmatpush.msra.mxu1 %v393_v31  ;;  %2569 = vmatpush.msra.mxu3 %v393_v31  ;;  %v56_v27 = vld [vmem:[%s3554_s0 + $0xd0] sm:$0xff]  ;;  %v679_v31 = vld [vmem:[%s3556_s4 + $0x38] sm:$0xff] }
  0x16   :  { %120 = vmatpush.msra.mxu0 %v99_v10  ;;  %2558 = vmatpush.msra.mxu2 %v99_v10  ;;  %v89_v10 = vld [vmem:[%s3554_s0 + $0x1d8] sm:$0xff]  ;;  %v92_v30 = vld [vmem:[%s3554_s0 + $0x1f0] sm:$0xff] }
  0x17   :  { %405 = vmatpush.msra.mxu1 %v392_v32  ;;  %2570 = vmatpush.msra.mxu3 %v392_v32  ;;  %v678_v32 = vld [vmem:[%s3556_s4 + $0x30] sm:$0xff] }
  0x18   :  { %121 = vmatpush.msra.mxu0 %v98_v11  ;;  %2559 = vmatpush.msra.mxu2 %v98_v11 }
  0x19   :  { %406 = vmatpush.msra.mxu1 %v391_v33  ;;  %2571 = vmatpush.msra.mxu3 %v391_v33  ;;  %v677_v33 = vld [vmem:[%s3556_s4 + $0x28] sm:$0xff] }
  0x1a   :  { %122 = vmatpush.msra.mxu0 %v97_v12  ;;  %2560 = vmatpush.msra.mxu2 %v97_v12  ;;  %v54_v12 = vld [vmem:[%s3554_s0 + $0xc0] sm:$0xff] }
  0x1b   :  { %407 = vmatpush.msra.mxu1 %v390_v35  ;;  %2572 = vmatpush.msra.mxu3 %v390_v35  ;;  %v57_v35 = vld [vmem:[%s3554_s0 + $0xd8] sm:$0xff] }
  0x1c   :  { %123 = vmatpush.msra.mxu0 %v96_v13  ;;  %2561 = vmatpush.msra.mxu2 %v96_v13 }
  0x1d   :  { %408 = vmatpush.msra.mxu1 %v389_v36  ;;  %2573 = vmatpush.msra.mxu3 %v389_v36 }
  0x1e   :  { %124 = vmatpush.msra.mxu0 %v95_v14  ;;  %2562 = vmatpush.msra.mxu2 %v95_v14  ;;  %v90_v14 = vld [vmem:[%s3554_s0 + $0x1e0] sm:$0xff] }
  0x1f   :  { %409 = vmatpush.msra.mxu1 %v388_v37  ;;  %2574 = vmatpush.msra.mxu3 %v388_v37  ;;  %v676_v37 = vld [vmem:[%s3556_s4 + $0x20] sm:$0xff] }
  0x20   :  { %125 = vmatpush.msra.mxu0 %v94_v15  ;;  %2563 = vmatpush.msra.mxu2 %v94_v15  ;;  %v687_v15 = vld [vmem:[%s3556_s4 + $0x78] sm:$0xff] }
  0x21   :  { %126 = vmatmul.f32.vlgmr.msra.gmra.mxu0 %v30_v16  ;;  %410 = vmatpush.msra.mxu1 %v387_v38  ;;  %v686_v16 = vld [vmem:[%s3556_s4 + $0x70] sm:$0xff] }
  0x22   :  { %2575 = vmatpush.msra.mxu3 %v387_v38  ;;  %297 = vmatmul.f32.vlgmr.msra.gmra.mxu2 %v87_v2  ;;  %v93_v38 = vld [vmem:[%s3554_s0 + $0x1f8] sm:$0xff] }
  0x23   :  { %411 = vmatpush.msra.mxu1 %v386_v40  ;;  %688 = vmatpush.msrb.mxu2 %v687_v15 }
  0x24   :  { %2576 = vmatpush.msra.mxu3 %v386_v40  ;;  %v674_v40 = vld [vmem:[%s3556_s4 + $0x10] sm:$0xff] }
  0x25   :  { %412 = vmatpush.msra.mxu1 %v385_v41  ;;  %689 = vmatpush.msrb.mxu2 %v686_v16 }
  0x26   :  { %2577 = vmatpush.msra.mxu3 %v385_v41  ;;  %v673_v41 = vld [vmem:[%s3556_s4 + $0x8] sm:$0xff] }
  0x27   :  { %413 = vmatpush.msra.mxu1 %v384_v42 }
  0x28   :  { %2578 = vmatpush.msra.mxu3 %v384_v42 }
  0x29   :  { %129 = vmatmul.f32.gmra.mxu0 %v31_v17  ;;  %414 = vmatpush.msra.mxu1 %v383_v44  ;;  %v685_v17 = vld [vmem:[%s3556_s4 + $0x68] sm:$0xff] }
  0x2a   :  { %2579 = vmatpush.msra.mxu3 %v383_v44  ;;  %300 = vmatmul.f32.gmra.mxu2 %v88_v6 }
  0x2b   :  { %690 = vmatpush.msrb.mxu2 %v685_v17 }
  0x31   :  { %132 = vmatmul.f32.gmra.mxu0 %v32_v18 }
  0x32   :  { %303 = vmatmul.f32.gmra.mxu2 %v89_v10 }
  0x39   :  { %135 = vmatmul.f32.gmra.mxu0 %v33_v19  ;;  %v55_v19 = vld [vmem:[%s3554_s0 + $0xc8] sm:$0xff] }
  0x3a   :  { %306 = vmatmul.f32.gmra.mxu2 %v90_v14 }
  0x41   :  { %138 = vmatmul.f32.gmra.mxu0 %v34_v20 }
  0x49   :  { %141 = vmatmul.f32.gmra.mxu0 %v35_v21  ;;  %v684_v21 = vld [vmem:[%s3556_s4 + $0x60] sm:$0xff] }
  0x4a   :  { %691 = vmatpush.msrb.mxu2 %v684_v21 }
  0x51   :  { %144 = vmatmul.f32.gmra.mxu0 %v36_v22  ;;  %v91_v22 = vld [vmem:[%s3554_s0 + $0x1e8] sm:$0xff] }
  0x52   :  { %309 = vmatmul.f32.gmra.mxu2 %v91_v22 }
  0x59   :  { %147 = vmatmul.f32.gmra.mxu0 %v37_v23  ;;  %v683_v23 = vld [vmem:[%s3556_s4 + $0x58] sm:$0xff] }
  0x5a   :  { %692 = vmatpush.msrb.mxu2 %v683_v23 }
  0x5b   :  { %312 = vmatmul.f32.gmra.mxu2 %v92_v30 }
  0x61   :  { %150 = vmatmul.f32.gmra.mxu0 %v38_v24  ;;  %v682_v24 = vld [vmem:[%s3556_s4 + $0x50] sm:$0xff] }
  0x62   :  { %693 = vmatpush.msrb.mxu2 %v682_v24  ;;  %v68_v24 = vld [vmem:[%s3554_s0 + $0x130] sm:$0xff] }
  0x63   :  { %315 = vmatmul.f32.gmra.mxu2 %v93_v38  ;;  %v70_v38 = vld [vmem:[%s3554_s0 + $0x140] sm:$0xff] }
  0x64   :  { %694 = vmatpush.msrb.mxu2 %v681_v25 }
  0x69   :  { %153 = vmatmul.f32.gmra.mxu0 %v39_v29  ;;  %v680_v29 = vld [vmem:[%s3556_s4 + $0x40] sm:$0xff] }
  0x6a   :  { %695 = vmatpush.msrb.mxu2 %v680_v29 }
  0x6c   :  { %696 = vmatpush.msrb.mxu2 %v679_v31  ;;  %v69_v31 = vld [vmem:[%s3554_s0 + $0x138] sm:$0xff] }
  0x6e   :  { %697 = vmatpush.msrb.mxu2 %v678_v32 }
  0x70   :  { %698 = vmatpush.msrb.mxu2 %v677_v33 }
  0x71   :  { %156 = vmatmul.f32.gmra.mxu0 %v40_v34 }
  0x72   :  { %699 = vmatpush.msrb.mxu2 %v676_v37 }
  0x79   :  { %159 = vmatmul.f32.gmra.mxu0 %v41_v39  ;;  %v675_v39 = vld [vmem:[%s3556_s4 + $0x18] sm:$0xff] }
  0x7a   :  { %700 = vmatpush.msrb.mxu2 %v675_v39 }
  0x7c   :  { %701 = vmatpush.msrb.mxu2 %v674_v40 }
  0x7e   :  { %702 = vmatpush.msrb.mxu2 %v673_v41 }
  0x81   :  { %162 = vmatmul.f32.gmra.mxu0 %v42_v43  ;;  %v58_v43 = vld [vmem:[%s3554_s0 + $0xe0] sm:$0xff] }
  0x89   :  { %165 = vmatmul.f32.gmra.mxu0 %v43_v45  ;;  %v672_v45 = vld [vmem:[%s3556_s4] sm:$0xff] }
  0x8a   :  { %703 = vmatpush.msrb.mxu2 %v672_v45  ;;  %v71_v45 = vld [vmem:[%s3554_s0 + $0x148] sm:$0xff] }
  0x91   :  { %168 = vmatmul.f32.gmra.mxu0 %v44_v46 }
  0x99   :  { %171 = vmatmul.f32.gmra.mxu0 %v45_v47  ;;  %v59_v47 = vld [vmem:[%s3554_s0 + $0xe8] sm:$0xff] }
  0x9e   :  { %v127_v48 = vpop.f32.mrf.mxu0 }
  0x9f   :  { %v319_v50 = vmax.f32 %v127_v48, 0.0 }
  0xa1   :  { %174 = vmatmul.f32.gmra.mxu0 %v46_v49  ;;  %415 = vmatmul.f32.vlgmr.msra.gmra.mxu1 %v319_v50  ;;  %v60_v50 = vld [vmem:[%s3554_s0 + $0xf0] sm:$0xff] }
  0xa5   :  { %v298_v21 = vpop.f32.mrf.mxu2 }
  0xa6   :  { %v130_v51 = vpop.f32.mrf.mxu0  ;;  %v376_v25 = vmax.f32 %v298_v21, 0.0 }
  0xa7   :  { %v320_v53 = vmax.f32 %v130_v51, 0.0 }
  0xa8   :  { %586 = vmatmul.f32.vlgmr.msra.gmra.mxu3 %v376_v25 }
  0xa9   :  { %177 = vmatmul.f32.gmra.mxu0 %v47_v52  ;;  %418 = vmatmul.f32.gmra.mxu1 %v320_v53  ;;  %v61_v53 = vld [vmem:[%s3554_s0 + $0xf8] sm:$0xff] }
  0xae   :  { %v133_v54 = vpop.f32.mrf.mxu0 }
  0xaf   :  { %v321_v56 = vmax.f32 %v133_v54, 0.0 }
  0xb1   :  { %180 = vmatmul.f32.gmra.mxu0 %v48_v55  ;;  %421 = vmatmul.f32.gmra.mxu1 %v321_v56 }
  0xb6   :  { %v136_v57 = vpop.f32.mrf.mxu0 }
  0xb7   :  { %v322_v59 = vmax.f32 %v136_v57, 0.0  ;;  %v62_v57 = vld [vmem:[%s3554_s0 + $0x100] sm:$0xff] }
  0xb9   :  { %183 = vmatmul.f32.gmra.mxu0 %v49_v58  ;;  %424 = vmatmul.f32.gmra.mxu1 %v322_v59 }
  0xbe   :  { %v139_v60 = vpop.f32.mrf.mxu0 }
  0xbf   :  { %v323_v62 = vmax.f32 %v139_v60, 0.0 }
  0xc1   :  { %186 = vmatmul.f32.gmra.mxu0 %v50_v61  ;;  %427 = vmatmul.f32.gmra.mxu1 %v323_v62  ;;  %v63_v62 = vld [vmem:[%s3554_s0 + $0x108] sm:$0xff] }
  0xc6   :  { %v142_v63 = vpop.f32.mrf.mxu0 }
  0xc7   :  { %v324_v1 = vmax.f32 %v142_v63, 0.0 }
  0xc9   :  { %189 = vmatmul.f32.gmra.mxu0 %v51_v0  ;;  %430 = vmatmul.f32.gmra.mxu1 %v324_v1 }
  0xce   :  { %v145_v3 = vpop.f32.mrf.mxu0 }
  0xcf   :  { %v325_v5 = vmax.f32 %v145_v3, 0.0  ;;  %v64_v3 = vld [vmem:[%s3554_s0 + $0x110] sm:$0xff] }
  0xd1   :  { %192 = vmatmul.f32.gmra.mxu0 %v52_v4  ;;  %433 = vmatmul.f32.gmra.mxu1 %v325_v5 }
  0xd6   :  { %v148_v7 = vpop.f32.mrf.mxu0 }
  0xd7   :  { %v326_v9 = vmax.f32 %v148_v7, 0.0 }
  0xd9   :  { %195 = vmatmul.f32.gmra.mxu0 %v53_v8  ;;  %436 = vmatmul.f32.gmra.mxu1 %v326_v9  ;;  %v65_v8 = vld [vmem:[%s3554_s0 + $0x118] sm:$0xff] }
  0xde   :  { %v151_v11 = vpop.f32.mrf.mxu0 }
  0xdf   :  { %v327_v13 = vmax.f32 %v151_v11, 0.0 }
  0xe1   :  { %198 = vmatmul.f32.gmra.mxu0 %v54_v12  ;;  %439 = vmatmul.f32.gmra.mxu1 %v327_v13  ;;  %v66_v13 = vld [vmem:[%s3554_s0 + $0x120] sm:$0xff] }
  0xe6   :  { %v154_v18 = vpop.f32.mrf.mxu0 }
  0xe7   :  { %v328_v20 = vmax.f32 %v154_v18, 0.0  ;;  %v67_v18 = vld [vmem:[%s3554_s0 + $0x128] sm:$0xff] }
  0xe9   :  { %201 = vmatmul.f32.gmra.mxu0 %v55_v19  ;;  %442 = vmatmul.f32.gmra.mxu1 %v328_v20 }
  0xee   :  { %v157_v26 = vpop.f32.mrf.mxu0 }
  0xef   :  { %v329_v28 = vmax.f32 %v157_v26, 0.0 }
  0xf1   :  { %204 = vmatmul.f32.gmra.mxu0 %v56_v27  ;;  %445 = vmatmul.f32.gmra.mxu1 %v329_v28  ;;  %v301_v28 = vpop.f32.mrf.mxu2 }
  0xf2   :  { %v377_v32 = vmax.f32 %v301_v28, 0.0 }
  0xf4   :  { %589 = vmatmul.f32.gmra.mxu3 %v377_v32 }
  0xf6   :  { %v160_v34 = vpop.f32.mrf.mxu0 }
  0xf7   :  { %v330_v36 = vmax.f32 %v160_v34, 0.0 }
  0xf9   :  { %207 = vmatmul.f32.gmra.mxu0 %v57_v35  ;;  %448 = vmatmul.f32.gmra.mxu1 %v330_v36  ;;  %v304_v35 = vpop.f32.mrf.mxu2 }
  0xfa   :  { %v378_v39 = vmax.f32 %v304_v35, 0.0 }
  0xfc   :  { %592 = vmatmul.f32.gmra.mxu3 %v378_v39 }
  0xfe   :  { %v163_v42 = vpop.f32.mrf.mxu0 }
  0xff   :  { %v331_v44 = vmax.f32 %v163_v42, 0.0 }
 0x101   :  { %210 = vmatmul.f32.gmra.mxu0 %v58_v43  ;;  %451 = vmatmul.f32.gmra.mxu1 %v331_v44  ;;  %v307_v42 = vpop.f32.mrf.mxu2 }
 0x106   :  { %v166_v46 = vpop.f32.mrf.mxu0 }
 0x107   :  { %v332_v48 = vmax.f32 %v166_v46, 0.0  ;;  %v379_v46 = vmax.f32 %v307_v42, 0.0  ;;  %v81_v42 = vld [vmem:[%s3554_s0 + $0x198] sm:$0xff] }
 0x109   :  { %213 = vmatmul.f32.gmra.mxu0 %v59_v47  ;;  %454 = vmatmul.f32.gmra.mxu1 %v332_v48 }
 0x10a   :  { %595 = vmatmul.f32.gmra.mxu3 %v379_v46 }
 0x10e   :  { %v169_v49 = vpop.f32.mrf.mxu0 }
 0x10f   :  { %v333_v51 = vmax.f32 %v169_v49, 0.0 }
 0x111   :  { %216 = vmatmul.f32.gmra.mxu0 %v60_v50  ;;  %457 = vmatmul.f32.gmra.mxu1 %v333_v51  ;;  %v72_v51 = vld [vmem:[%s3554_s0 + $0x150] sm:$0xff] }
 0x116   :  { %v172_v52 = vpop.f32.mrf.mxu0 }
 0x117   :  { %v334_v54 = vmax.f32 %v172_v52, 0.0 }
 0x119   :  { %219 = vmatmul.f32.gmra.mxu0 %v61_v53  ;;  %460 = vmatmul.f32.gmra.mxu1 %v334_v54  ;;  %v310_v54 = vpop.f32.mrf.mxu2 }
 0x11e   :  { %v175_v55 = vpop.f32.mrf.mxu0  ;;  %v416_v56 = vpop.f32.mrf.mxu1 }
 0x11f   :  { %v608_v58 = vmax.f32 %v416_v56, 0.0  ;;  %v335_v59 = vmax.f32 %v175_v55, 0.0  ;;  %v380_v55 = vmax.f32 %v310_v54, 0.0 }
 0x121   :  { %222 = vmatmul.f32.gmra.mxu0 %v62_v57  ;;  %463 = vmatmul.f32.gmra.mxu1 %v335_v59 }
 0x122   :  { %704 = vmatmul.f32.vlgmr.msrb.gmra.mxu2 %v608_v58  ;;  %598 = vmatmul.f32.gmra.mxu3 %v380_v55  ;;  %v73_v58 = vld [vmem:[%s3554_s0 + $0x158] sm:$0xff]  ;;  %v83_v55 = vld [vmem:[%s3554_s0 + $0x1a8] sm:$0xff] }
 0x126   :  { %v178_v60 = vpop.f32.mrf.mxu0  ;;  %v419_v61 = vpop.f32.mrf.mxu1 }
 0x127   :  { %v336_v63 = vmax.f32 %v178_v60, 0.0  ;;  %v609_v0 = vmax.f32 %v419_v61, 0.0  ;;  %v313_v61 = vpop.f32.mrf.mxu2 }
 0x129   :  { %225 = vmatmul.f32.gmra.mxu0 %v63_v62  ;;  %466 = vmatmul.f32.gmra.mxu1 %v336_v63  ;;  %v381_v62 = vmax.f32 %v313_v61, 0.0 }
 0x12a   :  { %707 = vmatmul.f32.gmra.mxu2 %v609_v0 }
 0x12b   :  { %601 = vmatmul.f32.gmra.mxu3 %v381_v62  ;;  %v84_v62 = vld [vmem:[%s3554_s0 + $0x1b0] sm:$0xff] }
 0x12e   :  { %v181_v1 = vpop.f32.mrf.mxu0  ;;  %v422_v2 = vpop.f32.mrf.mxu1 }
 0x12f   :  { %v337_v4 = vmax.f32 %v181_v1, 0.0  ;;  %v610_v5 = vmax.f32 %v422_v2, 0.0  ;;  %v74_v1 = vld [vmem:[%s3554_s0 + $0x160] sm:$0xff] }
 0x131   :  { %228 = vmatmul.f32.gmra.mxu0 %v64_v3  ;;  %469 = vmatmul.f32.gmra.mxu1 %v337_v4  ;;  %v316_v4 = vpop.f32.mrf.mxu2 }
 0x132   :  { %710 = vmatmul.f32.gmra.mxu2 %v610_v5  ;;  %v382_v5 = vmax.f32 %v316_v4, 0.0  ;;  %v85_v4 = vld [vmem:[%s3554_s0 + $0x1b8] sm:$0xff] }
 0x134   :  { %604 = vmatmul.f32.gmra.mxu3 %v382_v5 }
 0x136   :  { %v184_v6 = vpop.f32.mrf.mxu0  ;;  %v425_v7 = vpop.f32.mrf.mxu1 }
 0x137   :  { %v338_v9 = vmax.f32 %v184_v6, 0.0  ;;  %v611_v10 = vmax.f32 %v425_v7, 0.0 }
 0x139   :  { %231 = vmatmul.f32.gmra.mxu0 %v65_v8  ;;  %472 = vmatmul.f32.gmra.mxu1 %v338_v9  ;;  %v75_v8 = vld [vmem:[%s3554_s0 + $0x168] sm:$0xff] }
 0x13a   :  { %713 = vmatmul.f32.gmra.mxu2 %v611_v10 }
 0x13e   :  { %v187_v11 = vpop.f32.mrf.mxu0  ;;  %v428_v12 = vpop.f32.mrf.mxu1 }
 0x13f   :  { %v339_v14 = vmax.f32 %v187_v11, 0.0  ;;  %v612_v15 = vmax.f32 %v428_v12, 0.0 }
 0x141   :  { %234 = vmatmul.f32.gmra.mxu0 %v66_v13  ;;  %475 = vmatmul.f32.gmra.mxu1 %v339_v14  ;;  %v76_v13 = vld [vmem:[%s3554_s0 + $0x170] sm:$0xff] }
 0x142   :  { %716 = vmatmul.f32.gmra.mxu2 %v612_v15 }
 0x146   :  { %v190_v16 = vpop.f32.mrf.mxu0  ;;  %v431_v17 = vpop.f32.mrf.mxu1 }
 0x147   :  { %v340_v19 = vmax.f32 %v190_v16, 0.0  ;;  %v613_v20 = vmax.f32 %v431_v17, 0.0 }
 0x149   :  { %237 = vmatmul.f32.gmra.mxu0 %v67_v18  ;;  %478 = vmatmul.f32.gmra.mxu1 %v340_v19  ;;  %v77_v18 = vld [vmem:[%s3554_s0 + $0x178] sm:$0xff] }
 0x14a   :  { %719 = vmatmul.f32.gmra.mxu2 %v613_v20 }
 0x14e   :  { %v193_v22 = vpop.f32.mrf.mxu0  ;;  %v434_v23 = vpop.f32.mrf.mxu1 }
 0x14f   :  { %v341_v26 = vmax.f32 %v193_v22, 0.0  ;;  %v614_v27 = vmax.f32 %v434_v23, 0.0  ;;  %v78_v23 = vld [vmem:[%s3554_s0 + $0x180] sm:$0xff] }
 0x151   :  { %240 = vmatmul.f32.gmra.mxu0 %v68_v24  ;;  %481 = vmatmul.f32.gmra.mxu1 %v341_v26 }
 0x152   :  { %722 = vmatmul.f32.gmra.mxu2 %v614_v27 }
 0x156   :  { %v196_v29 = vpop.f32.mrf.mxu0  ;;  %v437_v30 = vpop.f32.mrf.mxu1 }
 0x157   :  { %v342_v33 = vmax.f32 %v196_v29, 0.0  ;;  %v615_v34 = vmax.f32 %v437_v30, 0.0  ;;  %v79_v29 = vld [vmem:[%s3554_s0 + $0x188] sm:$0xff] }
 0x159   :  { %243 = vmatmul.f32.gmra.mxu0 %v69_v31  ;;  %484 = vmatmul.f32.gmra.mxu1 %v342_v33 }
 0x15a   :  { %725 = vmatmul.f32.gmra.mxu2 %v615_v34 }
 0x15e   :  { %v199_v36 = vpop.f32.mrf.mxu0  ;;  %v440_v37 = vpop.f32.mrf.mxu1 }
 0x15f   :  { %v343_v40 = vmax.f32 %v199_v36, 0.0  ;;  %v616_v41 = vmax.f32 %v440_v37, 0.0  ;;  %v80_v36 = vld [vmem:[%s3554_s0 + $0x190] sm:$0xff] }
 0x161   :  { %246 = vmatmul.f32.gmra.mxu0 %v70_v38  ;;  %487 = vmatmul.f32.gmra.mxu1 %v343_v40 }
 0x162   :  { %728 = vmatmul.f32.gmra.mxu2 %v616_v41 }
 0x166   :  { %v202_v43 = vpop.f32.mrf.mxu0  ;;  %v443_v44 = vpop.f32.mrf.mxu1 }
 0x167   :  { %v344_v47 = vmax.f32 %v202_v43, 0.0  ;;  %v617_v48 = vmax.f32 %v443_v44, 0.0 }
 0x169   :  { %249 = vmatmul.f32.gmra.mxu0 %v71_v45  ;;  %490 = vmatmul.f32.gmra.mxu1 %v344_v47 }
 0x16a   :  { %731 = vmatmul.f32.gmra.mxu2 %v617_v48 }
 0x16e   :  { %v205_v49 = vpop.f32.mrf.mxu0  ;;  %v446_v50 = vpop.f32.mrf.mxu1 }
 0x16f   :  { %v345_v52 = vmax.f32 %v205_v49, 0.0  ;;  %v618_v53 = vmax.f32 %v446_v50, 0.0  ;;  %v82_v49 = vld [vmem:[%s3554_s0 + $0x1a0] sm:$0xff] }
 0x171   :  { %252 = vmatmul.f32.gmra.mxu0 %v72_v51  ;;  %493 = vmatmul.f32.gmra.mxu1 %v345_v52 }
 0x172   :  { %734 = vmatmul.f32.gmra.mxu2 %v618_v53 }
 0x176   :  { %v208_v56 = vpop.f32.mrf.mxu0  ;;  %v449_v57 = vpop.f32.mrf.mxu1 }
 0x177   :  { %v346_v59 = vmax.f32 %v208_v56, 0.0  ;;  %v619_v60 = vmax.f32 %v449_v57, 0.0 }
 0x179   :  { %255 = vmatmul.f32.gmra.mxu0 %v73_v58  ;;  %496 = vmatmul.f32.gmra.mxu1 %v346_v59 }
 0x17a   :  { %737 = vmatmul.f32.gmra.mxu2 %v619_v60 }
 0x17e   :  { %v211_v63 = vpop.f32.mrf.mxu0  ;;  %v452_v0 = vpop.f32.mrf.mxu1 }
 0x17f   :  { %v347_v2 = vmax.f32 %v211_v63, 0.0  ;;  %v620_v3 = vmax.f32 %v452_v0, 0.0 }
 0x181   :  { %258 = vmatmul.f32.gmra.mxu0 %v74_v1  ;;  %499 = vmatmul.f32.gmra.mxu1 %v347_v2 }
 0x182   :  { %740 = vmatmul.f32.gmra.mxu2 %v620_v3 }
 0x186   :  { %v214_v6 = vpop.f32.mrf.mxu0  ;;  %v455_v7 = vpop.f32.mrf.mxu1 }
 0x187   :  { %v348_v9 = vmax.f32 %v214_v6, 0.0  ;;  %v621_v10 = vmax.f32 %v455_v7, 0.0 }
 0x189   :  { %261 = vmatmul.f32.gmra.mxu0 %v75_v8  ;;  %502 = vmatmul.f32.gmra.mxu1 %v348_v9 }
 0x18a   :  { %743 = vmatmul.f32.gmra.mxu2 %v621_v10 }
 0x18e   :  { %v217_v11 = vpop.f32.mrf.mxu0  ;;  %v458_v12 = vpop.f32.mrf.mxu1 }
 0x18f   :  { %v349_v14 = vmax.f32 %v217_v11, 0.0  ;;  %v622_v15 = vmax.f32 %v458_v12, 0.0  ;;  %v86_v11 = vld [vmem:[%s3554_s0 + $0x1c0] sm:$0xff] }
 0x191   :  { %264 = vmatmul.f32.gmra.mxu0 %v76_v13  ;;  %505 = vmatmul.f32.gmra.mxu1 %v349_v14 }
 0x192   :  { %746 = vmatmul.f32.gmra.mxu2 %v622_v15 }
 0x196   :  { %v220_v16 = vpop.f32.mrf.mxu0  ;;  %v461_v17 = vpop.f32.mrf.mxu1 }
 0x197   :  { %v350_v19 = vmax.f32 %v220_v16, 0.0  ;;  %v623_v20 = vmax.f32 %v461_v17, 0.0 }
 0x199   :  { %267 = vmatmul.f32.gmra.mxu0 %v77_v18  ;;  %508 = vmatmul.f32.gmra.mxu1 %v350_v19 }
 0x19a   :  { %749 = vmatmul.f32.gmra.mxu2 %v623_v20 }
 0x19e   :  { %v223_v21 = vpop.f32.mrf.mxu0  ;;  %v464_v22 = vpop.f32.mrf.mxu1 }
 0x19f   :  { %v351_v24 = vmax.f32 %v223_v21, 0.0  ;;  %v624_v25 = vmax.f32 %v464_v22, 0.0 }
 0x1a1   :  { %270 = vmatmul.f32.gmra.mxu0 %v78_v23  ;;  %511 = vmatmul.f32.gmra.mxu1 %v351_v24 }
 0x1a2   :  { %752 = vmatmul.f32.gmra.mxu2 %v624_v25 }
 0x1a5   :  { %v705_v26 = vpop.f32.mrf.mxu2 }
 0x1a6   :  { %v226_v27 = vpop.f32.mrf.mxu0  ;;  %v467_v28 = vpop.f32.mrf.mxu1 }
 0x1a7   :  { %v352_v30 = vmax.f32 %v226_v27, 0.0  ;;  %v625_v31 = vmax.f32 %v467_v28, 0.0 }
 0x1a9   :  { %273 = vmatmul.f32.gmra.mxu0 %v79_v29  ;;  %514 = vmatmul.f32.gmra.mxu1 %v352_v30 }
 0x1aa   :  { %755 = vmatmul.f32.gmra.mxu2 %v625_v31 }
 0x1ad   :  { %v708_v32 = vpop.f32.mrf.mxu2 }
 0x1ae   :  { %v2360_v33 = vpack.c.bf16 %v708_v32, %v705_v26  ;;  %v229_v34 = vpop.f32.mrf.mxu0  ;;  %v470_v35 = vpop.f32.mrf.mxu1 }
 0x1af   :  { %v353_v37 = vmax.f32 %v229_v34, 0.0  ;;  %v626_v38 = vmax.f32 %v470_v35, 0.0 }
 0x1b0   :  { %2361 = vst [vmem:[#allocation2 + $0xb0] sm:$0xff] %v2360_v33  }
 0x1b1   :  { %276 = vmatmul.f32.gmra.mxu0 %v80_v36  ;;  %517 = vmatmul.f32.gmra.mxu1 %v353_v37 }
 0x1b2   :  { %758 = vmatmul.f32.gmra.mxu2 %v626_v38 }
 0x1b5   :  { %v711_v39 = vpop.f32.mrf.mxu2 }
 0x1b6   :  { %v232_v40 = vpop.f32.mrf.mxu0  ;;  %v473_v41 = vpop.f32.mrf.mxu1 }
 0x1b7   :  { %v354_v43 = vmax.f32 %v232_v40, 0.0  ;;  %v627_v44 = vmax.f32 %v473_v41, 0.0 }
 0x1b9   :  { %279 = vmatmul.f32.gmra.mxu0 %v81_v42  ;;  %520 = vmatmul.f32.gmra.mxu1 %v354_v43 }
 0x1ba   :  { %761 = vmatmul.f32.gmra.mxu2 %v627_v44 }
 0x1bd   :  { %v714_v45 = vpop.f32.mrf.mxu2 }
 0x1be   :  { %v2365_v46 = vpack.c.bf16 %v714_v45, %v711_v39  ;;  %v235_v47 = vpop.f32.mrf.mxu0  ;;  %v476_v48 = vpop.f32.mrf.mxu1 }
 0x1bf   :  { %v355_v50 = vmax.f32 %v235_v47, 0.0  ;;  %v628_v51 = vmax.f32 %v476_v48, 0.0 }
 0x1c0   :  { %2517 = vst [vmem:[#allocation2] sm:$0xff] %v2365_v46  }
 0x1c1   :  { %282 = vmatmul.f32.gmra.mxu0 %v82_v49  ;;  %523 = vmatmul.f32.gmra.mxu1 %v355_v50 }
 0x1c2   :  { %764 = vmatmul.f32.gmra.mxu2 %v628_v51 }
 0x1c5   :  { %v717_v52 = vpop.f32.mrf.mxu2 }
 0x1c6   :  { %v238_v53 = vpop.f32.mrf.mxu0  ;;  %v479_v54 = vpop.f32.mrf.mxu1 }
 0x1c7   :  { %v356_v56 = vmax.f32 %v238_v53, 0.0  ;;  %v629_v57 = vmax.f32 %v479_v54, 0.0 }
 0x1c9   :  { %285 = vmatmul.f32.gmra.mxu0 %v83_v55  ;;  %526 = vmatmul.f32.gmra.mxu1 %v356_v56 }
 0x1ca   :  { %767 = vmatmul.f32.gmra.mxu2 %v629_v57 }
 0x1cd   :  { %v720_v58 = vpop.f32.mrf.mxu2 }
 0x1ce   :  { %v2370_v59 = vpack.c.bf16 %v720_v58, %v717_v52  ;;  %v241_v60 = vpop.f32.mrf.mxu0  ;;  %v482_v61 = vpop.f32.mrf.mxu1 }
 0x1cf   :  { %v357_v63 = vmax.f32 %v241_v60, 0.0  ;;  %v630_v0 = vmax.f32 %v482_v61, 0.0 }
 0x1d0   :  { %2518 = vst [vmem:[#allocation2 + $0xd8] sm:$0xff] %v2370_v59  }
 0x1d1   :  { %288 = vmatmul.f32.gmra.mxu0 %v84_v62  ;;  %529 = vmatmul.f32.gmra.mxu1 %v357_v63 }
 0x1d2   :  { %770 = vmatmul.f32.gmra.mxu2 %v630_v0 }
 0x1d5   :  { %v723_v1 = vpop.f32.mrf.mxu2 }
 0x1d6   :  { %v244_v2 = vpop.f32.mrf.mxu0  ;;  %v485_v3 = vpop.f32.mrf.mxu1 }
 0x1d7   :  { %v358_v5 = vmax.f32 %v244_v2, 0.0  ;;  %v631_v6 = vmax.f32 %v485_v3, 0.0 }
 0x1d9   :  { %291 = vmatmul.f32.gmra.mxu0 %v85_v4  ;;  %532 = vmatmul.f32.gmra.mxu1 %v358_v5 }
 0x1da   :  { %773 = vmatmul.f32.gmra.mxu2 %v631_v6 }
 0x1dd   :  { %v726_v7 = vpop.f32.mrf.mxu2 }
 0x1de   :  { %v2375_v8 = vpack.c.bf16 %v726_v7, %v723_v1  ;;  %v247_v9 = vpop.f32.mrf.mxu0  ;;  %v488_v10 = vpop.f32.mrf.mxu1 }
 0x1df   :  { %v359_v12 = vmax.f32 %v247_v9, 0.0  ;;  %v632_v13 = vmax.f32 %v488_v10, 0.0 }
 0x1e0   :  { %2519 = vst [vmem:[#allocation2 + $0x18] sm:$0xff] %v2375_v8  }
 0x1e1   :  { %294 = vmatmul.f32.gmra.mxu0 %v86_v11  ;;  %535 = vmatmul.f32.gmra.mxu1 %v359_v12 }
 0x1e2   :  { %776 = vmatmul.f32.gmra.mxu2 %v632_v13 }
 0x1e5   :  { %v729_v14 = vpop.f32.mrf.mxu2 }
 0x1e6   :  { %v250_v15 = vpop.f32.mrf.mxu0  ;;  %v491_v16 = vpop.f32.mrf.mxu1 }
 0x1e7   :  { %v360_v17 = vmax.f32 %v250_v15, 0.0  ;;  %v633_v18 = vmax.f32 %v491_v16, 0.0  ;;  %v2327_v15 = vld [vmem:[#allocation2 + $0xd8] sm:$0xff] }
 0x1e9   :  { %538 = vmatmul.f32.gmra.mxu1 %v360_v17 }
 0x1ea   :  { %779 = vmatmul.f32.gmra.mxu2 %v633_v18 }
 0x1ed   :  { %v732_v19 = vpop.f32.mrf.mxu2 }
 0x1ee   :  { %v2380_v20 = vpack.c.bf16 %v732_v19, %v729_v14  ;;  %v253_v21 = vpop.f32.mrf.mxu0  ;;  %v494_v22 = vpop.f32.mrf.mxu1  ;;  %v2328_v14 = vld [vmem:[#allocation2 + $0x18] sm:$0xff] }
 0x1ef   :  { %v361_v23 = vmax.f32 %v253_v21, 0.0  ;;  %v634_v24 = vmax.f32 %v494_v22, 0.0  ;;  %v2326_v22 = vld [vmem:[#allocation2] sm:$0xff] }
 0x1f0   :  { %2520 = vst [vmem:[#allocation2 + $0x50] sm:$0xff] %v2380_v20  }
 0x1f1   :  { %541 = vmatmul.f32.gmra.mxu1 %v361_v23  ;;  %v2059_v23 = vld [vmem:[%s3557_s1] sm:$0xf] }
 0x1f2   :  { %782 = vmatmul.f32.gmra.mxu2 %v634_v24  ;;  %v2299_v24 = vld [vmem:[%s3557_s1 + $0xc] sm:$0xf0] }
 0x1f5   :  { %v735_v25 = vpop.f32.mrf.mxu2 }
 0x1f6   :  { %v256_v26 = vpop.f32.mrf.mxu0  ;;  %v497_v27 = vpop.f32.mrf.mxu1 }
 0x1f7   :  { %v362_v28 = vmax.f32 %v256_v26, 0.0  ;;  %v635_v29 = vmax.f32 %v497_v27, 0.0  ;;  %v2329_v8 = vld [vmem:[#allocation2 + $0x50] sm:$0xff]  ;;  %v2060_v26 = vor.u32 %v2299_v24, %v2059_v23 }
 0x1f9   :  { %544 = vmatmul.f32.gmra.mxu1 %v362_v28 }
 0x1fa   :  { %785 = vmatmul.f32.gmra.mxu2 %v635_v29 }
 0x1fd   :  { %v738_v30 = vpop.f32.mrf.mxu2 }
 0x1fe   :  { %v2385_v31 = vpack.c.bf16 %v738_v30, %v735_v25  ;;  %v259_v32 = vpop.f32.mrf.mxu0  ;;  %v500_v33 = vpop.f32.mrf.mxu1  ;;  %v2325_v25 = vld [vmem:[#allocation2 + $0xb0] sm:$0xff] }
 0x1ff   :  { %v363_v34 = vmax.f32 %v259_v32, 0.0  ;;  %v636_v35 = vmax.f32 %v500_v33, 0.0 }
 0x200   :  { %2521 = vst [vmem:[#allocation2 + $0x68] sm:$0xff] %v2385_v31  }
 0x201   :  { %547 = vmatmul.f32.gmra.mxu1 %v363_v34 }
 0x202   :  { %788 = vmatmul.f32.gmra.mxu2 %v636_v35 }
 0x205   :  { %v741_v36 = vpop.f32.mrf.mxu2 }
 0x206   :  { %v262_v37 = vpop.f32.mrf.mxu0  ;;  %v503_v38 = vpop.f32.mrf.mxu1 }
 0x207   :  { %v364_v39 = vmax.f32 %v262_v37, 0.0  ;;  %v637_v40 = vmax.f32 %v503_v38, 0.0  ;;  %v2330_v7 = vld [vmem:[#allocation2 + $0x68] sm:$0xff]  ;;  %v2075_v38 = vld [vmem:[%s3557_s1 + $0x20] sm:$0xf] }
 0x209   :  { %550 = vmatmul.f32.gmra.mxu1 %v364_v39  ;;  %v2303_v39 = vld [vmem:[%s3557_s1 + $0x2c] sm:$0xf0] }
 0x20a   :  { %791 = vmatmul.f32.gmra.mxu2 %v637_v40  ;;  %v2076_v40 = vor.u32 %v2303_v39, %v2075_v38 }
 0x20d   :  { %v744_v41 = vpop.f32.mrf.mxu2 }
 0x20e   :  { %v2390_v42 = vpack.c.bf16 %v744_v41, %v741_v36  ;;  %v265_v43 = vpop.f32.mrf.mxu0  ;;  %v506_v44 = vpop.f32.mrf.mxu1 }
 0x20f   :  { %v365_v45 = vmax.f32 %v265_v43, 0.0  ;;  %v638_v46 = vmax.f32 %v506_v44, 0.0 }
 0x210   :  { %2522 = vst [vmem:[#allocation2 + $0x30] sm:$0xff] %v2390_v42  }
 0x211   :  { %553 = vmatmul.f32.gmra.mxu1 %v365_v45 }
 0x212   :  { %794 = vmatmul.f32.gmra.mxu2 %v638_v46 }
 0x215   :  { %v747_v47 = vpop.f32.mrf.mxu2 }
 0x216   :  { %v268_v48 = vpop.f32.mrf.mxu0  ;;  %v509_v49 = vpop.f32.mrf.mxu1 }
 0x217   :  { %v366_v50 = vmax.f32 %v268_v48, 0.0  ;;  %v639_v51 = vmax.f32 %v509_v49, 0.0  ;;  %v2331_v0 = vld [vmem:[#allocation2 + $0x30] sm:$0xff] }
 0x219   :  { %556 = vmatmul.f32.gmra.mxu1 %v366_v50 }
 0x21a   :  { %797 = vmatmul.f32.gmra.mxu2 %v639_v51 }
 0x21d   :  { %v750_v52 = vpop.f32.mrf.mxu2 }
 0x21e   :  { %v2395_v53 = vpack.c.bf16 %v750_v52, %v747_v47  ;;  %v271_v54 = vpop.f32.mrf.mxu0  ;;  %v512_v55 = vpop.f32.mrf.mxu1  ;;  %v2091_v52 = vld [vmem:[%s3557_s1 + $0x40] sm:$0xf] }
 0x21f   :  { %v367_v56 = vmax.f32 %v271_v54, 0.0  ;;  %v640_v57 = vmax.f32 %v512_v55, 0.0 }
 0x220   :  { %2523 = vst [vmem:[#allocation2 + $0x48] sm:$0xff] %v2395_v53   ;;  %v2307_v53 = vld [vmem:[%s3557_s1 + $0x4c] sm:$0xf0] }
 0x221   :  { %559 = vmatmul.f32.gmra.mxu1 %v367_v56  ;;  %v2092_v54 = vor.u32 %v2307_v53, %v2091_v52 }
 0x222   :  { %800 = vmatmul.f32.gmra.mxu2 %v640_v57 }
 0x225   :  { %v753_v58 = vpop.f32.mrf.mxu2 }
 0x226   :  { %v274_v59 = vpop.f32.mrf.mxu0  ;;  %v515_v60 = vpop.f32.mrf.mxu1 }
 0x227   :  { %v368_v61 = vmax.f32 %v274_v59, 0.0  ;;  %v641_v62 = vmax.f32 %v515_v60, 0.0  ;;  %v2332_v63 = vld [vmem:[#allocation2 + $0x48] sm:$0xff] }
 0x228   :  { %1465 = vmatpush.bf16.msrb.mxu3 %v2332_v63  ;;  %v2311_v63 = vld [vmem:[%s3557_s1 + $0x6c] sm:$0xf0] }
 0x229   :  { %562 = vmatmul.f32.gmra.mxu1 %v368_v61 }
 0x22a   :  { %803 = vmatmul.f32.gmra.mxu2 %v641_v62  ;;  %v2107_v62 = vld [vmem:[%s3557_s1 + $0x60] sm:$0xf] }
 0x22c   :  { %1466 = vmatpush.bf16.msrb.mxu3 %v2331_v0  ;;  %v2108_v0 = vor.u32 %v2311_v63, %v2107_v62  ;;  %v2061_v62 = vld [vmem:[%s3557_s1 + $0x10] sm:$0xf0] }
 0x22d   :  { %v756_v1 = vpop.f32.mrf.mxu2 }
 0x22e   :  { %v2400_v2 = vpack.c.bf16 %v756_v1, %v753_v58  ;;  %v277_v3 = vpop.f32.mrf.mxu0  ;;  %v518_v4 = vpop.f32.mrf.mxu1 }
 0x22f   :  { %v369_v5 = vmax.f32 %v277_v3, 0.0  ;;  %v642_v6 = vmax.f32 %v518_v4, 0.0 }
 0x230   :  { %2524 = vst [vmem:[#allocation2 + $0x80] sm:$0xff] %v2400_v2   ;;  %1467 = vmatpush.bf16.msrb.mxu3 %v2330_v7 }
 0x231   :  { %565 = vmatmul.f32.gmra.mxu1 %v369_v5 }
 0x232   :  { %806 = vmatmul.f32.gmra.mxu2 %v642_v6 }
 0x234   :  { %1468 = vmatpush.bf16.msrb.mxu3 %v2329_v8  ;;  %v2123_v8 = vld [vmem:[%s3557_s1 + $0x80] sm:$0xf] }
 0x235   :  { %v759_v9 = vpop.f32.mrf.mxu2 }
 0x236   :  { %v280_v10 = vpop.f32.mrf.mxu0  ;;  %v521_v11 = vpop.f32.mrf.mxu1 }
 0x237   :  { %v370_v12 = vmax.f32 %v280_v10, 0.0  ;;  %v643_v13 = vmax.f32 %v521_v11, 0.0 }
 0x238   :  { %1469 = vmatpush.bf16.msrb.mxu3 %v2328_v14 }
 0x239   :  { %568 = vmatmul.f32.gmra.mxu1 %v370_v12 }
 0x23a   :  { %809 = vmatmul.f32.gmra.mxu2 %v643_v13  ;;  %v3016_v13 = vpop.f32.mrf.mxu3 }
 0x23c   :  { %1470 = vmatpush.bf16.msrb.mxu3 %v2327_v15 }
 0x23d   :  { %v762_v16 = vpop.f32.mrf.mxu2 }
 0x23e   :  { %v2405_v17 = vpack.c.bf16 %v762_v16, %v759_v9  ;;  %v283_v18 = vpop.f32.mrf.mxu0  ;;  %v524_v19 = vpop.f32.mrf.mxu1  ;;  %v2315_v9 = vld [vmem:[%s3557_s1 + $0x8c] sm:$0xf0] }
 0x23f   :  { %v371_v20 = vmax.f32 %v283_v18, 0.0  ;;  %v644_v21 = vmax.f32 %v524_v19, 0.0  ;;  %v2124_v10 = vor.u32 %v2315_v9, %v2123_v8 }
 0x240   :  { %2525 = vst [vmem:[#allocation2 + $0x88] sm:$0xff] %v2405_v17   ;;  %1471 = vmatpush.bf16.msrb.mxu3 %v2326_v22 }
 0x241   :  { %571 = vmatmul.f32.gmra.mxu1 %v371_v20  ;;  %v2139_v20 = vld [vmem:[%s3557_s1 + $0xa0] sm:$0xf] }
 0x242   :  { %812 = vmatmul.f32.gmra.mxu2 %v644_v21  ;;  %v3018_v19 = vpop.f32.mrf.mxu3  ;;  %v2319_v21 = vld [vmem:[%s3557_s1 + $0xac] sm:$0xf0] }
 0x243   :  { %v2140_v22 = vor.u32 %v2319_v21, %v2139_v20 }
 0x244   :  { %1472 = vmatpush.bf16.msrb.mxu3 %v2325_v25 }
 0x245   :  { %v765_v27 = vpop.f32.mrf.mxu2 }
 0x246   :  { %v286_v28 = vpop.f32.mrf.mxu0  ;;  %v527_v29 = vpop.f32.mrf.mxu1 }
 0x247   :  { %v372_v30 = vmax.f32 %v286_v28, 0.0  ;;  %v645_v31 = vmax.f32 %v527_v29, 0.0  ;;  %1473 = vmatmul.bf16.vlgmr.msrb.gmra.mxu3 %v2060_v26 }
 0x249   :  { %574 = vmatmul.f32.gmra.mxu1 %v372_v30 }
 0x24a   :  { %815 = vmatmul.f32.gmra.mxu2 %v645_v31  ;;  %v3026_v26 = vpop.f32.mrf.mxu3  ;;  %v2155_v31 = vld [vmem:[%s3557_s1 + $0xc0] sm:$0xf] }
 0x24d   :  { %v768_v32 = vpop.f32.mrf.mxu2 }
 0x24e   :  { %v2410_v33 = vpack.c.bf16 %v768_v32, %v765_v27  ;;  %v289_v34 = vpop.f32.mrf.mxu0  ;;  %v530_v35 = vpop.f32.mrf.mxu1  ;;  %v2323_v32 = vld [vmem:[%s3557_s1 + $0xcc] sm:$0xf0] }
 0x24f   :  { %v373_v36 = vmax.f32 %v289_v34, 0.0  ;;  %v646_v37 = vmax.f32 %v530_v35, 0.0 }
 0x250   :  { %2526 = vst [vmem:[#allocation2 + $0xe8] sm:$0xff] %v2410_v33   ;;  %v2156_v33 = vor.u32 %v2323_v32, %v2155_v31  ;;  %v665_v31 = vmax.f32 %v3016_v13, 0.0  ;;  %v1866_v32 = vld [vmem:[%s3558_s5 + $0x70] sm:$0xff] }
 0x251   :  { %577 = vmatmul.f32.gmra.mxu1 %v373_v36  ;;  %v2109_v13 = vld [vmem:[%s3557_s1 + $0x70] sm:$0xf0] }
 0x252   :  { %818 = vmatmul.f32.gmra.mxu2 %v646_v37  ;;  %v3034_v34 = vpop.f32.mrf.mxu3 }
 0x255   :  { %v771_v41 = vpop.f32.mrf.mxu2 }
 0x256   :  { %v292_v42 = vpop.f32.mrf.mxu0  ;;  %v533_v43 = vpop.f32.mrf.mxu1 }
 0x257   :  { %v374_v44 = vmax.f32 %v292_v42, 0.0  ;;  %v647_v45 = vmax.f32 %v533_v43, 0.0  ;;  %1478 = vmatmul.bf16.gmra.mxu3 %v2076_v40 }
 0x259   :  { %580 = vmatmul.f32.gmra.mxu1 %v374_v44 }
 0x25a   :  { %821 = vmatmul.f32.gmra.mxu2 %v647_v45  ;;  %v3041_v44 = vpop.f32.mrf.mxu3 }
 0x25d   :  { %v774_v46 = vpop.f32.mrf.mxu2 }
 0x25e   :  { %v2415_v47 = vpack.c.bf16 %v774_v46, %v771_v41  ;;  %v295_v48 = vpop.f32.mrf.mxu0  ;;  %v536_v49 = vpop.f32.mrf.mxu1  ;;  %v3039_v41 = vld [vmem:[%s3557_s1 + $0xe0] sm:$0xff] }
 0x25f   :  { %v375_v50 = vmax.f32 %v295_v48, 0.0  ;;  %v648_v51 = vmax.f32 %v536_v49, 0.0 }
 0x260   :  { %2527 = vst [vmem:[#allocation2 + $0xb8] sm:$0xff] %v2415_v47   ;;  %v1205_v47 = vunpack.c.l.b16 %v3039_v41 }
 0x261   :  { %583 = vmatmul.f32.gmra.mxu1 %v375_v50 }
 0x262   :  { %824 = vmatmul.f32.gmra.mxu2 %v648_v51  ;;  %v1237_v49 = vpack.c.b16 %v1205_v47, %v1205_v47  ;;  %v668_v47 = vmax.f32 %v3034_v34, 0.0  ;;  %v669_v34 = vmax.f32 %v3041_v44, 0.0 }
 0x265   :  { %v777_v55 = vpop.f32.mrf.mxu2 }
 0x266   :  { %v539_v56 = vpop.f32.mrf.mxu1 }
 0x267   :  { %v649_v57 = vmax.f32 %v539_v56, 0.0  ;;  %1483 = vmatmul.bf16.gmra.mxu3 %v2092_v54  ;;  %v2336_v53 = vld [vmem:[#allocation2 + $0xb8] sm:$0xff]  ;;  %v3044_v54 = vpop.f32.mrf.mxu3 }
 0x26a   :  { %827 = vmatmul.f32.gmra.mxu2 %v649_v57 }
 0x26d   :  { %v780_v58 = vpop.f32.mrf.mxu2 }
 0x26e   :  { %v2420_v59 = vpack.c.bf16 %v780_v58, %v777_v55  ;;  %v542_v60 = vpop.f32.mrf.mxu1  ;;  %v2335_v55 = vld [vmem:[#allocation2 + $0xe8] sm:$0xff] }
 0x26f   :  { %v650_v61 = vmax.f32 %v542_v60, 0.0  ;;  %v2334_v60 = vld [vmem:[#allocation2 + $0x88] sm:$0xff]  ;;  %v3052_v63 = vpop.f32.mrf.mxu3 }
 0x270   :  { %2528 = vst [vmem:[#allocation2 + $0x60] sm:$0xff] %v2420_v59  }
 0x272   :  { %830 = vmatmul.f32.gmra.mxu2 %v650_v61  ;;  %v2297_v61 = vld [vmem:[%s3557_s1 + $0x4] sm:$0xf] }
 0x275   :  { %v783_v1 = vpop.f32.mrf.mxu2 }
 0x276   :  { %v545_v2 = vpop.f32.mrf.mxu1 }
 0x277   :  { %v651_v3 = vmax.f32 %v545_v2, 0.0  ;;  %1488 = vmatmul.bf16.gmra.mxu3 %v2108_v0  ;;  %v2337_v48 = vld [vmem:[#allocation2 + $0x60] sm:$0xff] }
 0x278   :  { %v2333_v0 = vld [vmem:[#allocation2 + $0x80] sm:$0xff] }
 0x27a   :  { %833 = vmatmul.f32.gmra.mxu2 %v651_v3 }
 0x27d   :  { %v786_v4 = vpop.f32.mrf.mxu2 }
 0x27e   :  { %v2425_v5 = vpack.c.bf16 %v786_v4, %v783_v1  ;;  %v548_v6 = vpop.f32.mrf.mxu1  ;;  %v2064_v1 = vor.u32 %v2297_v61, %v2061_v62  ;;  %v671_v62 = vmax.f32 %v3052_v63, 0.0 }
 0x27f   :  { %v652_v7 = vmax.f32 %v548_v6, 0.0  ;;  %v1867_v6 = vld [vmem:[%s3558_s5 + $0x78] sm:$0xff] }
 0x280   :  { %2529 = vst [vmem:[#allocation2 + $0xf0] sm:$0xff] %v2425_v5   ;;  %1868 = vmatpush.msrb.mxu0 %v1867_v6 }
 0x282   :  { %836 = vmatmul.f32.gmra.mxu2 %v652_v7  ;;  %1869 = vmatpush.msrb.mxu0 %v1866_v32  ;;  %v2067_v32 = vld [vmem:[%s3557_s1 + $0x8] sm:$0xf] }
 0x285   :  { %v789_v11 = vpop.f32.mrf.mxu2 }
 0x286   :  { %v551_v12 = vpop.f32.mrf.mxu1 }
 0x287   :  { %v653_v14 = vmax.f32 %v551_v12, 0.0  ;;  %1493 = vmatmul.bf16.gmra.mxu3 %v2124_v10  ;;  %v2338_v46 = vld [vmem:[#allocation2 + $0xf0] sm:$0xff] }
 0x288   :  { %v2077_v12 = vld [vmem:[%s3557_s1 + $0x30] sm:$0xf0] }
 0x28a   :  { %839 = vmatmul.f32.gmra.mxu2 %v653_v14 }
 0x28d   :  { %v792_v15 = vpop.f32.mrf.mxu2 }
 0x28e   :  { %v2430_v16 = vpack.c.bf16 %v792_v15, %v789_v11  ;;  %v554_v17 = vpop.f32.mrf.mxu1  ;;  %v2301_v11 = vld [vmem:[%s3557_s1 + $0x24] sm:$0xf] }
 0x28f   :  { %v654_v18 = vmax.f32 %v554_v17, 0.0  ;;  %v2080_v15 = vor.u32 %v2301_v11, %v2077_v12 }
 0x290   :  { %2530 = vst [vmem:[#allocation2 + $0x8] sm:$0xff] %v2430_v16  }
 0x292   :  { %842 = vmatmul.f32.gmra.mxu2 %v654_v18 }
 0x295   :  { %v795_v23 = vpop.f32.mrf.mxu2 }
 0x296   :  { %v557_v24 = vpop.f32.mrf.mxu1 }
 0x297   :  { %v655_v25 = vmax.f32 %v557_v24, 0.0  ;;  %1498 = vmatmul.bf16.gmra.mxu3 %v2140_v22  ;;  %v2339_v39 = vld [vmem:[#allocation2 + $0x8] sm:$0xff] }
 0x29a   :  { %845 = vmatmul.f32.gmra.mxu2 %v655_v25  ;;  %v2305_v25 = vld [vmem:[%s3557_s1 + $0x44] sm:$0xf] }
 0x29d   :  { %v798_v27 = vpop.f32.mrf.mxu2 }
 0x29e   :  { %v2435_v28 = vpack.c.bf16 %v798_v27, %v795_v23  ;;  %v560_v29 = vpop.f32.mrf.mxu1  ;;  %v2093_v27 = vld [vmem:[%s3557_s1 + $0x50] sm:$0xf0] }
 0x29f   :  { %v656_v30 = vmax.f32 %v560_v29, 0.0  ;;  %v2096_v29 = vor.u32 %v2305_v25, %v2093_v27 }
 0x2a0   :  { %2531 = vst [vmem:[#allocation2 + $0x78] sm:$0xff] %v2435_v28  }
 0x2a2   :  { %848 = vmatmul.f32.gmra.mxu2 %v656_v30 }
 0x2a5   :  { %v801_v35 = vpop.f32.mrf.mxu2 }
 0x2a6   :  { %v563_v36 = vpop.f32.mrf.mxu1 }
 0x2a7   :  { %v657_v37 = vmax.f32 %v563_v36, 0.0  ;;  %v2340_v38 = vld [vmem:[#allocation2 + $0x78] sm:$0xff]  ;;  %1503 = vmatmul.bf16.gmra.mxu3 %v2156_v33 }
 0x2a8   :  { %1513 = vmatpush.bf16.msra.mxu3 %v2340_v38  ;;  %v2309_v38 = vld [vmem:[%s3557_s1 + $0x64] sm:$0xf] }
 0x2aa   :  { %851 = vmatmul.f32.gmra.mxu2 %v657_v37  ;;  %v666_v37 = vmax.f32 %v3018_v19, 0.0 }
 0x2ac   :  { %1514 = vmatpush.bf16.msra.mxu3 %v2339_v39 }
 0x2ad   :  { %v804_v40 = vpop.f32.mrf.mxu2 }
 0x2ae   :  { %v2440_v42 = vpack.c.bf16 %v804_v40, %v801_v35  ;;  %v566_v43 = vpop.f32.mrf.mxu1  ;;  %v2112_v40 = vor.u32 %v2309_v38, %v2109_v13 }
 0x2af   :  { %v658_v45 = vmax.f32 %v566_v43, 0.0  ;;  %v667_v43 = vmax.f32 %v3026_v26, 0.0 }
 0x2b0   :  { %2532 = vst [vmem:[#allocation2 + $0x38] sm:$0xff] %v2440_v42   ;;  %1515 = vmatpush.bf16.msra.mxu3 %v2338_v46 }
 0x2b2   :  { %854 = vmatmul.f32.gmra.mxu2 %v658_v45 }
 0x2b4   :  { %1516 = vmatpush.bf16.msra.mxu3 %v2337_v48  ;;  %v2313_v48 = vld [vmem:[%s3557_s1 + $0x84] sm:$0xf] }
 0x2b5   :  { %v807_v50 = vpop.f32.mrf.mxu2 }
 0x2b6   :  { %v569_v51 = vpop.f32.mrf.mxu1 }
 0x2b7   :  { %v659_v52 = vmax.f32 %v569_v51, 0.0  ;;  %1508 = vmatmul.bf16.gmra.mxu3 %v1237_v49  ;;  %v2125_v49 = vld [vmem:[%s3557_s1 + $0x90] sm:$0xf0] }
 0x2b8   :  { %1517 = vmatpush.bf16.msra.mxu3 %v2336_v53  ;;  %v2128_v26 = vor.u32 %v2313_v48, %v2125_v49 }
 0x2ba   :  { %857 = vmatmul.f32.gmra.mxu2 %v659_v52  ;;  %v1865_v52 = vld [vmem:[%s3558_s5 + $0x68] sm:$0xff] }
 0x2bb   :  { %1870 = vmatpush.msrb.mxu0 %v1865_v52 }
 0x2bc   :  { %1518 = vmatpush.bf16.msra.mxu3 %v2335_v55 }
 0x2bd   :  { %v810_v56 = vpop.f32.mrf.mxu2 }
 0x2be   :  { %v2445_v57 = vpack.c.bf16 %v810_v56, %v807_v50  ;;  %v572_v58 = vpop.f32.mrf.mxu1 }
 0x2bf   :  { %v660_v59 = vmax.f32 %v572_v58, 0.0  ;;  %v2317_v58 = vld [vmem:[%s3557_s1 + $0xa4] sm:$0xf] }
 0x2c0   :  { %2533 = vst [vmem:[#allocation2 + $0x58] sm:$0xff] %v2445_v57   ;;  %1519 = vmatpush.bf16.msra.mxu3 %v2334_v60  ;;  %v670_v57 = vmax.f32 %v3044_v54, 0.0 }
 0x2c2   :  { %860 = vmatmul.f32.gmra.mxu2 %v660_v59  ;;  %v2141_v59 = vld [vmem:[%s3557_s1 + $0xb0] sm:$0xf0] }
 0x2c3   :  { %v2144_v44 = vor.u32 %v2317_v58, %v2141_v59 }
 0x2c4   :  { %1520 = vmatpush.bf16.msra.mxu3 %v2333_v0 }
 0x2c5   :  { %v813_v2 = vpop.f32.mrf.mxu2 }
 0x2c6   :  { %v575_v3 = vpop.f32.mrf.mxu1 }
 0x2c7   :  { %v661_v4 = vmax.f32 %v575_v3, 0.0  ;;  %1521 = vmatmul.bf16.vlgmr.msra.gmra.mxu3 %v2064_v1  ;;  %v2157_v3 = vld [vmem:[%s3557_s1 + $0xd0] sm:$0xf0] }
 0x2ca   :  { %863 = vmatmul.f32.gmra.mxu2 %v661_v4  ;;  %v3054_v5 = vpop.f32.mrf.mxu3  ;;  %v1864_v4 = vld [vmem:[%s3558_s5 + $0x60] sm:$0xff] }
 0x2cb   :  { %1871 = vmatpush.msrb.mxu0 %v1864_v4 }
 0x2cd   :  { %v816_v7 = vpop.f32.mrf.mxu2 }
 0x2ce   :  { %v2450_v8 = vpack.c.bf16 %v816_v7, %v813_v2  ;;  %v578_v9 = vpop.f32.mrf.mxu1  ;;  %v2321_v2 = vld [vmem:[%s3557_s1 + $0xc4] sm:$0xf] }
 0x2cf   :  { %v662_v10 = vmax.f32 %v578_v9, 0.0  ;;  %v2160_v6 = vor.u32 %v2321_v2, %v2157_v3  ;;  %v2115_v2 = vld [vmem:[%s3557_s1 + $0x68] sm:$0xf]  ;;  %v2312_v3 = vld [vmem:[%s3557_s1 + $0x74] sm:$0xf0] }
 0x2d0   :  { %2534 = vst [vmem:[#allocation2 + $0x40] sm:$0xff] %v2450_v8  }
 0x2d2   :  { %866 = vmatmul.f32.gmra.mxu2 %v662_v10  ;;  %v3065_v14 = vpop.f32.mrf.mxu3 }
 0x2d5   :  { %v819_v16 = vpop.f32.mrf.mxu2 }
 0x2d6   :  { %v581_v17 = vpop.f32.mrf.mxu1 }
 0x2d7   :  { %v663_v18 = vmax.f32 %v581_v17, 0.0  ;;  %1526 = vmatmul.bf16.gmra.mxu3 %v2080_v15  ;;  %v2343_v25 = vld [vmem:[#allocation2 + $0x40] sm:$0xff] }
 0x2da   :  { %869 = vmatmul.f32.gmra.mxu2 %v663_v18  ;;  %v3067_v20 = vpop.f32.mrf.mxu3 }
 0x2dd   :  { %v822_v21 = vpop.f32.mrf.mxu2 }
 0x2de   :  { %v2455_v22 = vpack.c.bf16 %v822_v21, %v819_v16  ;;  %v584_v23 = vpop.f32.mrf.mxu1  ;;  %v1206_v16 = vunpack.c.h.b16 %v3039_v41 }
 0x2df   :  { %v664_v24 = vmax.f32 %v584_v23, 0.0 }
 0x2e0   :  { %2535 = vst [vmem:[#allocation2 + $0xc8] sm:$0xff] %v2455_v22   ;;  %v1238_v21 = vpack.c.b16 %v1206_v16, %v1206_v16  ;;  %v2316_v16 = vld [vmem:[%s3557_s1 + $0x94] sm:$0xf0] }
 0x2e2   :  { %872 = vmatmul.f32.gmra.mxu2 %v664_v24  ;;  %v3075_v28 = vpop.f32.mrf.mxu3 }
 0x2e5   :  { %v825_v30 = vpop.f32.mrf.mxu2 }
 0x2e7   :  { %1531 = vmatmul.bf16.gmra.mxu3 %v2096_v29  ;;  %v2344_v23 = vld [vmem:[#allocation2 + $0xc8] sm:$0xff] }
 0x2ea   :  { %875 = vmatmul.f32.gmra.mxu2 %v665_v31  ;;  %v3081_v33 = vpop.f32.mrf.mxu3  ;;  %v1863_v31 = vld [vmem:[%s3558_s5 + $0x58] sm:$0xff] }
 0x2eb   :  { %1872 = vmatpush.msrb.mxu0 %v1863_v31  ;;  %v2320_v31 = vld [vmem:[%s3557_s1 + $0xb4] sm:$0xf0] }
 0x2ed   :  { %v828_v35 = vpop.f32.mrf.mxu2 }
 0x2ee   :  { %v2460_v36 = vpack.c.bf16 %v828_v35, %v825_v30  ;;  %v2342_v30 = vld [vmem:[#allocation2 + $0x58] sm:$0xff] }
 0x2ef   :  { %v2300_v35 = vld [vmem:[%s3557_s1 + $0x14] sm:$0xf0] }
 0x2f0   :  { %2536 = vst [vmem:[#allocation2 + $0xe0] sm:$0xff] %v2460_v36   ;;  %v2068_v38 = vor.u32 %v2300_v35, %v2067_v32 }
 0x2f2   :  { %878 = vmatmul.f32.gmra.mxu2 %v666_v37  ;;  %v3090_v39 = vpop.f32.mrf.mxu3  ;;  %v2341_v37 = vld [vmem:[#allocation2 + $0x38] sm:$0xff] }
 0x2f5   :  { %v831_v42 = vpop.f32.mrf.mxu2 }
 0x2f7   :  { %1536 = vmatmul.bf16.gmra.mxu3 %v2112_v40  ;;  %v2345_v18 = vld [vmem:[#allocation2 + $0xe0] sm:$0xff] }
 0x2fa   :  { %881 = vmatmul.f32.gmra.mxu2 %v667_v43  ;;  %v3093_v45 = vpop.f32.mrf.mxu3 }
 0x2fd   :  { %v834_v19 = vpop.f32.mrf.mxu2 }
 0x2fe   :  { %v2465_v46 = vpack.c.bf16 %v834_v19, %v831_v42  ;;  %v1960_v42 = vld [vmem:[%s3559_s6 + $0x78] sm:$0xff] }
 0x2ff   :  { %1961 = vmatpush.msrb.mxu1 %v1960_v42 }
 0x300   :  { %2537 = vst [vmem:[#allocation2 + $0x90] sm:$0xff] %v2465_v46   ;;  %v2083_v46 = vld [vmem:[%s3557_s1 + $0x28] sm:$0xf] }
 0x302   :  { %884 = vmatmul.f32.gmra.mxu2 %v668_v47  ;;  %v3102_v50 = vpop.f32.mrf.mxu3  ;;  %v2304_v47 = vld [vmem:[%s3557_s1 + $0x34] sm:$0xf0] }
 0x303   :  { %v2084_v49 = vor.u32 %v2304_v47, %v2083_v46  ;;  %v1957_v46 = vld [vmem:[%s3559_s6 + $0x60] sm:$0xff] }
 0x305   :  { %v837_v51 = vpop.f32.mrf.mxu2 }
 0x307   :  { %1541 = vmatmul.bf16.gmra.mxu3 %v2128_v26  ;;  %v2346_v15 = vld [vmem:[#allocation2 + $0x90] sm:$0xff] }
 0x30a   :  { %887 = vmatmul.f32.gmra.mxu2 %v669_v34  ;;  %v3108_v53 = vpop.f32.mrf.mxu3 }
 0x30d   :  { %v840_v55 = vpop.f32.mrf.mxu2 }
 0x30e   :  { %v2470_v56 = vpack.c.bf16 %v840_v55, %v837_v51  ;;  %v1862_v51 = vld [vmem:[%s3558_s5 + $0x50] sm:$0xff] }
 0x30f   :  { %1873 = vmatpush.msrb.mxu0 %v1862_v51  ;;  %v1025_v51 = vld [vmem:[%s3557_s1] sm:$0xff] }
 0x310   :  { %2538 = vst [vmem:[#allocation2 + $0x70] sm:$0xff] %v2470_v56   ;;  %v2099_v56 = vld [vmem:[%s3557_s1 + $0x48] sm:$0xf] }
 0x312   :  { %890 = vmatmul.f32.gmra.mxu2 %v670_v57  ;;  %v3117_v60 = vpop.f32.mrf.mxu3  ;;  %v2308_v57 = vld [vmem:[%s3557_s1 + $0x54] sm:$0xf0] }
 0x313   :  { %v2100_v59 = vor.u32 %v2308_v57, %v2099_v56  ;;  %v1026_v56 = vld [vmem:[%s3557_s1 + $0x8] sm:$0xff] }
 0x315   :  { %v843_v61 = vpop.f32.mrf.mxu2 }
 0x317   :  { %1546 = vmatmul.bf16.gmra.mxu3 %v2144_v44  ;;  %v2347_v10 = vld [vmem:[#allocation2 + $0x70] sm:$0xff] }
 0x31a   :  { %893 = vmatmul.f32.gmra.mxu2 %v671_v62  ;;  %v3120_v0 = vpop.f32.mrf.mxu3 }
 0x31d   :  { %v846_v54 = vpop.f32.mrf.mxu2 }
 0x31e   :  { %v2475_v1 = vpack.c.bf16 %v846_v54, %v843_v61  ;;  %v1959_v61 = vld [vmem:[%s3559_s6 + $0x70] sm:$0xff] }
 0x31f   :  { %1962 = vmatpush.msrb.mxu1 %v1959_v61 }
 0x320   :  { %2539 = vst [vmem:[#allocation2 + $0xc0] sm:$0xff] %v2475_v1  }
 0x322   :  { %v3131_v63 = vpop.f32.mrf.mxu3 }
 0x325   :  { %v849_v7 = vpop.f32.mrf.mxu2 }
 0x327   :  { %v2348_v8 = vld [vmem:[#allocation2 + $0xc0] sm:$0xff]  ;;  %1551 = vmatmul.bf16.gmra.mxu3 %v2160_v6  ;;  %v2116_v6 = vor.u32 %v2312_v3, %v2115_v2  ;;  %v3244_v2 = vld [vmem:[%s3557_s1 + $0xe8] sm:$0xff] }
 0x328   :  { %1561 = vmatpush.bf16.msrb.mxu3 %v2348_v8  ;;  %v1861_v8 = vld [vmem:[%s3558_s5 + $0x48] sm:$0xff] }
 0x329   :  { %1874 = vmatpush.msrb.mxu0 %v1861_v8  ;;  %v1207_v8 = vunpack.c.l.b16 %v3244_v2 }
 0x32a   :  { %v3133_v9 = vpop.f32.mrf.mxu3 }
 0x32c   :  { %1562 = vmatpush.bf16.msrb.mxu3 %v2347_v10 }
 0x32d   :  { %v852_v11 = vpop.f32.mrf.mxu2 }
 0x32e   :  { %v2480_v12 = vpack.c.bf16 %v852_v11, %v849_v7 }
 0x330   :  { %2540 = vst [vmem:[#allocation2 + $0xa8] sm:$0xff] %v2480_v12   ;;  %1563 = vmatpush.bf16.msrb.mxu3 %v2346_v15  ;;  %v2131_v15 = vld [vmem:[%s3557_s1 + $0x88] sm:$0xf] }
 0x332   :  { %v3136_v17 = vpop.f32.mrf.mxu3 }
 0x334   :  { %1564 = vmatpush.bf16.msrb.mxu3 %v2345_v18 }
 0x335   :  { %v855_v22 = vpop.f32.mrf.mxu2 }
 0x337   :  { %1556 = vmatmul.bf16.gmra.mxu3 %v1238_v21  ;;  %v2132_v21 = vor.u32 %v2316_v16, %v2131_v15  ;;  %v1028_v16 = vld [vmem:[%s3557_s1 + $0x18] sm:$0xff] }
 0x338   :  { %1565 = vmatpush.bf16.msrb.mxu3 %v2344_v23 }
 0x33a   :  { %v3138_v24 = vpop.f32.mrf.mxu3 }
 0x33c   :  { %1566 = vmatpush.bf16.msrb.mxu3 %v2343_v25 }
 0x33d   :  { %v858_v27 = vpop.f32.mrf.mxu2 }
 0x33e   :  { %v2485_v29 = vpack.c.bf16 %v858_v27, %v855_v22  ;;  %v1958_v22 = vld [vmem:[%s3559_s6 + $0x68] sm:$0xff] }
 0x33f   :  { %1963 = vmatpush.msrb.mxu1 %v1958_v22 }
 0x340   :  { %2541 = vst [vmem:[#allocation2 + $0xd0] sm:$0xff] %v2485_v29   ;;  %1567 = vmatpush.bf16.msrb.mxu3 %v2342_v30  ;;  %v2147_v30 = vld [vmem:[%s3557_s1 + $0xa8] sm:$0xf] }
 0x341   :  { %v2148_v35 = vor.u32 %v2320_v31, %v2147_v30  ;;  %1964 = vmatpush.msrb.mxu1 %v1957_v46  ;;  %v1664_v30 = vunpack.c.h.bf16 %v1028_v16 }
 0x342   :  { %v1511_v36 = vpop.f32.mrf.mxu3 }
 0x343   :  { %v1860_v36 = vld [vmem:[%s3558_s5 + $0x40] sm:$0xff] }
 0x344   :  { %1568 = vmatpush.bf16.msrb.mxu3 %v2341_v37  ;;  %1875 = vmatpush.msrb.mxu0 %v1860_v36 }
 0x345   :  { %v861_v13 = vpop.f32.mrf.mxu2 }
 0x347   :  { %1569 = vmatmul.bf16.vlgmr.msrb.gmra.mxu3 %v2068_v38 }
 0x34a   :  { %v3149_v40 = vpop.f32.mrf.mxu3 }
 0x34d   :  { %v864_v43 = vpop.f32.mrf.mxu2 }
 0x34e   :  { %v2490_v19 = vpack.c.bf16 %v864_v43, %v861_v13  ;;  %v2163_v43 = vld [vmem:[%s3557_s1 + $0xc8] sm:$0xf] }
 0x350   :  { %2542 = vst [vmem:[#allocation2 + $0x10] sm:$0xff] %v2490_v19   ;;  %v2324_v19 = vld [vmem:[%s3557_s1 + $0xd4] sm:$0xf0] }
 0x352   :  { %v3160_v48 = vpop.f32.mrf.mxu3 }
 0x355   :  { %v867_v26 = vpop.f32.mrf.mxu2 }
 0x357   :  { %1574 = vmatmul.bf16.gmra.mxu3 %v2084_v49  ;;  %v2164_v49 = vor.u32 %v2324_v19, %v2163_v43  ;;  %v1030_v43 = vld [vmem:[%s3557_s1 + $0x28] sm:$0xff]  ;;  %v2351_v46 = vld [vmem:[#allocation2 + $0x10] sm:$0xff] }
 0x35a   :  { %v3165_v52 = vpop.f32.mrf.mxu3 }
 0x35d   :  { %v870_v34 = vpop.f32.mrf.mxu2 }
 0x35e   :  { %v2495_v55 = vpack.c.bf16 %v870_v34, %v867_v26  ;;  %v1657_v34 = vunpack.c.l.bf16 %v1025_v51 }
 0x360   :  { %2543 = vst [vmem:[#allocation2 + $0x28] sm:$0xff] %v2495_v55   ;;  %v1658_v55 = vunpack.c.h.bf16 %v1025_v51  ;;  %v1956_v51 = vld [vmem:[%s3559_s6 + $0x58] sm:$0xff] }
 0x361   :  { %1965 = vmatpush.msrb.mxu1 %v1956_v51  ;;  %v2085_v51 = vld [vmem:[%s3557_s1 + $0x38] sm:$0xf0] }
 0x362   :  { %v3173_v58 = vpop.f32.mrf.mxu3  ;;  %v1717_v61 = vadd.f32 %v1658_v55, %v1657_v34  ;;  %v1668_v34 = vunpack.c.h.bf16 %v1030_v43 }
 0x365   :  { %v873_v44 = vpop.f32.mrf.mxu2 }
 0x367   :  { %1579 = vmatmul.bf16.gmra.mxu3 %v2100_v59 }
 0x36a   :  { %v3178_v62 = vpop.f32.mrf.mxu3 }
 0x36d   :  { %v876_v54 = vpop.f32.mrf.mxu2 }
 0x36e   :  { %v2500_v1 = vpack.c.bf16 %v876_v54, %v873_v44  ;;  %v1659_v44 = vunpack.c.l.bf16 %v1026_v56  ;;  %v1859_v54 = vld [vmem:[%s3558_s5 + $0x38] sm:$0xff] }
 0x36f   :  { %1876 = vmatpush.msrb.mxu0 %v1859_v54  ;;  %v2069_v54 = vld [vmem:[%s3557_s1 + $0x18] sm:$0xf0] }
 0x370   :  { %2544 = vst [vmem:[#allocation2 + $0xa0] sm:$0xff] %v2500_v1   ;;  %v1660_v1 = vunpack.c.h.bf16 %v1026_v56  ;;  %v1718_v3 = vadd.f32 %v1717_v61, %v1659_v44  ;;  %v2350_v56 = vld [vmem:[#allocation2 + $0xd0] sm:$0xff]  ;;  %v2298_v61 = vld [vmem:[%s3557_s1 + $0xc] sm:$0xf] }
 0x371   :  { %v1031_v44 = vld [vmem:[%s3557_s1 + $0x30] sm:$0xff] }
 0x372   :  { %v3186_v4 = vpop.f32.mrf.mxu3 }
 0x375   :  { %v879_v7 = vpop.f32.mrf.mxu2 }
 0x377   :  { %1584 = vmatmul.bf16.gmra.mxu3 %v2116_v6  ;;  %v2353_v22 = vld [vmem:[#allocation2 + $0xa0] sm:$0xff] }
 0x37a   :  { %v3191_v10 = vpop.f32.mrf.mxu3 }
 0x37d   :  { %v882_v11 = vpop.f32.mrf.mxu2 }
 0x37e   :  { %v2505_v12 = vpack.c.bf16 %v882_v11, %v879_v7  ;;  %v1719_v7 = vadd.f32 %v1718_v3, %v1660_v1  ;;  %v1027_v11 = vld [vmem:[%s3557_s1 + $0x10] sm:$0xff]  ;;  %v1669_v1 = vunpack.c.l.bf16 %v1031_v44  ;;  %v1670_v3 = vunpack.c.h.bf16 %v1031_v44 }
 0x37f   :  { %v1662_v15 = vunpack.c.h.bf16 %v1027_v11 }
 0x380   :  { %2545 = vst [vmem:[#allocation2 + $0xf8] sm:$0xff] %v2505_v12   ;;  %1720 = vadd.xlane.f32.xlu0 %v1719_v7  ;;  %v1661_v12 = vunpack.c.l.bf16 %v1027_v11 }
 0x382   :  { %v3199_v18 = vpop.f32.mrf.mxu3 }
 0x385   :  { %v885_v23 = vpop.f32.mrf.mxu2 }
 0x387   :  { %1589 = vmatmul.bf16.gmra.mxu3 %v2132_v21  ;;  %v2354_v6 = vld [vmem:[#allocation2 + $0xf8] sm:$0xff] }
 0x38a   :  { %v3204_v25 = vpop.f32.mrf.mxu3 }
 0x38d   :  { %v888_v27 = vpop.f32.mrf.mxu2 }
 0x38e   :  { %v2510_v29 = vpack.c.bf16 %v888_v27, %v885_v23  ;;  %v1663_v23 = vunpack.c.l.bf16 %v1028_v16  ;;  %v1722_v27 = vadd.f32 %v1662_v15, %v1661_v12  ;;  %v1732_v12 = vadd.f32 %v1670_v3, %v1669_v1 }
 0x38f   :  { %v2072_v15 = vor.u32 %v2298_v61, %v2069_v54 }
 0x390   :  { %2546 = vst [vmem:[#allocation2 + $0x20] sm:$0xff] %v2510_v29   ;;  %v1239_v29 = vpack.c.b16 %v1207_v8, %v1207_v8  ;;  %v1723_v31 = vadd.f32 %v1722_v27, %v1663_v23  ;;  %v2349_v8 = vld [vmem:[#allocation2 + $0xa8] sm:$0xff]  ;;  %v1033_v27 = vld [vmem:[%s3557_s1 + $0x40] sm:$0xff] }
 0x392   :  { %v3212_v32 = vpop.f32.mrf.mxu3  ;;  %v1724_v36 = vadd.f32 %v1723_v31, %v1664_v30  ;;  %v1674_v30 = vunpack.c.h.bf16 %v1033_v27  ;;  %v1523_v31 = vadd.f32 %v3149_v40, %v3054_v5  ;;  %v1035_v5 = vld [vmem:[%s3557_s1 + $0x50] sm:$0xff]  ;;  %v2302_v40 = vld [vmem:[%s3557_s1 + $0x2c] sm:$0xf] }
 0x393   :  { %v2088_v3 = vor.u32 %v2302_v40, %v2085_v51 }
 0x394   :  { %1725 = vadd.xlane.f32.xlu0 %v1724_v36 }
 0x395   :  { %v891_v37 = vpop.f32.mrf.mxu2 }
 0x397   :  { %1594 = vmatmul.bf16.gmra.mxu3 %v2148_v35  ;;  %v2355_v59 = vld [vmem:[#allocation2 + $0x20] sm:$0xff]  ;;  %v2352_v35 = vld [vmem:[#allocation2 + $0x28] sm:$0xff] }
 0x39a   :  { %v3217_v38 = vpop.f32.mrf.mxu3 }
 0x39d   :  { %v894_v13 = vpop.f32.mrf.mxu2 }
 0x39e   :  { %v2515_v42 = vpack.c.bf16 %v894_v13, %v891_v37  ;;  %v1029_v37 = vld [vmem:[%s3557_s1 + $0x20] sm:$0xff] }
 0x39f   :  { %v1665_v13 = vunpack.c.l.bf16 %v1029_v37 }
 0x3a0   :  { %2547 = vst [vmem:[#allocation2 + $0x98] sm:$0xff] %v2515_v42   ;;  %v1666_v42 = vunpack.c.h.bf16 %v1029_v37 }
 0x3a2   :  { %v3228_v47 = vpop.f32.mrf.mxu3 }
 0x3a7   :  { %v2356_v26 = vld [vmem:[#allocation2 + $0x98] sm:$0xff]  ;;  %1599 = vmatmul.bf16.gmra.mxu3 %v2164_v49  ;;  %v1667_v49 = vunpack.c.l.bf16 %v1030_v43  ;;  %v1858_v43 = vld [vmem:[%s3558_s5 + $0x30] sm:$0xff] }
 0x3a8   :  { %1609 = vmatpush.bf16.msra.mxu3 %v2356_v26  ;;  %v1727_v26 = vadd.f32 %v1666_v42, %v1665_v13  ;;  %1877 = vmatpush.msrb.mxu0 %v1858_v43  ;;  %v1530_v43 = vadd.f32 %v3173_v58, %v3075_v28  ;;  %v1041_v28 = vld [vmem:[%s3557_s1 + $0x80] sm:$0xff] }
 0x3a9   :  { %v1689_v58 = vunpack.c.l.bf16 %v1041_v28 }
 0x3aa   :  { %v3236_v57 = vpop.f32.mrf.mxu3  ;;  %v1728_v55 = vadd.f32 %v1727_v26, %v1667_v49 }
 0x3ac   :  { %1610 = vmatpush.bf16.msra.mxu3 %v2355_v59  ;;  %v1729_v59 = vadd.f32 %v1728_v55, %v1668_v34  ;;  %v1677_v34 = vunpack.c.l.bf16 %v1035_v5  ;;  %v1678_v55 = vunpack.c.h.bf16 %v1035_v5 }
 0x3ae   :  { %1730 = vadd.xlane.f32.xlu1 %v1729_v59  ;;  %v1036_v59 = vld [vmem:[%s3557_s1 + $0x58] sm:$0xff]  ;;  %v1742_v54 = vadd.f32 %v1678_v55, %v1677_v34 }
 0x3af   :  { %v1679_v61 = vunpack.c.l.bf16 %v1036_v59 }
 0x3b0   :  { %1611 = vmatpush.bf16.msra.mxu3 %v2354_v6  ;;  %v1032_v6 = vld [vmem:[%s3557_s1 + $0x38] sm:$0xff] }
 0x3b1   :  { %v1671_v11 = vunpack.c.l.bf16 %v1032_v6  ;;  %v1672_v16 = vunpack.c.h.bf16 %v1032_v6  ;;  %v1680_v6 = vunpack.c.h.bf16 %v1036_v59  ;;  %v1857_v59 = vld [vmem:[%s3558_s5 + $0x28] sm:$0xff] }
 0x3b2   :  { %v3253_v21 = vpop.f32.mrf.mxu3  ;;  %1878 = vmatpush.msrb.mxu0 %v1857_v59 }
 0x3b4   :  { %1612 = vmatpush.bf16.msra.mxu3 %v2353_v22  ;;  %v1733_v22 = vadd.f32 %v1732_v12, %v1671_v11  ;;  %v1955_v11 = vld [vmem:[%s3559_s6 + $0x50] sm:$0xff] }
 0x3b5   :  { %1966 = vmatpush.msrb.mxu1 %v1955_v11 }
 0x3b6   :  { %v1734_v23 = vadd.f32 %v1733_v22, %v1672_v16  ;;  %v1038_v16 = vld [vmem:[%s3557_s1 + $0x68] sm:$0xff] }
 0x3b7   :  { %1604 = vmatmul.bf16.gmra.mxu3 %v1239_v29  ;;  %v1673_v29 = vunpack.c.l.bf16 %v1033_v27 }
 0x3b8   :  { %1613 = vmatpush.bf16.msra.mxu3 %v2352_v35  ;;  %1735 = vadd.xlane.f32.xlu1 %v1734_v23  ;;  %v1034_v35 = vld [vmem:[%s3557_s1 + $0x48] sm:$0xff]  ;;  %v1683_v23 = vunpack.c.l.bf16 %v1038_v16 }
 0x3b9   :  { %v1675_v37 = vunpack.c.l.bf16 %v1034_v35  ;;  %v1737_v13 = vadd.f32 %v1674_v30, %v1673_v29  ;;  %v1684_v30 = vunpack.c.h.bf16 %v1038_v16 }
 0x3ba   :  { %v3261_v19 = vpop.f32.mrf.mxu3 }
 0x3bb   :  { %v1738_v49 = vadd.f32 %v1737_v13, %v1675_v37 }
 0x3bc   :  { %1614 = vmatpush.bf16.msra.mxu3 %v2351_v46  ;;  %v1676_v46 = vunpack.c.h.bf16 %v1034_v35 }
 0x3be   :  { %v1739_v26 = vadd.f32 %v1738_v49, %v1676_v46  ;;  %v1040_v46 = vld [vmem:[%s3557_s1 + $0x78] sm:$0xff] }
 0x3bf   :  { %v1688_v34 = vunpack.c.h.bf16 %v1040_v46 }
 0x3c0   :  { %1615 = vmatpush.bf16.msra.mxu3 %v2350_v56  ;;  %1740 = vadd.xlane.f32.xlu2 %v1739_v26  ;;  %v1525_v56 = vadd.f32 %v3160_v48, %v3065_v14  ;;  %v1037_v14 = vld [vmem:[%s3557_s1 + $0x60] sm:$0xff]  ;;  %v1687_v26 = vunpack.c.l.bf16 %v1040_v46  ;;  %v1538_v46 = vadd.f32 %v3191_v10, %v3093_v45  ;;  %v2314_v45 = vld [vmem:[%s3557_s1 + $0x8c] sm:$0xf]  ;;  %v2133_v10 = vld [vmem:[%s3557_s1 + $0x98] sm:$0xf0] }
 0x3c1   :  { %v1681_v48 = vunpack.c.l.bf16 %v1037_v14  ;;  %v1682_v12 = vunpack.c.h.bf16 %v1037_v14 }
 0x3c2   :  { %v1559_v7 = vpop.f32.mrf.mxu3 }
 0x3c3   :  { %v1743_v7 = vadd.f32 %v1742_v54, %v1679_v61  ;;  %v1747_v27 = vadd.f32 %v1682_v12, %v1681_v48  ;;  %v1533_v61 = vadd.f32 %v3178_v62, %v3081_v33  ;;  %v1042_v54 = vld [vmem:[%s3557_s1 + $0x88] sm:$0xff]  ;;  %v1043_v12 = vld [vmem:[%s3557_s1 + $0x90] sm:$0xff]  ;;  %v2117_v62 = vld [vmem:[%s3557_s1 + $0x78] sm:$0xf0] }
 0x3c4   :  { %1616 = vmatpush.bf16.msra.mxu3 %v2349_v8  ;;  %v1692_v11 = vunpack.c.h.bf16 %v1042_v54  ;;  %v2310_v33 = vld [vmem:[%s3557_s1 + $0x6c] sm:$0xf]  ;;  %v1694_v16 = vunpack.c.h.bf16 %v1043_v12 }
 0x3c5   :  { %v1744_v8 = vadd.f32 %v1743_v7, %v1680_v6  ;;  %v1691_v6 = vunpack.c.l.bf16 %v1042_v54  ;;  %v1048_v54 = vld [vmem:[%s3557_s1 + $0xb8] sm:$0xff] }
 0x3c7   :  { %1617 = vmatmul.bf16.vlgmr.msra.gmra.mxu3 %v2072_v15  ;;  %v1528_v15 = vadd.f32 %v3165_v52, %v3067_v20  ;;  %v2306_v20 = vld [vmem:[%s3557_s1 + $0x4c] sm:$0xf]  ;;  %v2101_v52 = vld [vmem:[%s3557_s1 + $0x58] sm:$0xf0] }
 0x3c8   :  { %1745 = vadd.xlane.f32.xlu2 %v1744_v8  ;;  %v2104_v51 = vor.u32 %v2306_v20, %v2101_v52  ;;  %v1954_v20 = vld [vmem:[%s3559_s6 + $0x48] sm:$0xff] }
 0x3c9   :  { %1967 = vmatpush.msrb.mxu1 %v1954_v20 }
 0x3ca   :  { %v1570_v36 = vpop.f32.mrf.mxu3 }
 0x3cb   :  { %v3286_v42 = vadd.f32 %v1570_v36, %v1523_v31  ;;  %v1748_v31 = vadd.f32 %v1747_v27, %v1683_v23  ;;  %v1039_v36 = vld [vmem:[%s3557_s1 + $0x70] sm:$0xff]  ;;  %v1044_v23 = vld [vmem:[%s3557_s1 + $0x98] sm:$0xff] }
 0x3cc   :  { %v1685_v37 = vunpack.c.l.bf16 %v1039_v36  ;;  %v1686_v13 = vunpack.c.h.bf16 %v1039_v36  ;;  %v2120_v36 = vor.u32 %v2310_v33, %v2117_v62  ;;  %v1696_v52 = vunpack.c.h.bf16 %v1044_v23 }
 0x3cd   :  { %v1749_v35 = vadd.f32 %v1748_v31, %v1684_v30  ;;  %v1695_v30 = vunpack.c.l.bf16 %v1044_v23 }
 0x3ce   :  { %v1752_v5 = vadd.f32 %v1686_v13, %v1685_v37 }
 0x3cf   :  { %1750 = vadd.xlane.f32.xlu0 %v1749_v35 }
 0x3d0   :  { %v1753_v55 = vadd.f32 %v1752_v5, %v1687_v26 }
 0x3d2   :  { %v1572_v44 = vpop.f32.mrf.mxu3 }
 0x3d3   :  { %v3305_v1 = vadd.f32 %v1572_v44, %v1525_v56  ;;  %v1754_v56 = vadd.f32 %v1753_v55, %v1688_v34  ;;  %v1690_v44 = vunpack.c.h.bf16 %v1041_v28  ;;  %v1047_v28 = vld [vmem:[%s3557_s1 + $0xb0] sm:$0xff] }
 0x3d5   :  { %1755 = vadd.xlane.f32.xlu1 %v1754_v56  ;;  %v1757_v7 = vadd.f32 %v1690_v44, %v1689_v58  ;;  %v1701_v58 = vunpack.c.l.bf16 %v1047_v28  ;;  %v1702_v44 = vunpack.c.h.bf16 %v1047_v28 }
 0x3d7   :  { %1622 = vmatmul.bf16.gmra.mxu3 %v2088_v3  ;;  %v1758_v14 = vadd.f32 %v1757_v7, %v1691_v6  ;;  %v1703_v6 = vunpack.c.l.bf16 %v1048_v54  ;;  %v1772_v7 = vadd.f32 %v1702_v44, %v1701_v58  ;;  %v1715_v58 = vunpack.c.l.bf16 %v3244_v2 }
 0x3d9   :  { %v1759_v48 = vadd.f32 %v1758_v14, %v1692_v11  ;;  %v2136_v14 = vor.u32 %v2314_v45, %v2133_v10  ;;  %v1773_v33 = vadd.f32 %v1772_v7, %v1703_v6  ;;  %v1548_v45 = vadd.f32 %v3217_v38, %v3120_v0  ;;  %v2165_v0 = vld [vmem:[%s3557_s1 + $0xd8] sm:$0xf0] }
 0x3da   :  { %v1575_v22 = vpop.f32.mrf.mxu3  ;;  %v1550_v38 = vadd.f32 %v3228_v47, %v3131_v63  ;;  %v1853_v63 = vld [vmem:[%s3558_s5 + $0x8] sm:$0xff]  ;;  %v1208_v47 = vunpack.c.h.b16 %v3244_v2 }
 0x3db   :  { %v3318_v29 = vadd.f32 %v1575_v22, %v1528_v15  ;;  %1760 = vadd.xlane.f32.xlu2 %v1759_v48  ;;  %v1693_v15 = vunpack.c.l.bf16 %v1043_v12  ;;  %v1535_v22 = vadd.f32 %v3186_v4, %v3090_v39  ;;  %v1045_v39 = vld [vmem:[%s3557_s1 + $0xa0] sm:$0xff]  ;;  %v1704_v12 = vunpack.c.h.bf16 %v1048_v54  ;;  %v1855_v54 = vld [vmem:[%s3558_s5 + $0x18] sm:$0xff] }
 0x3dc   :  { %v1697_v4 = vunpack.c.l.bf16 %v1045_v39  ;;  %v1856_v48 = vld [vmem:[%s3558_s5 + $0x20] sm:$0xff] }
 0x3dd   :  { %v1762_v31 = vadd.f32 %v1694_v16, %v1693_v15  ;;  %1879 = vmatpush.msrb.mxu0 %v1856_v48  ;;  %v1774_v62 = vadd.f32 %v1773_v33, %v1704_v12  ;;  %v1543_v16 = vadd.f32 %v3204_v25, %v3108_v53  ;;  %v2318_v53 = vld [vmem:[%s3557_s1 + $0xac] sm:$0xf]  ;;  %v2149_v25 = vld [vmem:[%s3557_s1 + $0xb8] sm:$0xf0]  ;;  %v1553_v33 = vadd.f32 %v3236_v57, %v3133_v9  ;;  %v1852_v9 = vld [vmem:[%s3558_s5] sm:$0xff] }
 0x3de   :  { %v1555_v57 = vadd.f32 %v3253_v21, %v3136_v17 }
 0x3df   :  { %v1763_v37 = vadd.f32 %v1762_v31, %v1695_v30  ;;  %1880 = vmatpush.msrb.mxu0 %v1855_v54 }
 0x3e1   :  { %v1764_v13 = vadd.f32 %v1763_v37, %v1696_v52  ;;  %v1051_v37 = vld [vmem:[%s3557_s1 + $0xd0] sm:$0xff] }
 0x3e2   :  { %v1577_v49 = vpop.f32.mrf.mxu3 }
 0x3e3   :  { %v3334_v40 = vadd.f32 %v1577_v49, %v1530_v43  ;;  %1765 = vadd.xlane.f32.xlu0 %v1764_v13  ;;  %v1698_v43 = vunpack.c.h.bf16 %v1045_v39  ;;  %v1046_v49 = vld [vmem:[%s3557_s1 + $0xa8] sm:$0xff]  ;;  %1775 = vadd.xlane.f32.xlu2 %v1774_v62  ;;  %v1709_v13 = vunpack.c.l.bf16 %v1051_v37  ;;  %v1710_v39 = vunpack.c.h.bf16 %v1051_v37 }
 0x3e4   :  { %v1699_v5 = vunpack.c.l.bf16 %v1046_v49  ;;  %v1700_v55 = vunpack.c.h.bf16 %v1046_v49 }
 0x3e7   :  { %1627 = vmatmul.bf16.gmra.mxu3 %v2104_v51  ;;  %v1767_v51 = vadd.f32 %v1698_v43, %v1697_v4  ;;  %v1545_v4 = vadd.f32 %v3212_v32, %v3117_v60  ;;  %v1052_v43 = vld [vmem:[%s3557_s1 + $0xd8] sm:$0xff]  ;;  %v1713_v60 = vunpack.c.l.bf16 %v3039_v41  ;;  %v1714_v32 = vunpack.c.h.bf16 %v3039_v41  ;;  %v2322_v41 = vld [vmem:[%s3557_s1 + $0xcc] sm:$0xf] }
 0x3e8   :  { %v1711_v49 = vunpack.c.l.bf16 %v1052_v43  ;;  %v2168_v12 = vor.u32 %v2322_v41, %v2165_v0 }
 0x3e9   :  { %v1768_v56 = vadd.f32 %v1767_v51, %v1699_v5  ;;  %v2152_v51 = vor.u32 %v2318_v53, %v2149_v25  ;;  %v1787_v44 = vadd.f32 %v1714_v32, %v1713_v60 }
 0x3ea   :  { %v1580_v3 = vpop.f32.mrf.mxu3 }
 0x3eb   :  { %v3347_v8 = vadd.f32 %v1580_v3, %v1533_v61  ;;  %v1769_v59 = vadd.f32 %v1768_v56, %v1700_v55  ;;  %v1540_v61 = vadd.f32 %v3199_v18, %v3102_v50  ;;  %v1049_v50 = vld [vmem:[%s3557_s1 + $0xc0] sm:$0xff]  ;;  %v1712_v56 = vunpack.c.h.bf16 %v1052_v43 }
 0x3ec   :  { %v1705_v18 = vunpack.c.l.bf16 %v1049_v50  ;;  %v1706_v15 = vunpack.c.h.bf16 %v1049_v50  ;;  %v1953_v55 = vld [vmem:[%s3559_s6 + $0x40] sm:$0xff]  ;;  %v1788_v6 = vadd.f32 %v1787_v44, %v1715_v58 }
 0x3ed   :  { %1770 = vadd.xlane.f32.xlu1 %v1769_v59  ;;  %1968 = vmatpush.msrb.mxu1 %v1953_v55 }
 0x3ee   :  { %v1777_v30 = vadd.f32 %v1706_v15, %v1705_v18  ;;  %v1854_v18 = vld [vmem:[%s3558_s5 + $0x10] sm:$0xff]  ;;  %v1952_v15 = vld [vmem:[%s3559_s6 + $0x38] sm:$0xff] }
 0x3ef   :  { %1881 = vmatpush.msrb.mxu0 %v1854_v18  ;;  %1969 = vmatpush.msrb.mxu1 %v1952_v15 }
 0x3f1   :  { %1882 = vmatpush.msrb.mxu0 %v1853_v63 }
 0x3f2   :  { %v1582_v27 = vpop.f32.mrf.mxu3 }
 0x3f3   :  { %v3363_v35 = vadd.f32 %v1582_v27, %v1535_v22  ;;  %v1050_v22 = vld [vmem:[%s3557_s1 + $0xc8] sm:$0xff]  ;;  %1883 = vmatpush.msrb.mxu0 %v1852_v9 }
 0x3f4   :  { %v1707_v27 = vunpack.c.l.bf16 %v1050_v22 }
 0x3f6   :  { %v1778_v20 = vadd.f32 %v1777_v30, %v1707_v27 }
 0x3f7   :  { %1632 = vmatmul.bf16.gmra.mxu3 %v2120_v36  ;;  %v1708_v36 = vunpack.c.h.bf16 %v1050_v22 }
 0x3f9   :  { %v1779_v52 = vadd.f32 %v1778_v20, %v1708_v36  ;;  %v1721_v36 = vpop.xlane.xlu0 %1720 }
 0x3fa   :  { %v1585_v26 = vpop.f32.mrf.mxu3  ;;  %v1792_v20 = vmax.f32 %v1721_v36, 1.0 }
 0x3fb   :  { %v3376_v34 = vadd.f32 %v1585_v26, %v1538_v46  ;;  %1780 = vadd.xlane.f32.xlu0 %v1779_v52  ;;  %v1782_v26 = vadd.f32 %v1710_v39, %v1709_v13 }
 0x3fc   :  { %2580 = vrcp.f32 %v1792_v20 }
 0x3fd   :  { %v1783_v59 = vadd.f32 %v1782_v26, %v1711_v49 }
 0x3ff   :  { %v1784_v28 = vadd.f32 %v1783_v59, %v1712_v56 }
 0x401   :  { %1785 = vadd.xlane.f32.xlu1 %v1784_v28 }
 0x402   :  { %v1587_v3 = vpop.f32.mrf.mxu3  ;;  %v2581_v25 = vpop.eup %2580 }
 0x403   :  { %v3392_v11 = vadd.f32 %v1587_v3, %v1540_v61  ;;  %v1716_v3 = vunpack.c.h.bf16 %v3244_v2  ;;  %v1558_v2 = vadd.f32 %v3261_v19, %v3138_v24  ;;  %v1951_v24 = vld [vmem:[%s3559_s6 + $0x30] sm:$0xff] }
 0x404   :  { %1970 = vmatpush.msrb.mxu1 %v1951_v24 }
 0x405   :  { %v1789_v7 = vadd.f32 %v1788_v6, %v1716_v3 }
 0x407   :  { %1637 = vmatmul.bf16.gmra.mxu3 %v2136_v14  ;;  %1790 = vadd.xlane.f32.xlu2 %v1789_v7  ;;  %v1726_v37 = vpop.xlane.xlu0 %1725  ;;  %v1950_v7 = vld [vmem:[%s3559_s6 + $0x28] sm:$0xff] }
 0x408   :  { %v1793_v53 = vmax.f32 %v1726_v37, 1.0  ;;  %1971 = vmatpush.msrb.mxu1 %v1950_v7 }
 0x40a   :  { %v1590_v23 = vpop.f32.mrf.mxu3  ;;  %2582 = vrcp.f32 %v1793_v53 }
 0x40b   :  { %v3405_v31 = vadd.f32 %v1590_v23, %v1543_v16  ;;  %v1240_v23 = vpack.c.b16 %v1208_v47, %v1208_v47 }
 0x410   :  { %v2583_v43 = vpop.eup %2582 }
 0x412   :  { %v1592_v46 = vpop.f32.mrf.mxu3 }
 0x413   :  { %v3421_v5 = vadd.f32 %v1592_v46, %v1545_v4 }
 0x417   :  { %1642 = vmatmul.bf16.gmra.mxu3 %v2152_v51 }
 0x41a   :  { %v1595_v10 = vpop.f32.mrf.mxu3 }
 0x41b   :  { %v3431_v61 = vadd.f32 %v1595_v10, %v1548_v45 }
 0x421   :  { %v1731_v21 = vpop.xlane.xlu1 %1730 }
 0x422   :  { %v1597_v14 = vpop.f32.mrf.mxu3  ;;  %v1794_v19 = vmax.f32 %v1731_v21, 1.0 }
 0x423   :  { %v3445_v48 = vadd.f32 %v1597_v14, %v1550_v38 }
 0x424   :  { %2584 = vrcp.f32 %v1794_v19 }
 0x427   :  { %1647 = vmatmul.bf16.gmra.mxu3 %v2168_v12 }
 0x42a   :  { %v1600_v62 = vpop.f32.mrf.mxu3  ;;  %v2585_v56 = vpop.eup %2584 }
 0x42b   :  { %v3449_v50 = vadd.f32 %v1600_v62, %v1553_v33  ;;  %v1736_v51 = vpop.xlane.xlu1 %1735 }
 0x432   :  { %v1602_v16 = vpop.f32.mrf.mxu3 }
 0x433   :  { %v3466_v22 = vadd.f32 %v1602_v16, %v1555_v57  ;;  %v1741_v60 = vpop.xlane.xlu2 %1740 }
 0x434   :  { %v1796_v10 = vmax.f32 %v1741_v60, 1.0 }
 0x437   :  { %1652 = vmatmul.bf16.gmra.mxu3 %v1240_v23 }
 0x43a   :  { %v1605_v27 = vpop.f32.mrf.mxu3 }
 0x43b   :  { %v3470_v30 = vadd.f32 %v1605_v27, %v1558_v2  ;;  %v1746_v3 = vpop.xlane.xlu2 %1745 }
 0x43c   :  { %v1797_v41 = vmax.f32 %v1746_v3, 1.0 }
 0x442   :  { %v1607_v52 = vpop.f32.mrf.mxu3  ;;  %v1751_v12 = vpop.xlane.xlu0 %1750 }
 0x448   :  { %v1756_v15 = vpop.xlane.xlu1 %1755 }
 0x449   :  { %v1799_v57 = vmax.f32 %v1756_v15, 1.0 }
 0x44a   :  { %v1618_v13 = vpop.f32.mrf.mxu3 }
 0x44b   :  { %v1619_v17 = vadd.f32 %v1618_v13, %v3286_v42  ;;  %v1795_v42 = vmax.f32 %v1736_v51, 1.0 }
 0x44d   :  { %v1822_v39 = vmul.f32 %v2581_v25, %v1619_v17  ;;  %2586 = vrcp.f32 %v1795_v42  ;;  %v1949_v17 = vld [vmem:[%s3559_s6 + $0x20] sm:$0xff] }
 0x44e   :  { %2588 = vrcp.f32 %v1796_v10  ;;  %v1761_v27 = vpop.xlane.xlu2 %1760  ;;  %1972 = vmatpush.msrb.mxu1 %v1949_v17  ;;  %v1948_v10 = vld [vmem:[%s3559_s6 + $0x18] sm:$0xff] }
 0x44f   :  { %v1837_v4 = vmax.f32 %v1822_v39, 0.0  ;;  %2590 = vrcp.f32 %v1797_v41  ;;  %v1800_v20 = vmax.f32 %v1761_v27, 1.0 }
 0x450   :  { %1973 = vmatpush.msrb.mxu1 %v1948_v10 }
 0x451   :  { %1884 = vmatmul.f32.vlgmr.msrb.gmra.mxu0 %v1837_v4 }
 0x452   :  { %v1620_v46 = vpop.f32.mrf.mxu3 }
 0x453   :  { %v1621_v49 = vadd.f32 %v1620_v46, %v3305_v1  ;;  %v2587_v58 = vpop.eup %2586 }
 0x455   :  { %v1823_v26 = vmul.f32 %v2583_v43, %v1621_v49 }
 0x456   :  { %v1766_v25 = vpop.xlane.xlu0 %1765 }
 0x457   :  { %v1838_v55 = vmax.f32 %v1823_v26, 0.0  ;;  %v1801_v21 = vmax.f32 %v1766_v25, 1.0 }
 0x459   :  { %1887 = vmatmul.f32.gmra.mxu0 %v1838_v55  ;;  %v1776_v55 = vpop.xlane.xlu2 %1775 }
 0x45a   :  { %v1623_v59 = vpop.f32.mrf.mxu3 }
 0x45b   :  { %v1624_v28 = vadd.f32 %v1623_v59, %v3318_v29  ;;  %v2589_v29 = vpop.eup %2588 }
 0x45c   :  { %v2591_v62 = vpop.eup %2590 }
 0x45d   :  { %v1824_v32 = vmul.f32 %v2585_v56, %v1624_v28  ;;  %v1803_v56 = vmax.f32 %v1776_v55, 1.0 }
 0x45f   :  { %v1839_v45 = vmax.f32 %v1824_v32, 0.0 }
 0x460   :  { %v1771_v19 = vpop.xlane.xlu1 %1770 }
 0x461   :  { %1890 = vmatmul.f32.gmra.mxu0 %v1839_v45 }
 0x462   :  { %v1625_v44 = vpop.f32.mrf.mxu3 }
 0x463   :  { %v1626_v1 = vadd.f32 %v1625_v44, %v3334_v40  ;;  %v1798_v40 = vmax.f32 %v1751_v12, 1.0  ;;  %v1946_v12 = vld [vmem:[%s3559_s6 + $0x8] sm:$0xff] }
 0x465   :  { %v1825_v54 = vmul.f32 %v2587_v58, %v1626_v1  ;;  %2592 = vrcp.f32 %v1798_v40 }
 0x466   :  { %2594 = vrcp.f32 %v1799_v57 }
 0x467   :  { %v1840_v6 = vmax.f32 %v1825_v54, 0.0  ;;  %2596 = vrcp.f32 %v1800_v20 }
 0x468   :  { %2598 = vrcp.f32 %v1801_v21 }
 0x469   :  { %1893 = vmatmul.f32.gmra.mxu0 %v1840_v6 }
 0x46a   :  { %v1628_v0 = vpop.f32.mrf.mxu3 }
 0x46b   :  { %v1629_v38 = vadd.f32 %v1628_v0, %v3347_v8  ;;  %v2593_v16 = vpop.eup %2592 }
 0x46c   :  { %v2595_v52 = vpop.eup %2594 }
 0x46d   :  { %v1826_v14 = vmul.f32 %v2589_v29, %v1629_v38 }
 0x46e   :  { %v1781_v32 = vpop.xlane.xlu0 %1780 }
 0x46f   :  { %v1841_v33 = vmax.f32 %v1826_v14, 0.0  ;;  %v1804_v58 = vmax.f32 %v1781_v32, 1.0 }
 0x471   :  { %1896 = vmatmul.f32.gmra.mxu0 %v1841_v33 }
 0x472   :  { %v1630_v18 = vpop.f32.mrf.mxu3 }
 0x473   :  { %v1631_v63 = vadd.f32 %v1630_v18, %v3363_v35 }
 0x474   :  { %v1786_v3 = vpop.xlane.xlu1 %1785 }
 0x475   :  { %v1827_v47 = vmul.f32 %v2591_v62, %v1631_v63  ;;  %v1805_v7 = vmax.f32 %v1786_v3, 1.0 }
 0x477   :  { %v1842_v9 = vmax.f32 %v1827_v47, 0.0 }
 0x479   :  { %1899 = vmatmul.f32.gmra.mxu0 %v1842_v9 }
 0x47a   :  { %v1633_v23 = vpop.f32.mrf.mxu3  ;;  %v1791_v14 = vpop.xlane.xlu2 %1790 }
 0x47b   :  { %v1634_v8 = vadd.f32 %v1633_v23, %v3376_v34  ;;  %v2597_v34 = vpop.eup %2596  ;;  %v1806_v40 = vmax.f32 %v1791_v14, 1.0 }
 0x47c   :  { %v2599_v46 = vpop.eup %2598 }
 0x47d   :  { %v1828_v2 = vmul.f32 %v2593_v16, %v1634_v8 }
 0x47f   :  { %v1843_v36 = vmax.f32 %v1828_v2, 0.0 }
 0x481   :  { %1902 = vmatmul.f32.gmra.mxu0 %v1843_v36 }
 0x482   :  { %v1635_v37 = vpop.f32.mrf.mxu3 }
 0x483   :  { %v1636_v35 = vadd.f32 %v1635_v37, %v3392_v11  ;;  %v1802_v11 = vmax.f32 %v1771_v19, 1.0 }
 0x485   :  { %v1829_v53 = vmul.f32 %v2595_v52, %v1636_v35  ;;  %2600 = vrcp.f32 %v1802_v11 }
 0x486   :  { %2602 = vrcp.f32 %v1803_v56 }
 0x487   :  { %v1844_v13 = vmax.f32 %v1829_v53, 0.0  ;;  %2604 = vrcp.f32 %v1804_v58 }
 0x488   :  { %2606 = vrcp.f32 %v1805_v7 }
 0x489   :  { %1905 = vmatmul.f32.gmra.mxu0 %v1844_v13  ;;  %2608 = vrcp.f32 %v1806_v40 }
 0x48a   :  { %v1638_v39 = vpop.f32.mrf.mxu3 }
 0x48b   :  { %v1639_v4 = vadd.f32 %v1638_v39, %v3405_v31  ;;  %v2601_v59 = vpop.eup %2600 }
 0x48c   :  { %v2603_v44 = vpop.eup %2602 }
 0x48d   :  { %v1830_v24 = vmul.f32 %v2597_v34, %v1639_v4  ;;  %v2605_v41 = vpop.eup %2604 }
 0x48e   :  { %v2607_v62 = vpop.eup %2606 }
 0x48f   :  { %v1845_v43 = vmax.f32 %v1830_v24, 0.0  ;;  %v2609_v15 = vpop.eup %2608 }
 0x491   :  { %1908 = vmatmul.f32.gmra.mxu0 %v1845_v43 }
 0x492   :  { %v1640_v49 = vpop.f32.mrf.mxu3 }
 0x493   :  { %v1641_v26 = vadd.f32 %v1640_v49, %v3421_v5  ;;  %v1947_v5 = vld [vmem:[%s3559_s6 + $0x10] sm:$0xff] }
 0x494   :  { %1974 = vmatpush.msrb.mxu1 %v1947_v5 }
 0x495   :  { %v1831_v51 = vmul.f32 %v2599_v46, %v1641_v26 }
 0x496   :  { %1975 = vmatpush.msrb.mxu1 %v1946_v12 }
 0x497   :  { %v1846_v42 = vmax.f32 %v1831_v51, 0.0 }
 0x499   :  { %1911 = vmatmul.f32.gmra.mxu0 %v1846_v42 }
 0x49a   :  { %v1643_v28 = vpop.f32.mrf.mxu3 }
 0x49b   :  { %v1644_v31 = vadd.f32 %v1643_v28, %v3431_v61 }
 0x49d   :  { %v1832_v60 = vmul.f32 %v2601_v59, %v1644_v31 }
 0x49f   :  { %v1847_v45 = vmax.f32 %v1832_v60, 0.0 }
 0x4a1   :  { %1914 = vmatmul.f32.gmra.mxu0 %v1847_v45 }
 0x4a2   :  { %v1645_v1 = vpop.f32.mrf.mxu3 }
 0x4a3   :  { %v1646_v61 = vadd.f32 %v1645_v1, %v3445_v48  ;;  %v1945_v48 = vld [vmem:[%s3559_s6] sm:$0xff] }
 0x4a4   :  { %1976 = vmatpush.msrb.mxu1 %v1945_v48 }
 0x4a5   :  { %v1833_v54 = vmul.f32 %v2603_v44, %v1646_v61 }
 0x4a7   :  { %v1848_v6 = vmax.f32 %v1833_v54, 0.0 }
 0x4a9   :  { %1917 = vmatmul.f32.gmra.mxu0 %v1848_v6 }
 0x4aa   :  { %v1648_v29 = vpop.f32.mrf.mxu3 }
 0x4ab   :  { %v1649_v0 = vadd.f32 %v1648_v29, %v3449_v50 }
 0x4ad   :  { %v1834_v38 = vmul.f32 %v2605_v41, %v1649_v0 }
 0x4af   :  { %v1849_v33 = vmax.f32 %v1834_v38, 0.0 }
 0x4b1   :  { %1920 = vmatmul.f32.gmra.mxu0 %v1849_v33 }
 0x4b2   :  { %v1650_v18 = vpop.f32.mrf.mxu3 }
 0x4b3   :  { %v1651_v50 = vadd.f32 %v1650_v18, %v3466_v22 }
 0x4b5   :  { %v1835_v63 = vmul.f32 %v2607_v62, %v1651_v50 }
 0x4b7   :  { %v1850_v47 = vmax.f32 %v1835_v63, 0.0 }
 0x4b9   :  { %1923 = vmatmul.f32.gmra.mxu0 %v1850_v47 }
 0x4ba   :  { %v1653_v9 = vpop.f32.mrf.mxu3 }
 0x4bb   :  { %v1654_v57 = vadd.f32 %v1653_v9, %v3470_v30 }
 0x4bd   :  { %v1836_v16 = vmul.f32 %v2609_v15, %v1654_v57 }
 0x4bf   :  { %v1851_v23 = vmax.f32 %v1836_v16, 0.0 }
 0x4c1   :  { %1926 = vmatmul.f32.gmra.mxu0 %v1851_v23 }
 0x4c2   :  { %v1655_v8 = vpop.f32.mrf.mxu3 }
 0x4ce   :  { %v1885_v2 = vpop.f32.mrf.mxu0 }
 0x4cf   :  { %v1930_v27 = vmax.f32 %v1885_v2, 0.0 }
 0x4d1   :  { %1977 = vmatmul.f32.vlgmr.msrb.gmra.mxu1 %v1930_v27 }
 0x4d6   :  { %v1888_v36 = vpop.f32.mrf.mxu0 }
 0x4d7   :  { %v1931_v20 = vmax.f32 %v1888_v36, 0.0 }
 0x4d9   :  { %1980 = vmatmul.f32.gmra.mxu1 %v1931_v20 }
 0x4de   :  { %v1891_v52 = vpop.f32.mrf.mxu0 }
 0x4df   :  { %v1932_v22 = vmax.f32 %v1891_v52, 0.0 }
 0x4e1   :  { %1983 = vmatmul.f32.gmra.mxu1 %v1932_v22 }
 0x4e6   :  { %v1894_v37 = vpop.f32.mrf.mxu0 }
 0x4e7   :  { %v1933_v35 = vmax.f32 %v1894_v37, 0.0 }
 0x4e9   :  { %1986 = vmatmul.f32.gmra.mxu1 %v1933_v35 }
 0x4ee   :  { %v1897_v53 = vpop.f32.mrf.mxu0 }
 0x4ef   :  { %v1934_v25 = vmax.f32 %v1897_v53, 0.0 }
 0x4f1   :  { %1989 = vmatmul.f32.gmra.mxu1 %v1934_v25 }
 0x4f6   :  { %v1900_v30 = vpop.f32.mrf.mxu0 }
 0x4f7   :  { %v1935_v13 = vmax.f32 %v1900_v30, 0.0 }
 0x4f9   :  { %1992 = vmatmul.f32.gmra.mxu1 %v1935_v13 }
 0x4fe   :  { %v1903_v17 = vpop.f32.mrf.mxu0 }
 0x4ff   :  { %v1936_v21 = vmax.f32 %v1903_v17, 0.0 }
 0x501   :  { %1995 = vmatmul.f32.gmra.mxu1 %v1936_v21 }
 0x506   :  { %v1906_v34 = vpop.f32.mrf.mxu0 }
 0x507   :  { %v1937_v39 = vmax.f32 %v1906_v34, 0.0 }
 0x509   :  { %1998 = vmatmul.f32.gmra.mxu1 %v1937_v39 }
 0x50e   :  { %v1909_v4 = vpop.f32.mrf.mxu0 }
 0x50f   :  { %v1938_v24 = vmax.f32 %v1909_v4, 0.0 }
 0x511   :  { %2001 = vmatmul.f32.gmra.mxu1 %v1938_v24 }
 0x516   :  { %v1912_v19 = vpop.f32.mrf.mxu0 }
 0x517   :  { %v1939_v43 = vmax.f32 %v1912_v19, 0.0 }
 0x519   :  { %2004 = vmatmul.f32.gmra.mxu1 %v1939_v43 }
 0x51e   :  { %v1915_v11 = vpop.f32.mrf.mxu0 }
 0x51f   :  { %v1940_v46 = vmax.f32 %v1915_v11, 0.0 }
 0x521   :  { %2007 = vmatmul.f32.gmra.mxu1 %v1940_v46 }
 0x526   :  { %v1918_v49 = vpop.f32.mrf.mxu0 }
 0x527   :  { %v1941_v26 = vmax.f32 %v1918_v49, 0.0 }
 0x529   :  { %2010 = vmatmul.f32.gmra.mxu1 %v1941_v26 }
 0x52e   :  { %v1921_v51 = vpop.f32.mrf.mxu0 }
 0x52f   :  { %v1942_v55 = vmax.f32 %v1921_v51, 0.0 }
 0x531   :  { %2013 = vmatmul.f32.gmra.mxu1 %v1942_v55 }
 0x536   :  { %v1924_v42 = vpop.f32.mrf.mxu0 }
 0x537   :  { %v1943_v56 = vmax.f32 %v1924_v42, 0.0 }
 0x539   :  { %2016 = vmatmul.f32.gmra.mxu1 %v1943_v56 }
 0x53e   :  { %v1927_v59 = vpop.f32.mrf.mxu0 }
 0x53f   :  { %v1944_v28 = vmax.f32 %v1927_v59, 0.0 }
 0x541   :  { %2019 = vmatmul.f32.gmra.mxu1 %v1944_v28 }
 0x54e   :  { %v1978_v31 = vpop.f32.mrf.mxu1 }
 0x54f   :  { %v2023_v60 = vmax.f32 %v1978_v31, 0.0 }
 0x551   :  { %2038 = vst [vmem:[%s3560_s7] sm:$0xff] %v2023_v60 }
 0x556   :  { %v1981_v32 = vpop.f32.mrf.mxu1 }
 0x557   :  { %v2024_v45 = vmax.f32 %v1981_v32, 0.0 }
 0x559   :  { %2039 = vst [vmem:[%s3560_s7 + $0x8] sm:$0xff] %v2024_v45 }
 0x55e   :  { %v1984_v10 = vpop.f32.mrf.mxu1 }
 0x55f   :  { %v2025_v58 = vmax.f32 %v1984_v10, 0.0 }
 0x561   :  { %2040 = vst [vmem:[%s3560_s7 + $0x10] sm:$0xff] %v2025_v58 }
 0x566   :  { %v1987_v5 = vpop.f32.mrf.mxu1 }
 0x567   :  { %v2026_v44 = vmax.f32 %v1987_v5, 0.0 }
 0x569   :  { %2041 = vst [vmem:[%s3560_s7 + $0x18] sm:$0xff] %v2026_v44 }
 0x56e   :  { %v1990_v1 = vpop.f32.mrf.mxu1 }
 0x56f   :  { %v2027_v61 = vmax.f32 %v1990_v1, 0.0 }
 0x571   :  { %2042 = vst [vmem:[%s3560_s7 + $0x20] sm:$0xff] %v2027_v61 }
 0x576   :  { %v1993_v54 = vpop.f32.mrf.mxu1 }
 0x577   :  { %v2028_v3 = vmax.f32 %v1993_v54, 0.0 }
 0x579   :  { %2043 = vst [vmem:[%s3560_s7 + $0x28] sm:$0xff] %v2028_v3 }
 0x57e   :  { %v1996_v6 = vpop.f32.mrf.mxu1 }
 0x57f   :  { %v2029_v7 = vmax.f32 %v1996_v6, 0.0 }
 0x581   :  { %2044 = vst [vmem:[%s3560_s7 + $0x30] sm:$0xff] %v2029_v7 }
 0x586   :  { %v1999_v41 = vpop.f32.mrf.mxu1 }
 0x587   :  { %v2030_v29 = vmax.f32 %v1999_v41, 0.0 }
 0x589   :  { %2045 = vst [vmem:[%s3560_s7 + $0x38] sm:$0xff] %v2030_v29 }
 0x58e   :  { %v2002_v0 = vpop.f32.mrf.mxu1 }
 0x58f   :  { %v2031_v38 = vmax.f32 %v2002_v0, 0.0 }
 0x591   :  { %2046 = vst [vmem:[%s3560_s7 + $0x40] sm:$0xff] %v2031_v38 }
 0x596   :  { %v2005_v14 = vpop.f32.mrf.mxu1 }
 0x597   :  { %v2032_v12 = vmax.f32 %v2005_v14, 0.0 }
 0x599   :  { %2047 = vst [vmem:[%s3560_s7 + $0x48] sm:$0xff] %v2032_v12 }
 0x59e   :  { %v2008_v33 = vpop.f32.mrf.mxu1 }
 0x59f   :  { %v2033_v48 = vmax.f32 %v2008_v33, 0.0 }
 0x5a1   :  { %2048 = vst [vmem:[%s3560_s7 + $0x50] sm:$0xff] %v2033_v48 }
 0x5a6   :  { %v2011_v40 = vpop.f32.mrf.mxu1 }
 0x5a7   :  { %v2034_v62 = vmax.f32 %v2011_v40, 0.0 }
 0x5a9   :  { %2049 = vst [vmem:[%s3560_s7 + $0x58] sm:$0xff] %v2034_v62 }
 0x5ae   :  { %v2014_v18 = vpop.f32.mrf.mxu1 }
 0x5af   :  { %v2035_v50 = vmax.f32 %v2014_v18, 0.0 }
 0x5b1   :  { %2050 = vst [vmem:[%s3560_s7 + $0x60] sm:$0xff] %v2035_v50 }
 0x5b6   :  { %v2017_v63 = vpop.f32.mrf.mxu1 }
 0x5b7   :  { %v2036_v47 = vmax.f32 %v2017_v63, 0.0 }
 0x5b9   :  { %2051 = vst [vmem:[%s3560_s7 + $0x68] sm:$0xff] %v2036_v47 }
 0x5be   :  { %v2020_v15 = vpop.f32.mrf.mxu1 }
 0x5bf   :  { %v2037_v9 = vmax.f32 %v2020_v15, 0.0 }
 0x5c1   :  { %2052 = vst [vmem:[%s3560_s7 + $0x70] sm:$0xff] %v2037_v9 }

</bundles_post_ra>
